<compile_context>
chip_gen: v7x
topology: tpu7x:2x2x1
jax: 0.10.0
libtpu: 0.0.40
codegen_flags: <defaults>
</compile_context>

<pallas_src>
import functools

import jax
import jax.numpy as jnp
import numpy as np
from jax.experimental import pallas as pl
from jax.experimental.pallas import tpu as pltpu

LANES = 128
PAD_L = 8   # interior column offset inside the halo buffer (keeps stores / centre loads 8-aligned)


def _round_up(v, m):
    return (v + m - 1) // m * m


# ---------------------------------------------------------------------------
# Fused ConvBlock kernel: for each sub-block: n x (3x3 same conv) -> pool -> act.
# ---------------------------------------------------------------------------
def _convblock_kernel(*refs, sub_cfg, Cp, pooling, activation):
    # refs = [x, w0, b0, w1, b1, ..., out, B, P]
    #   x   : (1, H0, W0, Cp)   f32  lane-padded NHWC input (one batch image)
    #   w_i : (9, Cp, Cp)       bf16 3x3 weights, tap-major (ky*3+kx)
    #   b_i : (1, Cp)           f32
    #   out : (1, Hf, Wf, Cp)   f32
    #   B   : (H0+2, W0+16, Cp) f32  VMEM halo buffer; image at rows [1,H+1), cols [PAD_L, PAD_L+W)
    #   P   : (H0*W0, Cp)       f32  VMEM staging buffer for the 2x2 pooling epilogue
    n_layers_total = sum(nl for (_, _, nl) in sub_cfg)
    x_ref = refs[0]
    o_ref = refs[1 + 2 * n_layers_total]
    B = refs[2 + 2 * n_layers_total]
    P = refs[3 + 2 * n_layers_total]

    H0, W0, _ = sub_cfg[0]
    Hb, Wb = H0 + 2, W0 + 2 * PAD_L
    f32 = jnp.float32

    # ---- one-time halo init: border-only zeroing, interior <- input ----------
    # (executed every grid step: each batch element / each TensorCore re-inits its
    #  own scratch, so there is no cross-batch leakage and no program_id gating.)
    B[:, 0:PAD_L, :] = jnp.zeros((Hb, PAD_L, Cp), f32)
    B[:, PAD_L + W0:Wb, :] = jnp.zeros((Hb, Wb - PAD_L - W0, Cp), f32)
    B[0:1, PAD_L:PAD_L + W0, :] = jnp.zeros((1, W0, Cp), f32)
    B[H0 + 1:H0 + 2, PAD_L:PAD_L + W0, :] = jnp.zeros((1, W0, Cp), f32)
    B[1:H0 + 1, PAD_L:PAD_L + W0, :] = x_ref[0]

    li_global = 0
    n_sub = len(sub_cfg)
    for s, (H, W, n_layers) in enumerate(sub_cfg):
        for li in range(n_layers):
            w_ref = refs[1 + 2 * li_global]
            b_ref = refs[2 + 2 * li_global]
            li_global += 1

            # 3x3 "same" conv: 9 lane-dense MXU matmuls accumulated in registers.
            # One shifted load per horizontal tap (kx); vertical taps (ky) are free
            # leading-axis slices of the loaded value.
            acc = jnp.broadcast_to(b_ref[...], (H * W, Cp)).astype(f32)
            for kx in range(3):
                col0 = PAD_L - 1 + kx
                x_sh = B[0:H + 2, col0:col0 + W, :].astype(jnp.bfloat16)  # (H+2, W, Cp)
                for ky in range(3):
                    patch = x_sh[ky:ky + H].reshape(H * W, Cp)
                    acc = acc + jnp.dot(patch, w_ref[ky * 3 + kx],
                                        preferred_element_type=f32)

            if li < n_layers - 1:
                # Intermediate conv layer: write result into the (aligned) interior
                # so it becomes the next layer's input. Halo border stays zero.
                B[1:H + 1, PAD_L:PAD_L + W, :] = acc.reshape(H, W, Cp)
                continue

            # ---- sub-block epilogue: 2x2 pool (stride 2) + activation ----------
            if pooling is None:
                Ho, Wo = H, W
                out = acc.reshape(H, W, Cp)
            else:
                Ho, Wo = H // 2, W // 2
                P[pl.ds(0, H * W), :] = acc                       # one store, then strided reads
                even = P[pl.ds(0, H * Wo, stride=2), :]           # columns w even
                odd = P[pl.ds(1, H * Wo, stride=2), :]            # columns w odd
                if pooling == "max":
                    wred = jnp.maximum(even, odd).reshape(Ho, 2, Wo, Cp)
                    out = jnp.maximum(wred[:, 0], wred[:, 1])     # row pairs
                else:  # avg
                    wred = (even + odd).reshape(Ho, 2, Wo, Cp)
                    out = (wred[:, 0] + wred[:, 1]) * 0.25
            if activation is not None:
                out = activation(out)

            if s == n_sub - 1:
                o_ref[...] = out[None].astype(o_ref.dtype)
            else:
                # Stage pooled activation for the next sub-block; re-zero only the
                # halo cells that were interior before (new bottom row + right strip).
                B[1:Ho + 1, PAD_L:PAD_L + Wo, :] = out.astype(f32)
                B[Ho + 1:Ho + 2, :, :] = jnp.zeros((1, Wb, Cp), f32)
                B[0:Ho + 2, PAD_L + Wo:PAD_L + Wo + PAD_L, :] = jnp.zeros(
                    (Ho + 2, PAD_L, Cp), f32)


# ---------------------------------------------------------------------------
# Parameters: PyTorch-like nn.Conv2d init (HWIO weights), plus lane-dense repack.
# ---------------------------------------------------------------------------
def init_conv_block_params(key, channels_all):
    params = []
    for channels in channels_all:
        sub = []
        for cin, cout in zip(channels, channels[1:]):
            key, kw, kb = jax.random.split(key, 3)
            bound = 1.0 / np.sqrt(cin * 9)
            w = jax.random.uniform(kw, (3, 3, cin, cout), jnp.float32, -bound, bound)
            b = jax.random.uniform(kb, (1, cout), jnp.float32, -bound, bound)
            sub.append((w, b))
        params.append(sub)
    return params


def prepare_params(raw_params, lanes=LANES):
    """Lane-pad + repack: w (3,3,Cin,Cout)->(9,Cp,Cp) bf16, b (1,Cout)->(1,Cp) f32."""
    cmax = max(max(w.shape[2], w.shape[3]) for sub in raw_params for (w, _) in sub)
    cp = _round_up(cmax, lanes)
    padded = []
    for sub in raw_params:
        psub = []
        for (w, b) in sub:
            cin, cout = w.shape[2], w.shape[3]
            wp = jnp.zeros((3, 3, cp, cp), jnp.float32).at[:, :, :cin, :cout].set(w)
            bp = jnp.zeros((1, cp), jnp.float32).at[0, :cout].set(b.reshape(-1))
            psub.append((wp.reshape(9, cp, cp).astype(jnp.bfloat16), bp))
        padded.append(psub)
    return padded, cp


# ---------------------------------------------------------------------------
# ConvBlock.forward — NCHW in / NCHW out, like the PyTorch module.
# ---------------------------------------------------------------------------
def conv_block_forward(x_nchw, padded_params, cp, out_channels,
                       pooling_method="max", activation=None):
    N, C0, H0, W0 = x_nchw.shape
    # Entry repack (XLA): NCHW -> NHWC, channel axis zero-padded to cp lanes.
    x = jnp.transpose(x_nchw, (0, 2, 3, 1))
    x = jnp.pad(x, ((0, 0), (0, 0), (0, 0), (0, cp - C0))).astype(jnp.float32)

    # Static per-sub-block geometry.
    sub_cfg = []
    H, W = H0, W0
    for sub in padded_params:
        sub_cfg.append((H, W, len(sub)))
        if pooling_method in ("max", "avg"):
            assert H % 2 == 0 and W % 2 == 0
            H, W = H // 2, W // 2
        elif pooling_method is not None:
            raise ValueError(f"unknown pooling type {pooling_method}")
    Hf, Wf = H, W

    in_specs = [pl.BlockSpec((1, H0, W0, cp), lambda n: (n, 0, 0, 0))]
    args = [x]
    total_flops = 0
    weight_bytes = 0
    for (Hs, Ws, _), sub in zip(sub_cfg, padded_params):
        for (w, b) in sub:
            in_specs.append(pl.BlockSpec((9, cp, cp), lambda n: (0, 0, 0)))
            in_specs.append(pl.BlockSpec((1, cp), lambda n: (0, 0)))
            args.append(w)
            args.append(b)
            total_flops += 2 * Hs * Ws * 9 * cp * cp
            weight_bytes += w.size * w.dtype.itemsize + b.size * b.dtype.itemsize

    kernel = functools.partial(_convblock_kernel, sub_cfg=tuple(sub_cfg), Cp=cp,
                               pooling=pooling_method, activation=activation)

    out = pl.pallas_call(
        kernel,
        out_shape=jax.ShapeDtypeStruct((N, Hf, Wf, cp), jnp.float32),
        grid=(N,),
        in_specs=in_specs,
        out_specs=pl.BlockSpec((1, Hf, Wf, cp), lambda n: (n, 0, 0, 0)),
        scratch_shapes=[
            pltpu.VMEM((H0 + 2, W0 + 2 * PAD_L, cp), jnp.float32),  # halo activation buffer
            pltpu.VMEM((H0 * W0, cp), jnp.float32),                 # pooling staging buffer
        ],
        compiler_params=pltpu.CompilerParams(
            dimension_semantics=("parallel",),          # batch split across TensorCores
            vmem_limit_bytes=32 * 1024 * 1024,
        ),
        cost_estimate=pl.CostEstimate(
            flops=N * total_flops,
            transcendentals=0,
            bytes_accessed=int(x.size * 4 + weight_bytes + N * Hf * Wf * cp * 4),
        ),
    )(*args)
    out = out[..., :out_channels]
    return jnp.transpose(out, (0, 3, 1, 2))


# Plain-JAX f32 reference for verification.
def reference_forward(x_nchw, raw_params, pooling_method="max", activation=None):
    x = jnp.transpose(x_nchw, (0, 2, 3, 1))
    for sub in raw_params:
        for (w, b) in sub:
            x = jax.lax.conv_general_dilated(
                x, w, (1, 1), "SAME",
                dimension_numbers=("NHWC", "HWIO", "NHWC")) + b.reshape(1, 1, 1, -1)
        if pooling_method == "max":
            x = jax.lax.reduce_window(x, -jnp.inf, jax.lax.max,
                                      (1, 2, 2, 1), (1, 2, 2, 1), "VALID")
        elif pooling_method == "avg":
            x = jax.lax.reduce_window(x, 0.0, jax.lax.add,
                                      (1, 2, 2, 1), (1, 2, 2, 1), "VALID") / 4.0
        if activation is not None:
            x = activation(x)
    return jnp.transpose(x, (0, 3, 1, 2))


if __name__ == "__main__":
    key = jax.random.PRNGKey(0)
    kx, kp = jax.random.split(key)

    # ConvBlock(channels_all=[[4, 8, 8], [8, 16]], pooling_method='max', activation=None)
    channels_all = [[4, 8, 8], [8, 16]]
    x = jax.random.normal(kx, (2, 4, 16, 16), jnp.float32)   # NCHW, like PyTorch
    raw_params = init_conv_block_params(kp, channels_all)
    padded_params, cp = prepare_params(raw_params)
    out_channels = channels_all[-1][-1]

    out = conv_block_forward(x, padded_params, cp, out_channels,
                             pooling_method="max", activation=None)
    out = jax.block_until_ready(out)
    assert out.shape == (2, 16, 4, 4), out.shape

    ref = reference_forward(x, raw_params, pooling_method="max")
    # bf16 weights / bf16 MXU operands (f32 accumulation) -> relaxed tolerance.
    np.testing.assert_allclose(np.asarray(out), np.asarray(ref), rtol=2e-2, atol=2e-2)
    print("KERNEL_OK")
</pallas_src>

<mosaic_0001>
module attributes {stable_mosaic.version = 11 : i64} {
  func.func @_convblock_kernel(%arg0: i32, %arg1: memref<1x16x16x128xf32, #tpu.memory_space<vmem>>, %arg2: memref<9x128x128xbf16, #tpu.memory_space<vmem>>, %arg3: memref<1x128xf32, #tpu.memory_space<vmem>>, %arg4: memref<9x128x128xbf16, #tpu.memory_space<vmem>>, %arg5: memref<1x128xf32, #tpu.memory_space<vmem>>, %arg6: memref<9x128x128xbf16, #tpu.memory_space<vmem>>, %arg7: memref<1x128xf32, #tpu.memory_space<vmem>>, %arg8: memref<1x4x4x128xf32, #tpu.memory_space<vmem>>, %arg9: memref<18x32x128xf32, #tpu.memory_space<vmem>>, %arg10: memref<256x128xf32, #tpu.memory_space<vmem>>) attributes {dimension_semantics = [#tpu.dimension_semantics<parallel>], iteration_bounds = array<i64: 2>, scalar_prefetch = 0 : i64, scratch_operands = 2 : i64, tpu.core_type = #tpu.core_type<tc>, window_params = [{transform_indices = @transform_0, window_bounds = array<i64: 1, 16, 16, 128>}, {pipeline_mode = #tpu.pipeline_mode<synchronous>, transform_indices = @transform_1, window_bounds = array<i64: 9, 128, 128>}, {pipeline_mode = #tpu.pipeline_mode<synchronous>, transform_indices = @transform_2, window_bounds = array<i64: 1, 128>}, {pipeline_mode = #tpu.pipeline_mode<synchronous>, transform_indices = @transform_3, window_bounds = array<i64: 9, 128, 128>}, {pipeline_mode = #tpu.pipeline_mode<synchronous>, transform_indices = @transform_4, window_bounds = array<i64: 1, 128>}, {pipeline_mode = #tpu.pipeline_mode<synchronous>, transform_indices = @transform_5, window_bounds = array<i64: 9, 128, 128>}, {pipeline_mode = #tpu.pipeline_mode<synchronous>, transform_indices = @transform_6, window_bounds = array<i64: 1, 128>}, {transform_indices = @transform_7, window_bounds = array<i64: 1, 4, 4, 128>}]} {
    %cst = arith.constant 0.000000e+00 : f32
    %0 = vector.broadcast %cst : f32 to vector<18x8x128xf32>
    %c0 = arith.constant 0 : index
    %c0_0 = arith.constant 0 : index
    %c0_1 = arith.constant 0 : index
    %1 = vector.load %arg9[%c0, %c0_0, %c0_1] : memref<18x32x128xf32, #tpu.memory_space<vmem>>, vector<18x8x128xf32>
    tpu.vector_store %arg9[%c0, %c0_0, %c0_1], %0 {strides = array<i32>} : memref<18x32x128xf32, #tpu.memory_space<vmem>>, vector<18x8x128xf32>,
    %cst_2 = arith.constant 0.000000e+00 : f32
    %2 = vector.broadcast %cst_2 : f32 to vector<18x8x128xf32>
    %c0_3 = arith.constant 0 : index
    %c24 = arith.constant 24 : index
    %c0_4 = arith.constant 0 : index
    %3 = vector.load %arg9[%c0_3, %c24, %c0_4] : memref<18x32x128xf32, #tpu.memory_space<vmem>>, vector<18x8x128xf32>
    tpu.vector_store %arg9[%c0_3, %c24, %c0_4], %2 {strides = array<i32>} : memref<18x32x128xf32, #tpu.memory_space<vmem>>, vector<18x8x128xf32>,
    %cst_5 = arith.constant 0.000000e+00 : f32
    %4 = vector.broadcast %cst_5 : f32 to vector<1x16x128xf32>
    %c0_6 = arith.constant 0 : index
    %c8 = arith.constant 8 : index
    %c0_7 = arith.constant 0 : index
    %5 = vector.load %arg9[%c0_6, %c8, %c0_7] : memref<18x32x128xf32, #tpu.memory_space<vmem>>, vector<1x16x128xf32>
    tpu.vector_store %arg9[%c0_6, %c8, %c0_7], %4 {strides = array<i32>} : memref<18x32x128xf32, #tpu.memory_space<vmem>>, vector<1x16x128xf32>,
    %cst_8 = arith.constant 0.000000e+00 : f32
    %6 = vector.broadcast %cst_8 : f32 to vector<1x16x128xf32>
    %c17 = arith.constant 17 : index
    %c8_9 = arith.constant 8 : index
    %c0_10 = arith.constant 0 : index
    %7 = vector.load %arg9[%c17, %c8_9, %c0_10] : memref<18x32x128xf32, #tpu.memory_space<vmem>>, vector<1x16x128xf32>
    tpu.vector_store %arg9[%c17, %c8_9, %c0_10], %6 {strides = array<i32>} : memref<18x32x128xf32, #tpu.memory_space<vmem>>, vector<1x16x128xf32>,
    %c0_11 = arith.constant 0 : index
    %c0_12 = arith.constant 0 : index
    %c0_13 = arith.constant 0 : index
    %c0_14 = arith.constant 0 : index
    %8 = vector.load %arg1[%c0_11, %c0_12, %c0_13, %c0_14] : memref<1x16x16x128xf32, #tpu.memory_space<vmem>>, vector<1x16x16x128xf32>
    %9 = vector.shape_cast %8 : vector<1x16x16x128xf32> to vector<16x16x128xf32>
    %c1 = arith.constant 1 : index
    %c8_15 = arith.constant 8 : index
    %c0_16 = arith.constant 0 : index
    %10 = vector.load %arg9[%c1, %c8_15, %c0_16] : memref<18x32x128xf32, #tpu.memory_space<vmem>>, vector<16x16x128xf32>
    tpu.vector_store %arg9[%c1, %c8_15, %c0_16], %9 {strides = array<i32>} : memref<18x32x128xf32, #tpu.memory_space<vmem>>, vector<16x16x128xf32>,
    %c0_17 = arith.constant 0 : index
    %c0_18 = arith.constant 0 : index
    %11 = vector.load %arg3[%c0_17, %c0_18] : memref<1x128xf32, #tpu.memory_space<vmem>>, vector<1x128xf32>
    %12 = vector.shape_cast %11 : vector<1x128xf32> to vector<1x128xf32>
    %13 = vector.broadcast %12 : vector<1x128xf32> to vector<256x128xf32>
    %c0_19 = arith.constant 0 : index
    %c7 = arith.constant 7 : index
    %c0_20 = arith.constant 0 : index
    %14 = vector.load %arg9[%c0_19, %c7, %c0_20] : memref<18x32x128xf32, #tpu.memory_space<vmem>>, vector<18x16x128xf32>
    %15 = arith.truncf %14 : vector<18x16x128xf32> to vector<18x16x128xbf16>
    %16 = vector.extract_strided_slice %15 {offsets = [0, 0, 0], sizes = [16, 16, 128], strides = [1, 1, 1]} : vector<18x16x128xbf16> to vector<16x16x128xbf16>
    %17 = vector.shape_cast %16 : vector<16x16x128xbf16> to vector<256x128xbf16>
    %c0_21 = arith.constant 0 : index
    %c0_22 = arith.constant 0 : index
    %c0_23 = arith.constant 0 : index
    %18 = vector.load %arg2[%c0_21, %c0_22, %c0_23] : memref<9x128x128xbf16, #tpu.memory_space<vmem>>, vector<1x128x128xbf16>
    %19 = vector.shape_cast %18 : vector<1x128x128xbf16> to vector<128x128xbf16>
    %cst_24 = arith.constant dense<0.000000e+00> : vector<256x128xf32>
    %20 = tpu.matmul %17, %19, %cst_24 {dimension_numbers = #tpu.dot_dimension_numbers<[1], [0], [0], [1], [0, 0, 1, 1], [], []>} : vector<256x128xbf16>, vector<128x128xbf16>, vector<256x128xf32> -> vector<256x128xf32>
    %21 = arith.addf %13, %20 : vector<256x128xf32>
    %22 = vector.extract_strided_slice %15 {offsets = [1, 0, 0], sizes = [16, 16, 128], strides = [1, 1, 1]} : vector<18x16x128xbf16> to vector<16x16x128xbf16>
    %23 = vector.shape_cast %22 : vector<16x16x128xbf16> to vector<256x128xbf16>
    %c3 = arith.constant 3 : index
    %c0_25 = arith.constant 0 : index
    %c0_26 = arith.constant 0 : index
    %24 = vector.load %arg2[%c3, %c0_25, %c0_26] : memref<9x128x128xbf16, #tpu.memory_space<vmem>>, vector<1x128x128xbf16>
    %25 = vector.shape_cast %24 : vector<1x128x128xbf16> to vector<128x128xbf16>
    %cst_27 = arith.constant dense<0.000000e+00> : vector<256x128xf32>
    %26 = tpu.matmul %23, %25, %cst_27 {dimension_numbers = #tpu.dot_dimension_numbers<[1], [0], [0], [1], [0, 0, 1, 1], [], []>} : vector<256x128xbf16>, vector<128x128xbf16>, vector<256x128xf32> -> vector<256x128xf32>
    %27 = arith.addf %21, %26 : vector<256x128xf32>
    %28 = vector.extract_strided_slice %15 {offsets = [2, 0, 0], sizes = [16, 16, 128], strides = [1, 1, 1]} : vector<18x16x128xbf16> to vector<16x16x128xbf16>
    %29 = vector.shape_cast %28 : vector<16x16x128xbf16> to vector<256x128xbf16>
    %c6 = arith.constant 6 : index
    %c0_28 = arith.constant 0 : index
    %c0_29 = arith.constant 0 : index
    %30 = vector.load %arg2[%c6, %c0_28, %c0_29] : memref<9x128x128xbf16, #tpu.memory_space<vmem>>, vector<1x128x128xbf16>
    %31 = vector.shape_cast %30 : vector<1x128x128xbf16> to vector<128x128xbf16>
    %cst_30 = arith.constant dense<0.000000e+00> : vector<256x128xf32>
    %32 = tpu.matmul %29, %31, %cst_30 {dimension_numbers = #tpu.dot_dimension_numbers<[1], [0], [0], [1], [0, 0, 1, 1], [], []>} : vector<256x128xbf16>, vector<128x128xbf16>, vector<256x128xf32> -> vector<256x128xf32>
    %33 = arith.addf %27, %32 : vector<256x128xf32>
    %c0_31 = arith.constant 0 : index
    %c8_32 = arith.constant 8 : index
    %c0_33 = arith.constant 0 : index
    %34 = vector.load %arg9[%c0_31, %c8_32, %c0_33] : memref<18x32x128xf32, #tpu.memory_space<vmem>>, vector<18x16x128xf32>
    %35 = arith.truncf %34 : vector<18x16x128xf32> to vector<18x16x128xbf16>
    %36 = vector.extract_strided_slice %35 {offsets = [0, 0, 0], sizes = [16, 16, 128], strides = [1, 1, 1]} : vector<18x16x128xbf16> to vector<16x16x128xbf16>
    %37 = vector.shape_cast %36 : vector<16x16x128xbf16> to vector<256x128xbf16>
    %c1_34 = arith.constant 1 : index
    %c0_35 = arith.constant 0 : index
    %c0_36 = arith.constant 0 : index
    %38 = vector.load %arg2[%c1_34, %c0_35, %c0_36] : memref<9x128x128xbf16, #tpu.memory_space<vmem>>, vector<1x128x128xbf16>
    %39 = vector.shape_cast %38 : vector<1x128x128xbf16> to vector<128x128xbf16>
    %cst_37 = arith.constant dense<0.000000e+00> : vector<256x128xf32>
    %40 = tpu.matmul %37, %39, %cst_37 {dimension_numbers = #tpu.dot_dimension_numbers<[1], [0], [0], [1], [0, 0, 1, 1], [], []>} : vector<256x128xbf16>, vector<128x128xbf16>, vector<256x128xf32> -> vector<256x128xf32>
    %41 = arith.addf %33, %40 : vector<256x128xf32>
    %42 = vector.extract_strided_slice %35 {offsets = [1, 0, 0], sizes = [16, 16, 128], strides = [1, 1, 1]} : vector<18x16x128xbf16> to vector<16x16x128xbf16>
    %43 = vector.shape_cast %42 : vector<16x16x128xbf16> to vector<256x128xbf16>
    %c4 = arith.constant 4 : index
    %c0_38 = arith.constant 0 : index
    %c0_39 = arith.constant 0 : index
    %44 = vector.load %arg2[%c4, %c0_38, %c0_39] : memref<9x128x128xbf16, #tpu.memory_space<vmem>>, vector<1x128x128xbf16>
    %45 = vector.shape_cast %44 : vector<1x128x128xbf16> to vector<128x128xbf16>
    %cst_40 = arith.constant dense<0.000000e+00> : vector<256x128xf32>
    %46 = tpu.matmul %43, %45, %cst_40 {dimension_numbers = #tpu.dot_dimension_numbers<[1], [0], [0], [1], [0, 0, 1, 1], [], []>} : vector<256x128xbf16>, vector<128x128xbf16>, vector<256x128xf32> -> vector<256x128xf32>
    %47 = arith.addf %41, %46 : vector<256x128xf32>
    %48 = vector.extract_strided_slice %35 {offsets = [2, 0, 0], sizes = [16, 16, 128], strides = [1, 1, 1]} : vector<18x16x128xbf16> to vector<16x16x128xbf16>
    %49 = vector.shape_cast %48 : vector<16x16x128xbf16> to vector<256x128xbf16>
    %c7_41 = arith.constant 7 : index
    %c0_42 = arith.constant 0 : index
    %c0_43 = arith.constant 0 : index
    %50 = vector.load %arg2[%c7_41, %c0_42, %c0_43] : memref<9x128x128xbf16, #tpu.memory_space<vmem>>, vector<1x128x128xbf16>
    %51 = vector.shape_cast %50 : vector<1x128x128xbf16> to vector<128x128xbf16>
    %cst_44 = arith.constant dense<0.000000e+00> : vector<256x128xf32>
    %52 = tpu.matmul %49, %51, %cst_44 {dimension_numbers = #tpu.dot_dimension_numbers<[1], [0], [0], [1], [0, 0, 1, 1], [], []>} : vector<256x128xbf16>, vector<128x128xbf16>, vector<256x128xf32> -> vector<256x128xf32>
    %53 = arith.addf %47, %52 : vector<256x128xf32>
    %c0_45 = arith.constant 0 : index
    %c9 = arith.constant 9 : index
    %c0_46 = arith.constant 0 : index
    %54 = vector.load %arg9[%c0_45, %c9, %c0_46] : memref<18x32x128xf32, #tpu.memory_space<vmem>>, vector<18x16x128xf32>
    %55 = arith.truncf %54 : vector<18x16x128xf32> to vector<18x16x128xbf16>
    %56 = vector.extract_strided_slice %55 {offsets = [0, 0, 0], sizes = [16, 16, 128], strides = [1, 1, 1]} : vector<18x16x128xbf16> to vector<16x16x128xbf16>
    %57 = vector.shape_cast %56 : vector<16x16x128xbf16> to vector<256x128xbf16>
    %c2 = arith.constant 2 : index
    %c0_47 = arith.constant 0 : index
    %c0_48 = arith.constant 0 : index
    %58 = vector.load %arg2[%c2, %c0_47, %c0_48] : memref<9x128x128xbf16, #tpu.memory_space<vmem>>, vector<1x128x128xbf16>
    %59 = vector.shape_cast %58 : vector<1x128x128xbf16> to vector<128x128xbf16>
    %cst_49 = arith.constant dense<0.000000e+00> : vector<256x128xf32>
    %60 = tpu.matmul %57, %59, %cst_49 {dimension_numbers = #tpu.dot_dimension_numbers<[1], [0], [0], [1], [0, 0, 1, 1], [], []>} : vector<256x128xbf16>, vector<128x128xbf16>, vector<256x128xf32> -> vector<256x128xf32>
    %61 = arith.addf %53, %60 : vector<256x128xf32>
    %62 = vector.extract_strided_slice %55 {offsets = [1, 0, 0], sizes = [16, 16, 128], strides = [1, 1, 1]} : vector<18x16x128xbf16> to vector<16x16x128xbf16>
    %63 = vector.shape_cast %62 : vector<16x16x128xbf16> to vector<256x128xbf16>
    %c5 = arith.constant 5 : index
    %c0_50 = arith.constant 0 : index
    %c0_51 = arith.constant 0 : index
    %64 = vector.load %arg2[%c5, %c0_50, %c0_51] : memref<9x128x128xbf16, #tpu.memory_space<vmem>>, vector<1x128x128xbf16>
    %65 = vector.shape_cast %64 : vector<1x128x128xbf16> to vector<128x128xbf16>
    %cst_52 = arith.constant dense<0.000000e+00> : vector<256x128xf32>
    %66 = tpu.matmul %63, %65, %cst_52 {dimension_numbers = #tpu.dot_dimension_numbers<[1], [0], [0], [1], [0, 0, 1, 1], [], []>} : vector<256x128xbf16>, vector<128x128xbf16>, vector<256x128xf32> -> vector<256x128xf32>
    %67 = arith.addf %61, %66 : vector<256x128xf32>
    %68 = vector.extract_strided_slice %55 {offsets = [2, 0, 0], sizes = [16, 16, 128], strides = [1, 1, 1]} : vector<18x16x128xbf16> to vector<16x16x128xbf16>
    %69 = vector.shape_cast %68 : vector<16x16x128xbf16> to vector<256x128xbf16>
    %c8_53 = arith.constant 8 : index
    %c0_54 = arith.constant 0 : index
    %c0_55 = arith.constant 0 : index
    %70 = vector.load %arg2[%c8_53, %c0_54, %c0_55] : memref<9x128x128xbf16, #tpu.memory_space<vmem>>, vector<1x128x128xbf16>
    %71 = vector.shape_cast %70 : vector<1x128x128xbf16> to vector<128x128xbf16>
    %cst_56 = arith.constant dense<0.000000e+00> : vector<256x128xf32>
    %72 = tpu.matmul %69, %71, %cst_56 {dimension_numbers = #tpu.dot_dimension_numbers<[1], [0], [0], [1], [0, 0, 1, 1], [], []>} : vector<256x128xbf16>, vector<128x128xbf16>, vector<256x128xf32> -> vector<256x128xf32>
    %73 = arith.addf %67, %72 : vector<256x128xf32>
    %74 = vector.shape_cast %73 : vector<256x128xf32> to vector<16x16x128xf32>
    %c1_57 = arith.constant 1 : index
    %c8_58 = arith.constant 8 : index
    %c0_59 = arith.constant 0 : index
    %75 = vector.load %arg9[%c1_57, %c8_58, %c0_59] : memref<18x32x128xf32, #tpu.memory_space<vmem>>, vector<16x16x128xf32>
    tpu.vector_store %arg9[%c1_57, %c8_58, %c0_59], %74 {strides = array<i32>} : memref<18x32x128xf32, #tpu.memory_space<vmem>>, vector<16x16x128xf32>,
    %c0_60 = arith.constant 0 : index
    %c0_61 = arith.constant 0 : index
    %76 = vector.load %arg5[%c0_60, %c0_61] : memref<1x128xf32, #tpu.memory_space<vmem>>, vector<1x128xf32>
    %77 = vector.shape_cast %76 : vector<1x128xf32> to vector<1x128xf32>
    %78 = vector.broadcast %77 : vector<1x128xf32> to vector<256x128xf32>
    %c0_62 = arith.constant 0 : index
    %c7_63 = arith.constant 7 : index
    %c0_64 = arith.constant 0 : index
    %79 = vector.load %arg9[%c0_62, %c7_63, %c0_64] : memref<18x32x128xf32, #tpu.memory_space<vmem>>, vector<18x16x128xf32>
    %80 = arith.truncf %79 : vector<18x16x128xf32> to vector<18x16x128xbf16>
    %81 = vector.extract_strided_slice %80 {offsets = [0, 0, 0], sizes = [16, 16, 128], strides = [1, 1, 1]} : vector<18x16x128xbf16> to vector<16x16x128xbf16>
    %82 = vector.shape_cast %81 : vector<16x16x128xbf16> to vector<256x128xbf16>
    %c0_65 = arith.constant 0 : index
    %c0_66 = arith.constant 0 : index
    %c0_67 = arith.constant 0 : index
    %83 = vector.load %arg4[%c0_65, %c0_66, %c0_67] : memref<9x128x128xbf16, #tpu.memory_space<vmem>>, vector<1x128x128xbf16>
    %84 = vector.shape_cast %83 : vector<1x128x128xbf16> to vector<128x128xbf16>
    %cst_68 = arith.constant dense<0.000000e+00> : vector<256x128xf32>
    %85 = tpu.matmul %82, %84, %cst_68 {dimension_numbers = #tpu.dot_dimension_numbers<[1], [0], [0], [1], [0, 0, 1, 1], [], []>} : vector<256x128xbf16>, vector<128x128xbf16>, vector<256x128xf32> -> vector<256x128xf32>
    %86 = arith.addf %78, %85 : vector<256x128xf32>
    %87 = vector.extract_strided_slice %80 {offsets = [1, 0, 0], sizes = [16, 16, 128], strides = [1, 1, 1]} : vector<18x16x128xbf16> to vector<16x16x128xbf16>
    %88 = vector.shape_cast %87 : vector<16x16x128xbf16> to vector<256x128xbf16>
    %c3_69 = arith.constant 3 : index
    %c0_70 = arith.constant 0 : index
    %c0_71 = arith.constant 0 : index
    %89 = vector.load %arg4[%c3_69, %c0_70, %c0_71] : memref<9x128x128xbf16, #tpu.memory_space<vmem>>, vector<1x128x128xbf16>
    %90 = vector.shape_cast %89 : vector<1x128x128xbf16> to vector<128x128xbf16>
    %cst_72 = arith.constant dense<0.000000e+00> : vector<256x128xf32>
    %91 = tpu.matmul %88, %90, %cst_72 {dimension_numbers = #tpu.dot_dimension_numbers<[1], [0], [0], [1], [0, 0, 1, 1], [], []>} : vector<256x128xbf16>, vector<128x128xbf16>, vector<256x128xf32> -> vector<256x128xf32>
    %92 = arith.addf %86, %91 : vector<256x128xf32>
    %93 = vector.extract_strided_slice %80 {offsets = [2, 0, 0], sizes = [16, 16, 128], strides = [1, 1, 1]} : vector<18x16x128xbf16> to vector<16x16x128xbf16>
    %94 = vector.shape_cast %93 : vector<16x16x128xbf16> to vector<256x128xbf16>
    %c6_73 = arith.constant 6 : index
    %c0_74 = arith.constant 0 : index
    %c0_75 = arith.constant 0 : index
    %95 = vector.load %arg4[%c6_73, %c0_74, %c0_75] : memref<9x128x128xbf16, #tpu.memory_space<vmem>>, vector<1x128x128xbf16>
    %96 = vector.shape_cast %95 : vector<1x128x128xbf16> to vector<128x128xbf16>
    %cst_76 = arith.constant dense<0.000000e+00> : vector<256x128xf32>
    %97 = tpu.matmul %94, %96, %cst_76 {dimension_numbers = #tpu.dot_dimension_numbers<[1], [0], [0], [1], [0, 0, 1, 1], [], []>} : vector<256x128xbf16>, vector<128x128xbf16>, vector<256x128xf32> -> vector<256x128xf32>
    %98 = arith.addf %92, %97 : vector<256x128xf32>
    %c0_77 = arith.constant 0 : index
    %c8_78 = arith.constant 8 : index
    %c0_79 = arith.constant 0 : index
    %99 = vector.load %arg9[%c0_77, %c8_78, %c0_79] : memref<18x32x128xf32, #tpu.memory_space<vmem>>, vector<18x16x128xf32>
    %100 = arith.truncf %99 : vector<18x16x128xf32> to vector<18x16x128xbf16>
    %101 = vector.extract_strided_slice %100 {offsets = [0, 0, 0], sizes = [16, 16, 128], strides = [1, 1, 1]} : vector<18x16x128xbf16> to vector<16x16x128xbf16>
    %102 = vector.shape_cast %101 : vector<16x16x128xbf16> to vector<256x128xbf16>
    %c1_80 = arith.constant 1 : index
    %c0_81 = arith.constant 0 : index
    %c0_82 = arith.constant 0 : index
    %103 = vector.load %arg4[%c1_80, %c0_81, %c0_82] : memref<9x128x128xbf16, #tpu.memory_space<vmem>>, vector<1x128x128xbf16>
    %104 = vector.shape_cast %103 : vector<1x128x128xbf16> to vector<128x128xbf16>
    %cst_83 = arith.constant dense<0.000000e+00> : vector<256x128xf32>
    %105 = tpu.matmul %102, %104, %cst_83 {dimension_numbers = #tpu.dot_dimension_numbers<[1], [0], [0], [1], [0, 0, 1, 1], [], []>} : vector<256x128xbf16>, vector<128x128xbf16>, vector<256x128xf32> -> vector<256x128xf32>
    %106 = arith.addf %98, %105 : vector<256x128xf32>
    %107 = vector.extract_strided_slice %100 {offsets = [1, 0, 0], sizes = [16, 16, 128], strides = [1, 1, 1]} : vector<18x16x128xbf16> to vector<16x16x128xbf16>
    %108 = vector.shape_cast %107 : vector<16x16x128xbf16> to vector<256x128xbf16>
    %c4_84 = arith.constant 4 : index
    %c0_85 = arith.constant 0 : index
    %c0_86 = arith.constant 0 : index
    %109 = vector.load %arg4[%c4_84, %c0_85, %c0_86] : memref<9x128x128xbf16, #tpu.memory_space<vmem>>, vector<1x128x128xbf16>
    %110 = vector.shape_cast %109 : vector<1x128x128xbf16> to vector<128x128xbf16>
    %cst_87 = arith.constant dense<0.000000e+00> : vector<256x128xf32>
    %111 = tpu.matmul %108, %110, %cst_87 {dimension_numbers = #tpu.dot_dimension_numbers<[1], [0], [0], [1], [0, 0, 1, 1], [], []>} : vector<256x128xbf16>, vector<128x128xbf16>, vector<256x128xf32> -> vector<256x128xf32>
    %112 = arith.addf %106, %111 : vector<256x128xf32>
    %113 = vector.extract_strided_slice %100 {offsets = [2, 0, 0], sizes = [16, 16, 128], strides = [1, 1, 1]} : vector<18x16x128xbf16> to vector<16x16x128xbf16>
    %114 = vector.shape_cast %113 : vector<16x16x128xbf16> to vector<256x128xbf16>
    %c7_88 = arith.constant 7 : index
    %c0_89 = arith.constant 0 : index
    %c0_90 = arith.constant 0 : index
    %115 = vector.load %arg4[%c7_88, %c0_89, %c0_90] : memref<9x128x128xbf16, #tpu.memory_space<vmem>>, vector<1x128x128xbf16>
    %116 = vector.shape_cast %115 : vector<1x128x128xbf16> to vector<128x128xbf16>
    %cst_91 = arith.constant dense<0.000000e+00> : vector<256x128xf32>
    %117 = tpu.matmul %114, %116, %cst_91 {dimension_numbers = #tpu.dot_dimension_numbers<[1], [0], [0], [1], [0, 0, 1, 1], [], []>} : vector<256x128xbf16>, vector<128x128xbf16>, vector<256x128xf32> -> vector<256x128xf32>
    %118 = arith.addf %112, %117 : vector<256x128xf32>
    %c0_92 = arith.constant 0 : index
    %c9_93 = arith.constant 9 : index
    %c0_94 = arith.constant 0 : index
    %119 = vector.load %arg9[%c0_92, %c9_93, %c0_94] : memref<18x32x128xf32, #tpu.memory_space<vmem>>, vector<18x16x128xf32>
    %120 = arith.truncf %119 : vector<18x16x128xf32> to vector<18x16x128xbf16>
    %121 = vector.extract_strided_slice %120 {offsets = [0, 0, 0], sizes = [16, 16, 128], strides = [1, 1, 1]} : vector<18x16x128xbf16> to vector<16x16x128xbf16>
    %122 = vector.shape_cast %121 : vector<16x16x128xbf16> to vector<256x128xbf16>
    %c2_95 = arith.constant 2 : index
    %c0_96 = arith.constant 0 : index
    %c0_97 = arith.constant 0 : index
    %123 = vector.load %arg4[%c2_95, %c0_96, %c0_97] : memref<9x128x128xbf16, #tpu.memory_space<vmem>>, vector<1x128x128xbf16>
    %124 = vector.shape_cast %123 : vector<1x128x128xbf16> to vector<128x128xbf16>
    %cst_98 = arith.constant dense<0.000000e+00> : vector<256x128xf32>
    %125 = tpu.matmul %122, %124, %cst_98 {dimension_numbers = #tpu.dot_dimension_numbers<[1], [0], [0], [1], [0, 0, 1, 1], [], []>} : vector<256x128xbf16>, vector<128x128xbf16>, vector<256x128xf32> -> vector<256x128xf32>
    %126 = arith.addf %118, %125 : vector<256x128xf32>
    %127 = vector.extract_strided_slice %120 {offsets = [1, 0, 0], sizes = [16, 16, 128], strides = [1, 1, 1]} : vector<18x16x128xbf16> to vector<16x16x128xbf16>
    %128 = vector.shape_cast %127 : vector<16x16x128xbf16> to vector<256x128xbf16>
    %c5_99 = arith.constant 5 : index
    %c0_100 = arith.constant 0 : index
    %c0_101 = arith.constant 0 : index
    %129 = vector.load %arg4[%c5_99, %c0_100, %c0_101] : memref<9x128x128xbf16, #tpu.memory_space<vmem>>, vector<1x128x128xbf16>
    %130 = vector.shape_cast %129 : vector<1x128x128xbf16> to vector<128x128xbf16>
    %cst_102 = arith.constant dense<0.000000e+00> : vector<256x128xf32>
    %131 = tpu.matmul %128, %130, %cst_102 {dimension_numbers = #tpu.dot_dimension_numbers<[1], [0], [0], [1], [0, 0, 1, 1], [], []>} : vector<256x128xbf16>, vector<128x128xbf16>, vector<256x128xf32> -> vector<256x128xf32>
    %132 = arith.addf %126, %131 : vector<256x128xf32>
    %133 = vector.extract_strided_slice %120 {offsets = [2, 0, 0], sizes = [16, 16, 128], strides = [1, 1, 1]} : vector<18x16x128xbf16> to vector<16x16x128xbf16>
    %134 = vector.shape_cast %133 : vector<16x16x128xbf16> to vector<256x128xbf16>
    %c8_103 = arith.constant 8 : index
    %c0_104 = arith.constant 0 : index
    %c0_105 = arith.constant 0 : index
    %135 = vector.load %arg4[%c8_103, %c0_104, %c0_105] : memref<9x128x128xbf16, #tpu.memory_space<vmem>>, vector<1x128x128xbf16>
    %136 = vector.shape_cast %135 : vector<1x128x128xbf16> to vector<128x128xbf16>
    %cst_106 = arith.constant dense<0.000000e+00> : vector<256x128xf32>
    %137 = tpu.matmul %134, %136, %cst_106 {dimension_numbers = #tpu.dot_dimension_numbers<[1], [0], [0], [1], [0, 0, 1, 1], [], []>} : vector<256x128xbf16>, vector<128x128xbf16>, vector<256x128xf32> -> vector<256x128xf32>
    %138 = arith.addf %132, %137 : vector<256x128xf32>
    %c0_107 = arith.constant 0 : index
    %c0_108 = arith.constant 0 : index
    %139 = vector.load %arg10[%c0_107, %c0_108] : memref<256x128xf32, #tpu.memory_space<vmem>>, vector<256x128xf32>
    tpu.vector_store %arg10[%c0_107, %c0_108], %138 {strides = array<i32>} : memref<256x128xf32, #tpu.memory_space<vmem>>, vector<256x128xf32>,
    %c0_109 = arith.constant 0 : index
    %c0_110 = arith.constant 0 : index
    %140 = tpu.strided_load %arg10[%c0_109, %c0_110] {strides = array<i32: 2, 1>} : memref<256x128xf32, #tpu.memory_space<vmem>>, vector<128x128xf32>
    %c1_111 = arith.constant 1 : index
    %c0_112 = arith.constant 0 : index
    %141 = tpu.strided_load %arg10[%c1_111, %c0_112] {strides = array<i32: 2, 1>} : memref<256x128xf32, #tpu.memory_space<vmem>>, vector<128x128xf32>
    %142 = arith.maximumf %140, %141 : vector<128x128xf32>
    %143 = vector.shape_cast %142 : vector<128x128xf32> to vector<8x2x8x128xf32>
    %144 = vector.extract_strided_slice %143 {offsets = [0, 0, 0, 0], sizes = [8, 1, 8, 128], strides = [1, 1, 1, 1]} : vector<8x2x8x128xf32> to vector<8x1x8x128xf32>
    %145 = vector.shape_cast %144 : vector<8x1x8x128xf32> to vector<8x8x128xf32>
    %146 = vector.extract_strided_slice %143 {offsets = [0, 1, 0, 0], sizes = [8, 1, 8, 128], strides = [1, 1, 1, 1]} : vector<8x2x8x128xf32> to vector<8x1x8x128xf32>
    %147 = vector.shape_cast %146 : vector<8x1x8x128xf32> to vector<8x8x128xf32>
    %148 = arith.maximumf %145, %147 : vector<8x8x128xf32>
    %c1_113 = arith.constant 1 : index
    %c8_114 = arith.constant 8 : index
    %c0_115 = arith.constant 0 : index
    %149 = vector.load %arg9[%c1_113, %c8_114, %c0_115] : memref<18x32x128xf32, #tpu.memory_space<vmem>>, vector<8x8x128xf32>
    tpu.vector_store %arg9[%c1_113, %c8_114, %c0_115], %148 {strides = array<i32>} : memref<18x32x128xf32, #tpu.memory_space<vmem>>, vector<8x8x128xf32>,
    %cst_116 = arith.constant 0.000000e+00 : f32
    %150 = vector.broadcast %cst_116 : f32 to vector<1x32x128xf32>
    %c9_117 = arith.constant 9 : index
    %c0_118 = arith.constant 0 : index
    %c0_119 = arith.constant 0 : index
    %151 = vector.load %arg9[%c9_117, %c0_118, %c0_119] : memref<18x32x128xf32, #tpu.memory_space<vmem>>, vector<1x32x128xf32>
    tpu.vector_store %arg9[%c9_117, %c0_118, %c0_119], %150 {strides = array<i32>} : memref<18x32x128xf32, #tpu.memory_space<vmem>>, vector<1x32x128xf32>,
    %cst_120 = arith.constant 0.000000e+00 : f32
    %152 = vector.broadcast %cst_120 : f32 to vector<10x8x128xf32>
    %c0_121 = arith.constant 0 : index
    %c16 = arith.constant 16 : index
    %c0_122 = arith.constant 0 : index
    %153 = vector.load %arg9[%c0_121, %c16, %c0_122] : memref<18x32x128xf32, #tpu.memory_space<vmem>>, vector<10x8x128xf32>
    tpu.vector_store %arg9[%c0_121, %c16, %c0_122], %152 {strides = array<i32>} : memref<18x32x128xf32, #tpu.memory_space<vmem>>, vector<10x8x128xf32>,
    %c0_123 = arith.constant 0 : index
    %c0_124 = arith.constant 0 : index
    %154 = vector.load %arg7[%c0_123, %c0_124] : memref<1x128xf32, #tpu.memory_space<vmem>>, vector<1x128xf32>
    %155 = vector.shape_cast %154 : vector<1x128xf32> to vector<1x128xf32>
    %156 = vector.broadcast %155 : vector<1x128xf32> to vector<64x128xf32>
    %c0_125 = arith.constant 0 : index
    %c7_126 = arith.constant 7 : index
    %c0_127 = arith.constant 0 : index
    %157 = vector.load %arg9[%c0_125, %c7_126, %c0_127] : memref<18x32x128xf32, #tpu.memory_space<vmem>>, vector<10x8x128xf32>
    %158 = arith.truncf %157 : vector<10x8x128xf32> to vector<10x8x128xbf16>
    %159 = vector.extract_strided_slice %158 {offsets = [0, 0, 0], sizes = [8, 8, 128], strides = [1, 1, 1]} : vector<10x8x128xbf16> to vector<8x8x128xbf16>
    %160 = vector.shape_cast %159 : vector<8x8x128xbf16> to vector<64x128xbf16>
    %c0_128 = arith.constant 0 : index
    %c0_129 = arith.constant 0 : index
    %c0_130 = arith.constant 0 : index
    %161 = vector.load %arg6[%c0_128, %c0_129, %c0_130] : memref<9x128x128xbf16, #tpu.memory_space<vmem>>, vector<1x128x128xbf16>
    %162 = vector.shape_cast %161 : vector<1x128x128xbf16> to vector<128x128xbf16>
    %cst_131 = arith.constant dense<0.000000e+00> : vector<64x128xf32>
    %163 = tpu.matmul %160, %162, %cst_131 {dimension_numbers = #tpu.dot_dimension_numbers<[1], [0], [0], [1], [0, 0, 1, 1], [], []>} : vector<64x128xbf16>, vector<128x128xbf16>, vector<64x128xf32> -> vector<64x128xf32>
    %164 = arith.addf %156, %163 : vector<64x128xf32>
    %165 = vector.extract_strided_slice %158 {offsets = [1, 0, 0], sizes = [8, 8, 128], strides = [1, 1, 1]} : vector<10x8x128xbf16> to vector<8x8x128xbf16>
    %166 = vector.shape_cast %165 : vector<8x8x128xbf16> to vector<64x128xbf16>
    %c3_132 = arith.constant 3 : index
    %c0_133 = arith.constant 0 : index
    %c0_134 = arith.constant 0 : index
    %167 = vector.load %arg6[%c3_132, %c0_133, %c0_134] : memref<9x128x128xbf16, #tpu.memory_space<vmem>>, vector<1x128x128xbf16>
    %168 = vector.shape_cast %167 : vector<1x128x128xbf16> to vector<128x128xbf16>
    %cst_135 = arith.constant dense<0.000000e+00> : vector<64x128xf32>
    %169 = tpu.matmul %166, %168, %cst_135 {dimension_numbers = #tpu.dot_dimension_numbers<[1], [0], [0], [1], [0, 0, 1, 1], [], []>} : vector<64x128xbf16>, vector<128x128xbf16>, vector<64x128xf32> -> vector<64x128xf32>
    %170 = arith.addf %164, %169 : vector<64x128xf32>
    %171 = vector.extract_strided_slice %158 {offsets = [2, 0, 0], sizes = [8, 8, 128], strides = [1, 1, 1]} : vector<10x8x128xbf16> to vector<8x8x128xbf16>
    %172 = vector.shape_cast %171 : vector<8x8x128xbf16> to vector<64x128xbf16>
    %c6_136 = arith.constant 6 : index
    %c0_137 = arith.constant 0 : index
    %c0_138 = arith.constant 0 : index
    %173 = vector.load %arg6[%c6_136, %c0_137, %c0_138] : memref<9x128x128xbf16, #tpu.memory_space<vmem>>, vector<1x128x128xbf16>
    %174 = vector.shape_cast %173 : vector<1x128x128xbf16> to vector<128x128xbf16>
    %cst_139 = arith.constant dense<0.000000e+00> : vector<64x128xf32>
    %175 = tpu.matmul %172, %174, %cst_139 {dimension_numbers = #tpu.dot_dimension_numbers<[1], [0], [0], [1], [0, 0, 1, 1], [], []>} : vector<64x128xbf16>, vector<128x128xbf16>, vector<64x128xf32> -> vector<64x128xf32>
    %176 = arith.addf %170, %175 : vector<64x128xf32>
    %c0_140 = arith.constant 0 : index
    %c8_141 = arith.constant 8 : index
    %c0_142 = arith.constant 0 : index
    %177 = vector.load %arg9[%c0_140, %c8_141, %c0_142] : memref<18x32x128xf32, #tpu.memory_space<vmem>>, vector<10x8x128xf32>
    %178 = arith.truncf %177 : vector<10x8x128xf32> to vector<10x8x128xbf16>
    %179 = vector.extract_strided_slice %178 {offsets = [0, 0, 0], sizes = [8, 8, 128], strides = [1, 1, 1]} : vector<10x8x128xbf16> to vector<8x8x128xbf16>
    %180 = vector.shape_cast %179 : vector<8x8x128xbf16> to vector<64x128xbf16>
    %c1_143 = arith.constant 1 : index
    %c0_144 = arith.constant 0 : index
    %c0_145 = arith.constant 0 : index
    %181 = vector.load %arg6[%c1_143, %c0_144, %c0_145] : memref<9x128x128xbf16, #tpu.memory_space<vmem>>, vector<1x128x128xbf16>
    %182 = vector.shape_cast %181 : vector<1x128x128xbf16> to vector<128x128xbf16>
    %cst_146 = arith.constant dense<0.000000e+00> : vector<64x128xf32>
    %183 = tpu.matmul %180, %182, %cst_146 {dimension_numbers = #tpu.dot_dimension_numbers<[1], [0], [0], [1], [0, 0, 1, 1], [], []>} : vector<64x128xbf16>, vector<128x128xbf16>, vector<64x128xf32> -> vector<64x128xf32>
    %184 = arith.addf %176, %183 : vector<64x128xf32>
    %185 = vector.extract_strided_slice %178 {offsets = [1, 0, 0], sizes = [8, 8, 128], strides = [1, 1, 1]} : vector<10x8x128xbf16> to vector<8x8x128xbf16>
    %186 = vector.shape_cast %185 : vector<8x8x128xbf16> to vector<64x128xbf16>
    %c4_147 = arith.constant 4 : index
    %c0_148 = arith.constant 0 : index
    %c0_149 = arith.constant 0 : index
    %187 = vector.load %arg6[%c4_147, %c0_148, %c0_149] : memref<9x128x128xbf16, #tpu.memory_space<vmem>>, vector<1x128x128xbf16>
    %188 = vector.shape_cast %187 : vector<1x128x128xbf16> to vector<128x128xbf16>
    %cst_150 = arith.constant dense<0.000000e+00> : vector<64x128xf32>
    %189 = tpu.matmul %186, %188, %cst_150 {dimension_numbers = #tpu.dot_dimension_numbers<[1], [0], [0], [1], [0, 0, 1, 1], [], []>} : vector<64x128xbf16>, vector<128x128xbf16>, vector<64x128xf32> -> vector<64x128xf32>
    %190 = arith.addf %184, %189 : vector<64x128xf32>
    %191 = vector.extract_strided_slice %178 {offsets = [2, 0, 0], sizes = [8, 8, 128], strides = [1, 1, 1]} : vector<10x8x128xbf16> to vector<8x8x128xbf16>
    %192 = vector.shape_cast %191 : vector<8x8x128xbf16> to vector<64x128xbf16>
    %c7_151 = arith.constant 7 : index
    %c0_152 = arith.constant 0 : index
    %c0_153 = arith.constant 0 : index
    %193 = vector.load %arg6[%c7_151, %c0_152, %c0_153] : memref<9x128x128xbf16, #tpu.memory_space<vmem>>, vector<1x128x128xbf16>
    %194 = vector.shape_cast %193 : vector<1x128x128xbf16> to vector<128x128xbf16>
    %cst_154 = arith.constant dense<0.000000e+00> : vector<64x128xf32>
    %195 = tpu.matmul %192, %194, %cst_154 {dimension_numbers = #tpu.dot_dimension_numbers<[1], [0], [0], [1], [0, 0, 1, 1], [], []>} : vector<64x128xbf16>, vector<128x128xbf16>, vector<64x128xf32> -> vector<64x128xf32>
    %196 = arith.addf %190, %195 : vector<64x128xf32>
    %c0_155 = arith.constant 0 : index
    %c9_156 = arith.constant 9 : index
    %c0_157 = arith.constant 0 : index
    %197 = vector.load %arg9[%c0_155, %c9_156, %c0_157] : memref<18x32x128xf32, #tpu.memory_space<vmem>>, vector<10x8x128xf32>
    %198 = arith.truncf %197 : vector<10x8x128xf32> to vector<10x8x128xbf16>
    %199 = vector.extract_strided_slice %198 {offsets = [0, 0, 0], sizes = [8, 8, 128], strides = [1, 1, 1]} : vector<10x8x128xbf16> to vector<8x8x128xbf16>
    %200 = vector.shape_cast %199 : vector<8x8x128xbf16> to vector<64x128xbf16>
    %c2_158 = arith.constant 2 : index
    %c0_159 = arith.constant 0 : index
    %c0_160 = arith.constant 0 : index
    %201 = vector.load %arg6[%c2_158, %c0_159, %c0_160] : memref<9x128x128xbf16, #tpu.memory_space<vmem>>, vector<1x128x128xbf16>
    %202 = vector.shape_cast %201 : vector<1x128x128xbf16> to vector<128x128xbf16>
    %cst_161 = arith.constant dense<0.000000e+00> : vector<64x128xf32>
    %203 = tpu.matmul %200, %202, %cst_161 {dimension_numbers = #tpu.dot_dimension_numbers<[1], [0], [0], [1], [0, 0, 1, 1], [], []>} : vector<64x128xbf16>, vector<128x128xbf16>, vector<64x128xf32> -> vector<64x128xf32>
    %204 = arith.addf %196, %203 : vector<64x128xf32>
    %205 = vector.extract_strided_slice %198 {offsets = [1, 0, 0], sizes = [8, 8, 128], strides = [1, 1, 1]} : vector<10x8x128xbf16> to vector<8x8x128xbf16>
    %206 = vector.shape_cast %205 : vector<8x8x128xbf16> to vector<64x128xbf16>
    %c5_162 = arith.constant 5 : index
    %c0_163 = arith.constant 0 : index
    %c0_164 = arith.constant 0 : index
    %207 = vector.load %arg6[%c5_162, %c0_163, %c0_164] : memref<9x128x128xbf16, #tpu.memory_space<vmem>>, vector<1x128x128xbf16>
    %208 = vector.shape_cast %207 : vector<1x128x128xbf16> to vector<128x128xbf16>
    %cst_165 = arith.constant dense<0.000000e+00> : vector<64x128xf32>
    %209 = tpu.matmul %206, %208, %cst_165 {dimension_numbers = #tpu.dot_dimension_numbers<[1], [0], [0], [1], [0, 0, 1, 1], [], []>} : vector<64x128xbf16>, vector<128x128xbf16>, vector<64x128xf32> -> vector<64x128xf32>
    %210 = arith.addf %204, %209 : vector<64x128xf32>
    %211 = vector.extract_strided_slice %198 {offsets = [2, 0, 0], sizes = [8, 8, 128], strides = [1, 1, 1]} : vector<10x8x128xbf16> to vector<8x8x128xbf16>
    %212 = vector.shape_cast %211 : vector<8x8x128xbf16> to vector<64x128xbf16>
    %c8_166 = arith.constant 8 : index
    %c0_167 = arith.constant 0 : index
    %c0_168 = arith.constant 0 : index
    %213 = vector.load %arg6[%c8_166, %c0_167, %c0_168] : memref<9x128x128xbf16, #tpu.memory_space<vmem>>, vector<1x128x128xbf16>
    %214 = vector.shape_cast %213 : vector<1x128x128xbf16> to vector<128x128xbf16>
    %cst_169 = arith.constant dense<0.000000e+00> : vector<64x128xf32>
    %215 = tpu.matmul %212, %214, %cst_169 {dimension_numbers = #tpu.dot_dimension_numbers<[1], [0], [0], [1], [0, 0, 1, 1], [], []>} : vector<64x128xbf16>, vector<128x128xbf16>, vector<64x128xf32> -> vector<64x128xf32>
    %216 = arith.addf %210, %215 : vector<64x128xf32>
    %c0_170 = arith.constant 0 : index
    %c0_171 = arith.constant 0 : index
    %217 = vector.load %arg10[%c0_170, %c0_171] : memref<256x128xf32, #tpu.memory_space<vmem>>, vector<64x128xf32>
    tpu.vector_store %arg10[%c0_170, %c0_171], %216 {strides = array<i32>} : memref<256x128xf32, #tpu.memory_space<vmem>>, vector<64x128xf32>,
    %c0_172 = arith.constant 0 : index
    %c0_173 = arith.constant 0 : index
    %218 = tpu.strided_load %arg10[%c0_172, %c0_173] {strides = array<i32: 2, 1>} : memref<256x128xf32, #tpu.memory_space<vmem>>, vector<32x128xf32>
    %c1_174 = arith.constant 1 : index
    %c0_175 = arith.constant 0 : index
    %219 = tpu.strided_load %arg10[%c1_174, %c0_175] {strides = array<i32: 2, 1>} : memref<256x128xf32, #tpu.memory_space<vmem>>, vector<32x128xf32>
    %220 = arith.maximumf %218, %219 : vector<32x128xf32>
    %221 = vector.shape_cast %220 : vector<32x128xf32> to vector<4x2x4x128xf32>
    %222 = vector.extract_strided_slice %221 {offsets = [0, 0, 0, 0], sizes = [4, 1, 4, 128], strides = [1, 1, 1, 1]} : vector<4x2x4x128xf32> to vector<4x1x4x128xf32>
    %223 = vector.shape_cast %222 : vector<4x1x4x128xf32> to vector<4x4x128xf32>
    %224 = vector.extract_strided_slice %221 {offsets = [0, 1, 0, 0], sizes = [4, 1, 4, 128], strides = [1, 1, 1, 1]} : vector<4x2x4x128xf32> to vector<4x1x4x128xf32>
    %225 = vector.shape_cast %224 : vector<4x1x4x128xf32> to vector<4x4x128xf32>
    %226 = arith.maximumf %223, %225 : vector<4x4x128xf32>
    %227 = vector.shape_cast %226 : vector<4x4x128xf32> to vector<1x4x4x128xf32>
    %c0_176 = arith.constant 0 : index
    %c0_177 = arith.constant 0 : index
    %c0_178 = arith.constant 0 : index
    %c0_179 = arith.constant 0 : index
    %228 = vector.load %arg8[%c0_176, %c0_177, %c0_178, %c0_179] : memref<1x4x4x128xf32, #tpu.memory_space<vmem>>, vector<1x4x4x128xf32>
    tpu.vector_store %arg8[%c0_176, %c0_177, %c0_178, %c0_179], %227 {strides = array<i32>} : memref<1x4x4x128xf32, #tpu.memory_space<vmem>>, vector<1x4x4x128xf32>,
    return
  }
  func.func @transform_0(%arg0: i32) -> (i32, i32, i32, i32) {
    %c0_i32 = arith.constant 0 : i32
    %c0_i32_0 = arith.constant 0 : i32
    %c0_i32_1 = arith.constant 0 : i32
    %c0_i32_2 = arith.constant 0 : i32
    return %arg0, %c0_i32, %c0_i32_0, %c0_i32_1 : i32, i32, i32, i32
  }
  func.func @transform_1(%arg0: i32) -> (i32, i32, i32) {
    %c0_i32 = arith.constant 0 : i32
    %c0_i32_0 = arith.constant 0 : i32
    %c0_i32_1 = arith.constant 0 : i32
    %c0_i32_2 = arith.constant 0 : i32
    return %c0_i32, %c0_i32_0, %c0_i32_1 : i32, i32, i32
  }
  func.func @transform_2(%arg0: i32) -> (i32, i32) {
    %c0_i32 = arith.constant 0 : i32
    %c0_i32_0 = arith.constant 0 : i32
    %c0_i32_1 = arith.constant 0 : i32
    return %c0_i32, %c0_i32_0 : i32, i32
  }
  func.func @transform_3(%arg0: i32) -> (i32, i32, i32) {
    %c0_i32 = arith.constant 0 : i32
    %c0_i32_0 = arith.constant 0 : i32
    %c0_i32_1 = arith.constant 0 : i32
    %c0_i32_2 = arith.constant 0 : i32
    return %c0_i32, %c0_i32_0, %c0_i32_1 : i32, i32, i32
  }
  func.func @transform_4(%arg0: i32) -> (i32, i32) {
    %c0_i32 = arith.constant 0 : i32
    %c0_i32_0 = arith.constant 0 : i32
    %c0_i32_1 = arith.constant 0 : i32
    return %c0_i32, %c0_i32_0 : i32, i32
  }
  func.func @transform_5(%arg0: i32) -> (i32, i32, i32) {
    %c0_i32 = arith.constant 0 : i32
    %c0_i32_0 = arith.constant 0 : i32
    %c0_i32_1 = arith.constant 0 : i32
    %c0_i32_2 = arith.constant 0 : i32
    return %c0_i32, %c0_i32_0, %c0_i32_1 : i32, i32, i32
  }
  func.func @transform_6(%arg0: i32) -> (i32, i32) {
    %c0_i32 = arith.constant 0 : i32
    %c0_i32_0 = arith.constant 0 : i32
    %c0_i32_1 = arith.constant 0 : i32
    return %c0_i32, %c0_i32_0 : i32, i32
  }
  func.func @transform_7(%arg0: i32) -> (i32, i32, i32, i32) {
    %c0_i32 = arith.constant 0 : i32
    %c0_i32_0 = arith.constant 0 : i32
    %c0_i32_1 = arith.constant 0 : i32
    %c0_i32_2 = arith.constant 0 : i32
    return %arg0, %c0_i32, %c0_i32_0, %c0_i32_1 : i32, i32, i32, i32
  }
}

</mosaic_0001>

<bundles_post_ra>
// kernel: tpu_custom_call.1
= control target key start
LH: loop header
LB: loop body
LE: loop exit
PB: predicated region body
PF: predicated region fallthrough
CT: control target
= control target key end

     0   :  { %12 = vsyncpa [#allocation5], 0  ;;  %s11493_s0 = inlined_call_operand.hbm [shape: f32[2,16,16,128], index: 0, kind: input, shape index: {}]   ;;  %s11494_s1 = inlined_call_operand.hbm [shape: bf16[9,128,128], index: 1, kind: input, shape index: {}]   ;;  %s11495_s2 = inlined_call_operand.vmem [shape: f32[1,128], index: 2, kind: input, shape index: {}]   ;;  %s11496_s3 = inlined_call_operand.hbm [shape: bf16[9,128,128], index: 3, kind: input, shape index: {}]   ;;  %s11497_s4 = inlined_call_operand.vmem [shape: f32[1,128], index: 4, kind: input, shape index: {}]   ;;  %s11498_s5 = inlined_call_operand.hbm [shape: bf16[9,128,128], index: 5, kind: input, shape index: {}]   ;;  %s11499_s6 = inlined_call_operand.vmem [shape: f32[1,128], index: 6, kind: input, shape index: {}]   ;;  %s11500_s7 = inlined_call_operand.hbm [shape: f32[2,4,4,128], index: 7, kind: output, shape index: {}]  }
   0x1   :  { %14 = vsyncpa [#allocation5 + $0x1], 0 }
   0x2   :  { %15 = vsyncpa [#allocation8], 0 }
   0x3   :  { %16 = vsyncpa [#allocation11], 0 }
   0x4   :  { %17 = vsyncpa [#allocation6], 0 }
   0x5   :  { %19 = vsyncpa [#allocation6 + $0x1], 0  ;;  %s10307_s24 = smov 0   ;;  %s10309_s25 = smov 0  }
   0x6   :  { %s10311_s26 = smov 0   ;;  %s10313_s27 = smov 0  }
   0x7 LB: > { %s10328_s28 = sadd.s32 4294967295, %s10252_s27   ;;  %s7183_s29 = sadd.s32 4294967294, %s10252_s27   ;;  %s10252_s27 = sphi %s10313_s27, %s11526_s27   ;;  %s10248_s26 = sphi %s10311_s26, %s11525_s26   ;;  %s10244_s25 = sphi %s10309_s25, %s11524_s25   ;;  %s10240_s24 = sphi %s10307_s24, %s11523_s24  }
   0x8   : > { %p45_p0 = scmp.ne.s32.totalorder %s10244_s25, %s10240_s24  ;;  %p11501_p1 = scmp.eq.s32.totalorder %s10328_s28, 0 }
   0x9   : > { %p201_p3 = scmp.eq.s32.totalorder %s7183_s29, 1  ;;  %p7184_p5 = scmp.ge.s32.totalorder %s10252_s27, 1 }
   0xa   : > { %p10337_p4 = por %p11501_p1, %p45_p0  ;;  %p208_p7 = scmp.lt.s32.totalorder %s10252_s27, 3 }
   0xb   : > { %p10342_p6 = por %p201_p3, %p45_p0  ;;  %s10254_s10 = smov [#allocation7]  }
   0xc   : > { %s11505_s30 = scalar_select %p10337_p4, 1, 0 }
   0xd   : > { %s11506_s8 = scalar_select %p10342_p6, 1, 0 }
   0xe   : > { %p10347_p8 = pnand %p7184_p5, %p208_p7  ;;  %s220_s11 = sshll.u32 %s10254_s10, 4  ;;  %s10351_s11 = int_to_ptr.vmem [resolvable:$true] %s220_s11 }
   0xf   : > { %11507 = sst [smem:[#allocation17_spill]] %s11506_s8  ;;  %s10255_s13 = smov [#allocation9]  }
  0x10   : > { %s11508_s9 = scalar_select %p10347_p8, 1, 0 }
  0x11   : > { %p9778_p9 = pneg %p10347_p8  ;;  %s236_s14 = sshll.u32 %s10255_s13, 4  ;;  %s10362_s14 = int_to_ptr.vmem [resolvable:$true] %s236_s14 }
  0x12   : > { %s10256_s15 = smov [#allocation10]   ;;  %s10064_s19 = scalar_lea.hbm %s11494_s1, 9216 }
  0x13   : > { %p10358_p11 = pnand %p9778_p9, %p11501_p1  ;;  %s10364_s16 = sshll.u32 %s10256_s15, 4  ;;  %s253_s16 = int_to_ptr.vmem [resolvable:$true] %s10364_s16 }
  0x14   : > { %p10065_p12 = scmp.ne.s32.totalorder %s11494_s1, %s10064_s19  ;;  %p10071_p5 = scmp.lt.u32.totalorder %s10064_s19, %s11494_s1 }
  0x15   : > { %p10374_p13 = pneg %p10358_p11 }
  0x17   : > { %p10067_p0 = pnand %p10374_p13, %p10065_p12 }
  0x19   : > { %p10068_p3 = pneg %p10067_p0 }
  0x1b   : > { %p10073_p7 = pnand %p10071_p5, %p10068_p3 }
  0x1d   : > { %10076 = shalt.err (!%p10073_p7)
}
  0x1e   : > { %s10077_s10 = scalar_lea.vmem %s10351_s11, 9216  ;;  %p10085_p2 = scmp.lt.s32.totalorder %s10351_s11, %s10351_s11 }
  0x1f   : > { %p10078_p9 = scmp.ne.s32.totalorder %s10351_s11, %s10077_s10  ;;  %p10086_p6 = scmp.lt.s32.totalorder %s10077_s10, %s10077_s10 }
  0x21   : > { %p10080_p10 = pnand %p10078_p9, %p10374_p13  ;;  %p10087_p12 = por %p10086_p6, %p10085_p2 }
  0x23   : > { %p10081_p1 = pneg %p10080_p10 }
  0x25   : > { %p10088_p0 = pnand %p10087_p12, %p10081_p1 }
  0x27   : > { %10091 = shalt.err (!%p10088_p0)
}
  0x28   : > { %s10257_s13 = smov 64   ;;  %s10258_s15 = smov 4  }
  0x29   : > { %9781 = dma.hbm_to_vmem [thread:$0]  (!%p10358_p11), %s11494_s1, 9216, %s10351_s11, [#allocation8], %s10257_s13, %s10257_s13, %s10258_s15  }
  0x2a   : > { %s10092_s21 = scalar_lea.hbm %s11496_s3, 9216 }
  0x2b   : > { %p10093_p1 = scmp.ne.s32.totalorder %s11496_s3, %s10092_s21  ;;  %p10099_p10 = scmp.lt.u32.totalorder %s10092_s21, %s11496_s3 }
  0x2d   : > { %p10095_p2 = pnand %p10093_p1, %p10374_p13 }
  0x2f   : > { %p10096_p6 = pneg %p10095_p2 }
  0x31   : > { %p10101_p3 = pnand %p10099_p10, %p10096_p6 }
  0x33   : > { %10104 = shalt.err (!%p10101_p3)
}
  0x34   : > { %s10105_s11 = scalar_lea.vmem %s10362_s14, 9216  ;;  %p10113_p12 = scmp.lt.s32.totalorder %s10362_s14, %s10362_s14 }
  0x35   : > { %p10106_p5 = scmp.ne.s32.totalorder %s10362_s14, %s10105_s11  ;;  %p10114_p0 = scmp.lt.s32.totalorder %s10105_s11, %s10105_s11 }
  0x37   : > { %p10108_p7 = pnand %p10106_p5, %p10374_p13  ;;  %p10115_p1 = por %p10114_p0, %p10113_p12 }
  0x39   : > { %p10109_p9 = pneg %p10108_p7 }
  0x3b   : > { %p10116_p2 = pnand %p10115_p1, %p10109_p9 }
  0x3d   : > { %10119 = shalt.err (!%p10116_p2)
}
  0x3e   : > { %9784 = dma.hbm_to_vmem [thread:$0]  (!%p10358_p11), %s11496_s3, 9216, %s10362_s14, [#allocation8], %s10257_s13, %s10257_s13, %s10258_s15  }
  0x3f   : > { %s10120_s20 = scalar_lea.hbm %s11498_s5, 9216 }
  0x40   : > { %p10121_p6 = scmp.ne.s32.totalorder %s11498_s5, %s10120_s20  ;;  %p10127_p5 = scmp.lt.u32.totalorder %s10120_s20, %s11498_s5 }
  0x42   : > { %p10123_p10 = pnand %p10121_p6, %p10374_p13 }
  0x44   : > { %p10124_p3 = pneg %p10123_p10 }
  0x46   : > { %p10129_p7 = pnand %p10127_p5, %p10124_p3 }
  0x48   : > { %10132 = shalt.err (!%p10129_p7)
}
  0x49   : > { %s10133_s11 = scalar_lea.vmem %s253_s16, 9216  ;;  %p10141_p1 = scmp.lt.s32.totalorder %s253_s16, %s253_s16 }
  0x4a   : > { %p10134_p9 = scmp.ne.s32.totalorder %s253_s16, %s10133_s11  ;;  %p10142_p2 = scmp.lt.s32.totalorder %s10133_s11, %s10133_s11 }
  0x4c   : > { %p10136_p12 = pnand %p10134_p9, %p10374_p13  ;;  %p10143_p4 = por %p10142_p2, %p10141_p1 }
  0x4e   : > { %p10137_p0 = pneg %p10136_p12 }
  0x50   : > { %p10144_p8 = pnand %p10143_p4, %p10137_p0 }
  0x52   : > { %10147 = shalt.err (!%p10144_p8)
}
  0x53   : > { %9787 = dma.hbm_to_vmem [thread:$0]  (!%p10358_p11), %s11498_s5, 9216, %s253_s16, [#allocation11], %s10257_s13, %s10257_s13, %s10258_s15  }
  0x54   : > { %s10447_s22 = sadd.s32 1, %s10252_s27   ;;  %s32_s17 = sadd.s32 1, %s10248_s26 }
  0x55   : > { %s29_s12 = ssub.s32 %s10252_s27, %s10447_s22  ;;  %p39_p8 = scmp.ne.s32.totalorder %s10248_s26, %s10244_s25 }
  0x56   : > { %p30_p4 = scmp.eq.s32.totalorder %s29_s12, 0  ;;  %p40_p13 = scmp.eq.s32.totalorder %s10252_s27, 0 }
  0x57   : > { %p9799_p6 = scmp.lt.s32.totalorder %s10252_s27, 2  ;;  %p11511_p3 = scmp.eq.s32.totalorder %s10328_s28, 1 }
  0x58   : > { %s10457_s18 = scalar_select %p30_p4, %s10248_s26, %s32_s17  }
  0x59   : > { %p41_p10 = por %p40_p13, %p39_p8  ;;  %p10461_p5 = por %p11511_p3, %p39_p8 }
  0x5a   : > { %s269_s20 = sand.u32 1, %s10248_s26   ;;  %s7449_s21 = sshll.u32 %s10252_s27, 12 }
  0x5b   : > { %s7189_s16 = sshll.u32 %s269_s20, 8  ;;  %s10470_s23 = scalar_lea.hbm %s11493_s0, %s7449_s21 }
  0x5c   : > { %s273_s29 = scalar_lea.vmem [#allocation4], %s7189_s16  ;;  %p10472_p11 = pnand %p9799_p6, %p41_p10 }
  0x5d   : > { %s280_s10 = sshll.u32 %s273_s29, 4  ;;  %s10478_s14 = scalar_lea.sflag [#allocation5], %s269_s20  ;;  %s10476_s10 = int_to_ptr.vmem [resolvable:$true] %s280_s10 }
  0x5e   : > { %s10148_s8 = scalar_lea.hbm %s10470_s23, 4096  ;;  %p10150_p9 = pneg %p10472_p11 }
  0x5f   : > { %p10149_p7 = scmp.ne.s32.totalorder %s10470_s23, %s10148_s8  ;;  %s10153_s21 = scalar_lea.hbm %s11493_s0, 8192 }
  0x60   : > { %p10154_p1 = scmp.lt.u32.totalorder %s10470_s23, %s11493_s0  ;;  %p10155_p2 = scmp.lt.u32.totalorder %s10153_s21, %s10148_s8 }
  0x61   : > { %p10151_p12 = pnand %p10150_p9, %p10149_p7  ;;  %p10157_p8 = scmp.lt.u32.totalorder %s10148_s8, %s10470_s23 }
  0x62   : > { %p10156_p4 = por %p10155_p2, %p10154_p1 }
  0x63   : > { %p10152_p0 = pneg %p10151_p12 }
  0x64   : > { %p10158_p13 = por %p10157_p8, %p10156_p4 }
  0x66   : > { %p10159_p6 = pnand %p10158_p13, %p10152_p0 }
  0x68   : > { %10162 = shalt.err (!%p10159_p6)
}
  0x69   : > { %s10163_s20 = scalar_lea.vmem %s10476_s10, 4096  ;;  %s10259_s15 = smov [#allocation4]  }
  0x6a   : > { %p10164_p10 = scmp.ne.s32.totalorder %s10476_s10, %s10163_s20  ;;  %s10168_s29 = sshll.u32 %s10259_s15, 4  ;;  %s10169_s29 = int_to_ptr.vmem [resolvable:$false] %s10168_s29 }
  0x6b   : > { %s10170_s12 = scalar_lea.vmem %s10169_s29, 8192  ;;  %p10171_p12 = scmp.lt.s32.totalorder %s10476_s10, %s10169_s29 }
  0x6c   : > { %p10166_p3 = pnand %p10164_p10, %p10150_p9  ;;  %p10172_p1 = scmp.lt.s32.totalorder %s10170_s12, %s10163_s20 }
  0x6e   : > { %p10167_p7 = pneg %p10166_p3  ;;  %p10173_p2 = por %p10172_p1, %p10171_p12 }
  0x70   : > { %p10174_p4 = pnand %p10173_p2, %p10167_p7 }
  0x72   : > { %10177 = shalt.err (!%p10174_p4)
}
  0x73   : > { %s10260_s8 = smov 128   ;;  %s10261_s17 = smov 8  }
  0x74   : > { %9791 = dma.hbm_to_vmem [thread:$0]  (!%p10472_p11), %s10470_s23, 4096, %s10476_s10, %s10478_s14, %s10260_s8, %s10260_s8, %s10261_s17  }
  0x75   : > { %p11514_p9 = scmp.ne.s32.totalorder %s11508_s9, 0 }
  0x76   : > { %s10509_s21 = sand.u32 (!%p11514_p9), 1, %s10244_s25   ;;  %p11515_p0 = scmp.ne.s32.totalorder (!%p11514_p9), %s11505_s30, 0 }
  0x77   : > { %292 = sbr.rel (%p11514_p9) target bundleno = 2056 (0x808), region = 48  ;;  %s7193_s16 = sshll.u32 (!%p11514_p9), %s10509_s21, 8 }
  0x78   : > { %s295_s13 = scalar_lea.sflag (!%p11514_p9), [#allocation5], %s10509_s21  ;;  %s10513_s20 = scalar_lea.vmem (!%p11514_p9), [#allocation4], %s7193_s16 }
  0x7e   : > { %10223 = dma.done.wait (%p11515_p0), %s295_s13, 4096  }
  0x7f   : > { %10225 = vsyncadd (%p11515_p0), %s295_s13, 4294963200  ;;  %p11516_p11 = scmp.eq.s32.totalorder %s10328_s28, 0 }
  0x81   : > { %10227 = dma.done.wait (%p11516_p11), [#allocation8], 18432   ;;  %p11517_p8 = pmov %p11516_p11 }
  0x83   : > { %10229 = vsyncadd (%p11517_p8), [#allocation8], 4294948864  ;;  %p11518_p13 = pmov %p11517_p8 }
  0x84   : > { %p11519_p6 = pmov %p11517_p8 }
  0x85   : > { %10231 = dma.done.wait (%p11518_p13), [#allocation11], 9216  }
  0x86   : > { %10233 = vsyncadd (%p11519_p6), [#allocation11], 4294958080  ;;  %v10262_v0 = vmov 0.0   ;;  %v9846_v1 = vld [vmem:[#allocation7 + $0x180] sm:$0xff]   ;;  %v9847_v2 = vld [vmem:[#allocation7 + $0x188] sm:$0xff]   ;;  %s7197_s15 = sshll.u32 %s10509_s21, 4 }
  0x87   : > { %344 = vst [vmem:[#allocation2 + $0x40] sm:$0xff] %v10262_v0  ;;  %342 = vst [vmem:[#allocation2] sm:$0xff] %v10262_v0  ;;  %8114 = vmatprep.subr.bf16.mxu0 %v9846_v1  ;;  %v9848_v3 = vld [vmem:[#allocation7 + $0x190] sm:$0xff]   ;;  %v9849_v4 = vld [vmem:[#allocation7 + $0x198] sm:$0xff]   ;;  %s340_s29 = scalar_lea.vmem [#allocation12], %s7197_s15  ;;  %s7477_s12 = sshll.u32 %s10328_s28, 8 }
  0x88   : > { %343 = vst [vmem:[#allocation2 + $0x20] sm:$0xff] %v10262_v0  ;;  %345 = vst [vmem:[#allocation2 + $0x60] sm:$0xff] %v10262_v0  ;;  %8115 = vmatpush3.bf16.msra.mxu0 %v9846_v1  ;;  %v385_v5 = vld [vmem:[%s10513_s20 + $0x10] sm:$0xff]  ;;  %v386_v6 = vld [vmem:[%s10513_s20 + $0x18] sm:$0xff]  ;;  %s7081_s8 = sshll.u32 %s340_s29, 4  ;;  %s11447_s13 = scalar_lea.hbm %s11500_s7, %s7477_s12  ;;  %s11449_s8 = int_to_ptr.vmem [resolvable:$true] %s7081_s8 }
  0x89   : > { %346 = vst [vmem:[#allocation2 + $0x80] sm:$0xff] %v10262_v0  ;;  %347 = vst [vmem:[#allocation2 + $0xa0] sm:$0xff] %v10262_v0  ;;  %8116 = vmatprep.subr.bf16.mxu0 %v9847_v2  ;;  %v387_v7 = vld [vmem:[%s10513_s20 + $0x20] sm:$0xff]  ;;  %v388_v8 = vld [vmem:[%s10513_s20 + $0x28] sm:$0xff]  ;;  %v10531_v9 = vpack.c.bf16 %v386_v6, %v385_v5  ;;  %s10178_s30 = scalar_lea.vmem %s11449_s8, 256  ;;  %s10264_s28 = smov [#allocation12]  }
  0x8a   : > { %348 = vst [vmem:[#allocation2 + $0xc0] sm:$0xff] %v10262_v0  ;;  %349 = vst [vmem:[#allocation2 + $0xe0] sm:$0xff] %v10262_v0  ;;  %v389_v10 = vld [vmem:[%s10513_s20 + $0x30] sm:$0xff]  ;;  %v390_v11 = vld [vmem:[%s10513_s20 + $0x38] sm:$0xff]  ;;  %v10535_v12 = vpack.c.bf16 %v388_v8, %v387_v7  ;;  %p10179_p10 = scmp.ne.s32.totalorder %s11449_s8, %s10178_s30  ;;  %s10182_s9 = sshll.u32 %s10264_s28, 4  ;;  %s10183_s9 = int_to_ptr.vmem [resolvable:$false] %s10182_s9 }
  0x8b   : > { %350 = vst [vmem:[#allocation2 + $0x100] sm:$0xff] %v10262_v0  ;;  %351 = vst [vmem:[#allocation2 + $0x120] sm:$0xff] %v10262_v0  ;;  %v391_v13 = vld [vmem:[%s10513_s20 + $0x40] sm:$0xff]  ;;  %v392_v14 = vld [vmem:[%s10513_s20 + $0x48] sm:$0xff]  ;;  %v10539_v15 = vpack.c.bf16 %v390_v11, %v389_v10  ;;  %s10184_s23 = scalar_lea.vmem %s10183_s9, 512  ;;  %p10185_p12 = scmp.lt.s32.totalorder %s11449_s8, %s10183_s9 }
  0x8c   : > { %352 = vst [vmem:[#allocation2 + $0x140] sm:$0xff] %v10262_v0  ;;  %353 = vst [vmem:[#allocation2 + $0x160] sm:$0xff] %v10262_v0  ;;  %8117 = vmatpush3.bf16.msra.mxu0 %v9847_v2  ;;  %v9850_v16 = vld [vmem:[#allocation7 + $0x1a0] sm:$0xff]   ;;  %v393_v17 = vld [vmem:[%s10513_s20 + $0x50] sm:$0xff]  ;;  %v10542_v18 = vpack.c.bf16 %v392_v14, %v391_v13  ;;  %p10180_p3 = pnand %p10179_p10, %p10461_p5  ;;  %p10186_p1 = scmp.lt.s32.totalorder %s10184_s23, %s10178_s30 }
  0x8d   : > { %354 = vst [vmem:[#allocation2 + $0x180] sm:$0xff] %v10262_v0  ;;  %355 = vst [vmem:[#allocation2 + $0x1a0] sm:$0xff] %v10262_v0  ;;  %8118 = vmatprep.subr.bf16.mxu0 %v9848_v3  ;;  %v394_v19 = vld [vmem:[%s10513_s20 + $0x58] sm:$0xff]  ;;  %v395_v20 = vld [vmem:[%s10513_s20 + $0x60] sm:$0xff] }
  0x8e   : > { %356 = vst [vmem:[#allocation2 + $0x1c0] sm:$0xff] %v10262_v0  ;;  %357 = vst [vmem:[#allocation2 + $0x1e0] sm:$0xff] %v10262_v0  ;;  %v396_v21 = vld [vmem:[%s10513_s20 + $0x68] sm:$0xff]  ;;  %v10547_v22 = vpack.c.bf16 %v394_v19, %v393_v17  ;;  %v397_v24 = vld [vmem:[%s10513_s20 + $0x70] sm:$0xff]  ;;  %p10181_p7 = pneg %p10180_p3  ;;  %p10187_p2 = por %p10186_p1, %p10185_p12 }
  0x8f   : > { %358 = vst [vmem:[#allocation2 + $0x200] sm:$0xff] %v10262_v0  ;;  %359 = vst [vmem:[#allocation2 + $0x220] sm:$0xff] %v10262_v0  ;;  %v10549_v23 = vpack.c.bf16 %v396_v21, %v395_v20  ;;  %v398_v25 = vld [vmem:[%s10513_s20 + $0x78] sm:$0xff]  ;;  %v399_v26 = vld [vmem:[%s10513_s20 + $0x80] sm:$0xff] }
  0x90   : > { %360 = vst [vmem:[#allocation2 + $0x18] sm:$0xff] %v10262_v0  ;;  %361 = vst [vmem:[#allocation2 + $0x38] sm:$0xff] %v10262_v0  ;;  %8119 = vmatpush3.bf16.msra.mxu0 %v9848_v3  ;;  %v9851_v27 = vld [vmem:[#allocation7 + $0x1a8] sm:$0xff]   ;;  %v10554_v30 = vpack.c.bf16 %v398_v25, %v397_v24  ;;  %v9852_v34 = vld [vmem:[#allocation7 + $0x1b0] sm:$0xff]   ;;  %p10188_p4 = pnand %p10187_p2, %p10181_p7 }
  0x91   : > { %362 = vst [vmem:[#allocation2 + $0x58] sm:$0xff] %v10262_v0  ;;  %363 = vst [vmem:[#allocation2 + $0x78] sm:$0xff] %v10262_v0  ;;  %8120 = vmatprep.subr.bf16.mxu0 %v9849_v4  ;;  %v400_v32 = vld [vmem:[%s10513_s20 + $0x88] sm:$0xff]  ;;  %v401_v35 = vld [vmem:[%s10513_s20 + $0x90] sm:$0xff] }
  0x92   : > { %364 = vst [vmem:[#allocation2 + $0x98] sm:$0xff] %v10262_v0  ;;  %365 = vst [vmem:[#allocation2 + $0xb8] sm:$0xff] %v10262_v0  ;;  %v10559_v33 = vpack.c.bf16 %v400_v32, %v399_v26  ;;  %v402_v36 = vld [vmem:[%s10513_s20 + $0x98] sm:$0xff]  ;;  %v403_v38 = vld [vmem:[%s10513_s20 + $0xa0] sm:$0xff] }
  0x93   : > { %366 = vst [vmem:[#allocation2 + $0xd8] sm:$0xff] %v10262_v0  ;;  %367 = vst [vmem:[#allocation2 + $0xf8] sm:$0xff] %v10262_v0  ;;  %v10564_v37 = vpack.c.bf16 %v402_v36, %v401_v35  ;;  %v404_v39 = vld [vmem:[%s10513_s20 + $0xa8] sm:$0xff]  ;;  %v9853_v41 = vld [vmem:[#allocation7 + $0x1b8] sm:$0xff]  }
  0x94   : > { %368 = vst [vmem:[#allocation2 + $0x118] sm:$0xff] %v10262_v0  ;;  %369 = vst [vmem:[#allocation2 + $0x138] sm:$0xff] %v10262_v0  ;;  %8121 = vmatpush3.bf16.msra.mxu0 %v9849_v4  ;;  %v10568_v40 = vpack.c.bf16 %v404_v39, %v403_v38  ;;  %v405_v42 = vld [vmem:[%s10513_s20 + $0xb0] sm:$0xff]  ;;  %v406_v44 = vld [vmem:[%s10513_s20 + $0xb8] sm:$0xff] }
  0x95   : > { %370 = vst [vmem:[#allocation2 + $0x158] sm:$0xff] %v10262_v0  ;;  %371 = vst [vmem:[#allocation2 + $0x178] sm:$0xff] %v10262_v0  ;;  %8122 = vmatprep.subr.bf16.mxu0 %v9850_v16  ;;  %v407_v45 = vld [vmem:[%s10513_s20 + $0xc0] sm:$0xff]  ;;  %v408_v47 = vld [vmem:[%s10513_s20 + $0xc8] sm:$0xff]  ;;  %v10574_v48 = vpack.c.bf16 %v406_v44, %v405_v42 }
  0x96   : > { %372 = vst [vmem:[#allocation2 + $0x198] sm:$0xff] %v10262_v0  ;;  %373 = vst [vmem:[#allocation2 + $0x1b8] sm:$0xff] %v10262_v0  ;;  %v9854_v46 = vld [vmem:[#allocation7 + $0x40] sm:$0xff]   ;;  %v409_v50 = vld [vmem:[%s10513_s20 + $0xd0] sm:$0xff]  ;;  %v10578_v52 = vpack.c.bf16 %v408_v47, %v407_v45 }
  0x97   : > { %374 = vst [vmem:[#allocation2 + $0x1d8] sm:$0xff] %v10262_v0  ;;  %375 = vst [vmem:[#allocation2 + $0x1f8] sm:$0xff] %v10262_v0  ;;  %v410_v51 = vld [vmem:[%s10513_s20 + $0xd8] sm:$0xff]  ;;  %v411_v55 = vld [vmem:[%s10513_s20 + $0xe0] sm:$0xff] }
  0x98   : > { %376 = vst [vmem:[#allocation2 + $0x218] sm:$0xff] %v10262_v0  ;;  %377 = vst [vmem:[#allocation2 + $0x238] sm:$0xff] %v10262_v0  ;;  %8123 = vmatpush3.bf16.msra.mxu0 %v9850_v16  ;;  %v10581_v56 = vpack.c.bf16 %v410_v51, %v409_v50  ;;  %v412_v57 = vld [vmem:[%s10513_s20 + $0xe8] sm:$0xff]  ;;  %v10591_v61 = vld [vmem:[%s10513_s20 + $0xf0] sm:$0xff] }
  0x99   : > { %378 = vst [vmem:[#allocation2 + $0x8] sm:$0xff] %v10262_v0  ;;  %379 = vst [vmem:[#allocation2 + $0x10] sm:$0xff] %v10262_v0  ;;  %8124 = vmatprep.subr.bf16.mxu0 %v9851_v27  ;;  %v10586_v59 = vpack.c.bf16 %v412_v57, %v411_v55  ;;  %v10594_v62 = vld [vmem:[%s10513_s20 + $0xf8] sm:$0xff]  ;;  %v9855_v63 = vld [vmem:[#allocation7 + $0x48] sm:$0xff]  }
  0x9a   : > { %381 = vst [vmem:[#allocation2 + $0x228] sm:$0xff] %v10262_v0  ;;  %382 = vst [vmem:[#allocation2 + $0x230] sm:$0xff] %v10262_v0  ;;  %v9856_v1 = vld [vmem:[#allocation7 + $0x50] sm:$0xff]   ;;  %v10600_v2 = vld [vmem:[%s10513_s20] sm:$0xff] }
  0x9b   : > { %418 = vst [vmem:[#allocation2 + $0x48] sm:$0xff] %v385_v5  ;;  %419 = vst [vmem:[#allocation2 + $0x50] sm:$0xff] %v386_v6  ;;  %v10604_v5 = vld [vmem:[%s10513_s20 + $0x8] sm:$0xff]  ;;  %s7068_s20 = scalar_lea.sflag [#allocation6], %s10509_s21 }
  0x9c   : > { %420 = vst [vmem:[#allocation2 + $0x68] sm:$0xff] %v387_v7  ;;  %421 = vst [vmem:[#allocation2 + $0x70] sm:$0xff] %v388_v8  ;;  %8125 = vmatpush3.bf16.msra.mxu0 %v9851_v27 }
  0x9d   : > { %422 = vst [vmem:[#allocation2 + $0x88] sm:$0xff] %v389_v10  ;;  %423 = vst [vmem:[#allocation2 + $0x90] sm:$0xff] %v390_v11  ;;  %8126 = vmatprep.subr.bf16.mxu0 %v9852_v34  ;;  %v9857_v10 = vld [vmem:[#allocation7 + $0x58] sm:$0xff]  }
  0x9e   : > { %424 = vst [vmem:[#allocation2 + $0xa8] sm:$0xff] %v391_v13  ;;  %425 = vst [vmem:[#allocation2 + $0xb0] sm:$0xff] %v392_v14 }
  0x9f   : > { %426 = vst [vmem:[#allocation2 + $0xc8] sm:$0xff] %v393_v17  ;;  %427 = vst [vmem:[#allocation2 + $0xd0] sm:$0xff] %v394_v19  ;;  %v9858_v17 = vld [vmem:[#allocation7 + $0x60] sm:$0xff]  }
  0xa0   : > { %428 = vst [vmem:[#allocation2 + $0xe8] sm:$0xff] %v395_v20  ;;  %429 = vst [vmem:[#allocation2 + $0xf0] sm:$0xff] %v396_v21  ;;  %8127 = vmatpush3.bf16.msra.mxu0 %v9852_v34  ;;  %v9859_v21 = vld [vmem:[#allocation7 + $0x68] sm:$0xff]  }
  0xa1   : > { %430 = vst [vmem:[#allocation2 + $0x108] sm:$0xff] %v397_v24  ;;  %431 = vst [vmem:[#allocation2 + $0x110] sm:$0xff] %v398_v25  ;;  %8128 = vmatprep.subr.bf16.mxu0 %v9853_v41 }
  0xa2   : > { %v459_v28 = vld [vmem:[#allocation2 + $0x47] sm:$0xff]  ;;  %v460_v29 = vld [vmem:[#allocation2 + $0x4f] sm:$0xff]  ;;  %432 = vst [vmem:[#allocation2 + $0x128] sm:$0xff] %v399_v26  ;;  %433 = vst [vmem:[#allocation2 + $0x130] sm:$0xff] %v400_v32 }
  0xa3   : > { %v10556_v31 = vpack.c.bf16 %v460_v29, %v459_v28  ;;  %434 = vst [vmem:[#allocation2 + $0x148] sm:$0xff] %v401_v35  ;;  %435 = vst [vmem:[#allocation2 + $0x150] sm:$0xff] %v402_v36  ;;  %v461_v43 = vld [vmem:[#allocation2 + $0x67] sm:$0xff]  ;;  %v462_v49 = vld [vmem:[#allocation2 + $0x6f] sm:$0xff] }
  0xa4   : > { %436 = vst [vmem:[#allocation2 + $0x168] sm:$0xff] %v403_v38  ;;  %437 = vst [vmem:[#allocation2 + $0x170] sm:$0xff] %v404_v39  ;;  %v463_v53 = vld [vmem:[#allocation2 + $0x87] sm:$0xff]  ;;  %v464_v54 = vld [vmem:[#allocation2 + $0x8f] sm:$0xff]  ;;  %v10584_v58 = vpack.c.bf16 %v462_v49, %v461_v43  ;;  %8129 = vmatpush3.bf16.msra.mxu0 %v9853_v41 }
  0xa5   : > { %8130 = vmatprep.mubr.bf16.mxu0 %v10556_v31  ;;  %438 = vst [vmem:[#allocation2 + $0x188] sm:$0xff] %v405_v42  ;;  %439 = vst [vmem:[#allocation2 + $0x190] sm:$0xff] %v406_v44  ;;  %v10588_v60 = vpack.c.bf16 %v464_v54, %v463_v53  ;;  %8162 = vmatprep.subr.bf16.mxu0 %v9854_v46  ;;  %v465_v0 = vld [vmem:[#allocation2 + $0xa7] sm:$0xff]  ;;  %v466_v3 = vld [vmem:[#allocation2 + $0xaf] sm:$0xff] }
  0xa6   : > { %440 = vst [vmem:[#allocation2 + $0x1a8] sm:$0xff] %v407_v45  ;;  %441 = vst [vmem:[#allocation2 + $0x1b0] sm:$0xff] %v408_v47  ;;  %v467_v4 = vld [vmem:[#allocation2 + $0xc7] sm:$0xff]  ;;  %v468_v6 = vld [vmem:[#allocation2 + $0xcf] sm:$0xff]  ;;  %v10608_v7 = vpack.c.bf16 %v466_v3, %v465_v0  ;;  %v10646_v3 = vpack.c.bf16 %v10594_v62, %v10591_v61 }
  0xa7   : > { %442 = vst [vmem:[#allocation2 + $0x1c8] sm:$0xff] %v409_v50  ;;  %443 = vst [vmem:[#allocation2 + $0x1d0] sm:$0xff] %v410_v51  ;;  %8131 = vmatmul.mubr.bf16.vlgmr.msra.gmra.mrb[0].mxu0 %v10584_v58  ;;  %v10610_v8 = vpack.c.bf16 %v468_v6, %v467_v4  ;;  %v469_v11 = vld [vmem:[#allocation2 + $0xe7] sm:$0xff]  ;;  %v470_v13 = vld [vmem:[#allocation2 + $0xef] sm:$0xff]  ;;  %v10263_v6 = vmov 0.0|0.0  }
  0xa8   : > { %444 = vst [vmem:[#allocation2 + $0x1e8] sm:$0xff] %v411_v55  ;;  %445 = vst [vmem:[#allocation2 + $0x1f0] sm:$0xff] %v412_v57  ;;  %8163 = vmatpush3.bf16.msra.mxu0 %v9854_v46  ;;  %8134 = vmatprep.mubr.bf16.mxu0 %v10588_v60  ;;  %v471_v14 = vld [vmem:[#allocation2 + $0x107] sm:$0xff]  ;;  %v472_v16 = vld [vmem:[#allocation2 + $0x10f] sm:$0xff]  ;;  %v10614_v19 = vpack.c.bf16 %v470_v13, %v469_v11 }
  0xa9   : > { %446 = vst [vmem:[#allocation2 + $0x208] sm:$0xff] %v10591_v61  ;;  %447 = vst [vmem:[#allocation2 + $0x210] sm:$0xff] %v10594_v62  ;;  %8164 = vmatprep.subr.bf16.mxu0 %v9855_v63  ;;  %v10616_v20 = vpack.c.bf16 %v472_v16, %v471_v14  ;;  %v473_v24 = vld [vmem:[#allocation2 + $0x127] sm:$0xff]  ;;  %v474_v25 = vld [vmem:[#allocation2 + $0x12f] sm:$0xff] }
  0xaa   : > { %416 = vst [vmem:[#allocation2 + $0x28] sm:$0xff] %v10600_v2  ;;  %417 = vst [vmem:[#allocation2 + $0x30] sm:$0xff] %v10604_v5  ;;  %v475_v26 = vld [vmem:[#allocation2 + $0x147] sm:$0xff]  ;;  %v476_v27 = vld [vmem:[#allocation2 + $0x14f] sm:$0xff]  ;;  %v10620_v29 = vpack.c.bf16 %v474_v25, %v473_v24 }
  0xab   : > { %v9860_v28 = vld [vmem:[#allocation7 + $0x70] sm:$0xff]   ;;  %v9861_v32 = vld [vmem:[#allocation7 + $0x78] sm:$0xff]   ;;  %v10622_v34 = vpack.c.bf16 %v476_v27, %v475_v26  ;;  %v477_v35 = vld [vmem:[#allocation2 + $0x167] sm:$0xff] }
  0xac   : > { %8165 = vmatpush3.bf16.msra.mxu0 %v9855_v63  ;;  %v478_v36 = vld [vmem:[#allocation2 + $0x16f] sm:$0xff]  ;;  %v479_v38 = vld [vmem:[#allocation2 + $0x187] sm:$0xff]  ;;  %v9865_v14 = vld [vmem:[#allocation7 + $0x118] sm:$0xff]  }
  0xad   : > { %8166 = vmatprep.subr.bf16.mxu0 %v9856_v1  ;;  %v480_v39 = vld [vmem:[#allocation2 + $0x18f] sm:$0xff]  ;;  %v9862_v41 = vld [vmem:[#allocation7 + $0x100] sm:$0xff]   ;;  %v10626_v42 = vpack.c.bf16 %v478_v36, %v477_v35  ;;  %v9886_v25 = vld [vmem:[#allocation7 + $0x18] sm:$0xff]  }
  0xae   : > { %v10628_v43 = vpack.c.bf16 %v480_v39, %v479_v38  ;;  %v481_v44 = vld [vmem:[#allocation2 + $0x1a7] sm:$0xff]  ;;  %v482_v45 = vld [vmem:[#allocation2 + $0x1af] sm:$0xff] }
  0xaf   : > { %8135 = vmatmul.mubr.bf16.gmra.mrb[4].mxu0 %v10608_v7  ;;  %v483_v46 = vld [vmem:[#allocation2 + $0x1c7] sm:$0xff]  ;;  %v484_v47 = vld [vmem:[#allocation2 + $0x1cf] sm:$0xff]  ;;  %v10632_v49 = vpack.c.bf16 %v482_v45, %v481_v44 }
  0xb0   : > { %8138 = vmatprep.mubr.bf16.mxu0 %v10610_v8  ;;  %8167 = vmatpush3.bf16.msra.mxu0 %v9856_v1  ;;  %v10634_v50 = vpack.c.bf16 %v484_v47, %v483_v46  ;;  %v485_v51 = vld [vmem:[#allocation2 + $0x1e7] sm:$0xff]  ;;  %v486_v53 = vld [vmem:[#allocation2 + $0x1ef] sm:$0xff]  ;;  %v9873_v47 = vld [vmem:[#allocation7 + $0x1d8] sm:$0xff]  }
  0xb1   : > { %8168 = vmatprep.subr.bf16.mxu0 %v9857_v10  ;;  %v487_v54 = vld [vmem:[#allocation2 + $0x207] sm:$0xff]  ;;  %v488_v55 = vld [vmem:[#allocation2 + $0x20f] sm:$0xff]  ;;  %v10638_v57 = vpack.c.bf16 %v486_v53, %v485_v51 }
  0xb2   : > { %v10640_v63 = vpack.c.bf16 %v488_v55, %v487_v54  ;;  %v489_v0 = vld [vmem:[#allocation2 + $0x227] sm:$0xff]  ;;  %v490_v1 = vld [vmem:[#allocation2 + $0x22f] sm:$0xff]  ;;  %v9877_v55 = vld [vmem:[#allocation7 + $0x1f8] sm:$0xff]  }
  0xb3   : > { %v508_v4 = vpack.c.bf16 %v490_v1, %v489_v0  ;;  %v9863_v11 = vld [vmem:[#allocation7 + $0x108] sm:$0xff]   ;;  %v9864_v13 = vld [vmem:[#allocation7 + $0x110] sm:$0xff]   ;;  %v9866_v61 = vld [vmem:[#allocation7 + $0x120] sm:$0xff]  }
  0xb4   : > { %8169 = vmatpush3.bf16.msra.mxu0 %v9857_v10  ;;  %v10651_v10 = vpack.c.bf16 %v10604_v5, %v10600_v2  ;;  %v9867_v62 = vld [vmem:[#allocation7 + $0x128] sm:$0xff]   ;;  %v9868_v2 = vld [vmem:[#allocation7 + $0x130] sm:$0xff]   ;;  %v9869_v5 = vld [vmem:[#allocation7 + $0x138] sm:$0xff]  }
  0xb5   : > { %8170 = vmatprep.subr.bf16.mxu0 %v9858_v17  ;;  %v9870_v16 = vld [vmem:[#allocation7 + $0x1c0] sm:$0xff]   ;;  %v9885_v24 = vld [vmem:[#allocation7 + $0x10] sm:$0xff]   ;;  %v9889_v27 = vld [vmem:[#allocation7 + $0x28] sm:$0xff]  }
  0xb6   : > { %v9888_v26 = vld [vmem:[#allocation7 + $0x20] sm:$0xff]   ;;  %v456_v36 = vld [vmem:[#allocation2 + $0xf] sm:$0xff] }
  0xb7   : > { %8139 = vmatmul.mubr.bf16.gmra.mrb[8].mxu0 %v10614_v19  ;;  %v455_v35 = vld [vmem:[#allocation2 + $0x7] sm:$0xff]  ;;  %v9872_v46 = vld [vmem:[#allocation7 + $0x1d0] sm:$0xff]  }
  0xb8   : > { %8142 = vmatprep.mubr.bf16.mxu0 %v10616_v20  ;;  %8171 = vmatpush3.bf16.msra.mxu0 %v9858_v17  ;;  %v9882_v17 = vld [vmem:[#allocation7] sm:$0xff]   ;;  %v10668_v38 = vpack.c.bf16 %v456_v36, %v455_v35  ;;  %v9871_v45 = vld [vmem:[#allocation7 + $0x1c8] sm:$0xff]   ;;  %v9876_v54 = vld [vmem:[#allocation7 + $0x1f0] sm:$0xff]  }
  0xb9   : > { %8172 = vmatprep.subr.bf16.mxu0 %v9859_v21  ;;  %8018 = vmatprep.subr.bf16.mxu1 %v9882_v17  ;;  %v457_v39 = vld [vmem:[#allocation2 + $0x27] sm:$0xff]  ;;  %v2129_v36 = vld [vmem:[#allocation2 + $0x131] sm:$0xff] }
  0xba   : > { %8019 = vmatpush3.bf16.msra.mxu1 %v9882_v17  ;;  %8034 = vmatprep.mubr.bf16.mxu1 %v10668_v38  ;;  %v9874_v51 = vld [vmem:[#allocation7 + $0x1e0] sm:$0xff]   ;;  %v9875_v53 = vld [vmem:[#allocation7 + $0x1e8] sm:$0xff]  }
  0xbb   : > { %v9898_v0 = vld [vmem:[#allocation7 + $0xc0] sm:$0xff]   ;;  %v9899_v1 = vld [vmem:[#allocation7 + $0xc8] sm:$0xff]  }
  0xbc   : > { %8173 = vmatpush3.bf16.msra.mxu0 %v9859_v21  ;;  %v9883_v21 = vld [vmem:[#allocation7 + $0x8] sm:$0xff]  }
  0xbd   : > { %8174 = vmatprep.subr.bf16.mxu0 %v9860_v28  ;;  %8020 = vmatprep.subr.bf16.mxu1 %v9883_v21  ;;  %v2124_v17 = vld [vmem:[#allocation2 + $0xe9] sm:$0xff] }
  0xbe   : > { %8021 = vmatpush3.bf16.msra.mxu1 %v9883_v21  ;;  %v2125_v21 = vld [vmem:[#allocation2 + $0xf1] sm:$0xff]  ;;  %v2128_v35 = vld [vmem:[#allocation2 + $0x129] sm:$0xff] }
  0xbf   : > { %8143 = vmatmul.mubr.bf16.gmra.mrb[12].mxu0 %v10620_v29  ;;  %8022 = vmatprep.subr.bf16.mxu1 %v9885_v24 }
  0xc0   : > { %8146 = vmatprep.mubr.bf16.mxu0 %v10622_v34  ;;  %8175 = vmatpush3.bf16.msra.mxu0 %v9860_v28  ;;  %v9891_v28 = vld [vmem:[#allocation7 + $0x30] sm:$0xff]  }
  0xc1   : > { %8176 = vmatprep.subr.bf16.mxu0 %v9861_v32 }
  0xc2   : > { %8023 = vmatpush3.bf16.msra.mxu1 %v9885_v24  ;;  %v2126_v24 = vld [vmem:[#allocation2 + $0x109] sm:$0xff] }
  0xc3   : > { %8024 = vmatprep.subr.bf16.mxu1 %v9886_v25 }
  0xc4   : > { %8177 = vmatpush3.bf16.msra.mxu0 %v9861_v32  ;;  %v9892_v32 = vld [vmem:[#allocation7 + $0x38] sm:$0xff]  }
  0xc5   : > { %8210 = vmatprep.subr.bf16.mxu0 %v9862_v41 }
  0xc6   : > { %8025 = vmatpush3.bf16.msra.mxu1 %v9886_v25  ;;  %v2127_v25 = vld [vmem:[#allocation2 + $0x111] sm:$0xff] }
  0xc7   : > { %8147 = vmatmul.mubr.bf16.gmra.mrb[16].mxu0 %v10626_v42  ;;  %8026 = vmatprep.subr.bf16.mxu1 %v9888_v26 }
  0xc8   : > { %8150 = vmatprep.mubr.bf16.mxu0 %v10628_v43 }
  0xca   : > { %8027 = vmatpush3.bf16.msra.mxu1 %v9888_v26  ;;  %v9906_v26 = vld [vmem:[#allocation7 + $0x170] sm:$0xff]  }
  0xcb   : > { %8028 = vmatprep.subr.bf16.mxu1 %v9889_v27 }
  0xce   : > { %8029 = vmatpush3.bf16.msra.mxu1 %v9889_v27  ;;  %v10755_v27 = vpack.c.bf16 %v2125_v21, %v2124_v17  ;;  %v2144_v21 = vld [vmem:[#allocation2 + $0x229] sm:$0xff] }
  0xcf   : > { %8151 = vmatmul.mubr.bf16.gmra.mrb[20].mxu0 %v10632_v49  ;;  %8030 = vmatprep.subr.bf16.mxu1 %v9891_v28 }
  0xd0   : > { %8154 = vmatprep.mubr.bf16.mxu0 %v10634_v50 }
  0xd2   : > { %8031 = vmatpush3.bf16.msra.mxu1 %v9891_v28  ;;  %v10757_v28 = vpack.c.bf16 %v2127_v25, %v2126_v24  ;;  %v2145_v24 = vld [vmem:[#allocation2 + $0x231] sm:$0xff] }
  0xd3   : > { %8032 = vmatprep.subr.bf16.mxu1 %v9892_v32 }
  0xd6   : > { %8033 = vmatpush3.bf16.msra.mxu1 %v9892_v32  ;;  %v9909_v32 = vld [vmem:[#allocation7 + $0x178] sm:$0xff]  }
  0xd7   : > { %8155 = vmatmul.mubr.bf16.gmra.mrb[24].mxu0 %v10638_v57  ;;  %8066 = vmatprep.subr.bf16.mxu1 %v9898_v0 }
  0xd8   : > { %8158 = vmatprep.mubr.bf16.mxu0 %v10640_v63 }
  0xdf   : > { %8159 = vmatmul.mubr.bf16.gmra.mrb[28].mxu0 %v508_v4  ;;  %v9878_v4 = vld [vmem:[#allocation7 + $0x80] sm:$0xff]  }
  0xe0   : > { %8178 = vmatprep.mubr.bf16.mxu0 %v10263_v6 }
  0xe7   : > { %8179 = vmatmul.mubr.bf16.vlgmr.msra.gmra.mrb[0].mxu0 %v10651_v10 }
  0xe8   : > { %8211 = vmatpush3.bf16.msra.mxu0 %v9862_v41  ;;  %8182 = vmatprep.mubr.bf16.mxu0 %v10531_v9  ;;  %v458_v41 = vld [vmem:[#allocation2 + $0x2f] sm:$0xff] }
  0xe9   : > { %8212 = vmatprep.subr.bf16.mxu0 %v9863_v11  ;;  %v10671_v44 = vpack.c.bf16 %v458_v41, %v457_v39  ;;  %v2131_v39 = vld [vmem:[#allocation2 + $0x151] sm:$0xff]  ;;  %v9910_v41 = vld [vmem:[#allocation7 + $0x200] sm:$0xff]  }
  0xeb   : > { %8035 = vmatmul.mubr.bf16.vlgmr.msra.gmra.mrb[0].mxu1 %v10671_v44 }
  0xec   : > { %8213 = vmatpush3.bf16.msra.mxu0 %v9863_v11  ;;  %8038 = vmatprep.mubr.bf16.mxu1 %v10556_v31  ;;  %v9902_v11 = vld [vmem:[#allocation7 + $0xd8] sm:$0xff]  }
  0xed   : > { %8214 = vmatprep.subr.bf16.mxu0 %v9864_v13  ;;  %8067 = vmatpush3.bf16.msra.mxu1 %v9898_v0  ;;  %v2136_v0 = vld [vmem:[#allocation2 + $0x1a9] sm:$0xff] }
  0xee   : > { %8068 = vmatprep.subr.bf16.mxu1 %v9899_v1 }
  0xef   : > { %8183 = vmatmul.mubr.bf16.gmra.mrb[4].mxu0 %v10535_v12 }
  0xf0   : > { %8186 = vmatprep.mubr.bf16.mxu0 %v10539_v15  ;;  %8215 = vmatpush3.bf16.msra.mxu0 %v9864_v13  ;;  %v9904_v13 = vld [vmem:[#allocation7 + $0xe0] sm:$0xff]  }
  0xf1   : > { %8216 = vmatprep.subr.bf16.mxu0 %v9865_v14  ;;  %8069 = vmatpush3.bf16.msra.mxu1 %v9899_v1  ;;  %v2137_v1 = vld [vmem:[#allocation2 + $0x1b1] sm:$0xff] }
  0xf3   : > { %8039 = vmatmul.mubr.bf16.gmra.mrb[4].mxu1 %v10584_v58 }
  0xf4   : > { %8217 = vmatpush3.bf16.msra.mxu0 %v9865_v14  ;;  %8042 = vmatprep.mubr.bf16.mxu1 %v10588_v60  ;;  %v9905_v14 = vld [vmem:[#allocation7 + $0xe8] sm:$0xff]  }
  0xf5   : > { %8218 = vmatprep.subr.bf16.mxu0 %v9866_v61 }
  0xf7   : > { %8187 = vmatmul.mubr.bf16.gmra.mrb[8].mxu0 %v10542_v18 }
  0xf8   : > { %8190 = vmatprep.mubr.bf16.mxu0 %v10547_v22  ;;  %8219 = vmatpush3.bf16.msra.mxu0 %v9866_v61  ;;  %v9907_v61 = vld [vmem:[#allocation7 + $0xf0] sm:$0xff]  }
  0xf9   : > { %8220 = vmatprep.subr.bf16.mxu0 %v9867_v62 }
  0xfb   : > { %8043 = vmatmul.mubr.bf16.gmra.mrb[8].mxu1 %v10608_v7 }
  0xfc   : > { %8221 = vmatpush3.bf16.msra.mxu0 %v9867_v62  ;;  %8046 = vmatprep.mubr.bf16.mxu1 %v10610_v8  ;;  %v9908_v62 = vld [vmem:[#allocation7 + $0xf8] sm:$0xff]  }
  0xfd   : > { %8222 = vmatprep.subr.bf16.mxu0 %v9868_v2 }
  0xff   : > { %8191 = vmatmul.mubr.bf16.gmra.mrb[12].mxu0 %v10549_v23 }
 0x100   : > { %8194 = vmatprep.mubr.bf16.mxu0 %v10554_v30  ;;  %8223 = vmatpush3.bf16.msra.mxu0 %v9868_v2  ;;  %v9879_v2 = vld [vmem:[#allocation7 + $0x88] sm:$0xff]  }
 0x101   : > { %8224 = vmatprep.subr.bf16.mxu0 %v9869_v5 }
 0x103   : > { %8047 = vmatmul.mubr.bf16.gmra.mrb[12].mxu1 %v10614_v19 }
 0x104   : > { %8225 = vmatpush3.bf16.msra.mxu0 %v9869_v5  ;;  %8050 = vmatprep.mubr.bf16.mxu1 %v10616_v20  ;;  %v9880_v5 = vld [vmem:[#allocation7 + $0x90] sm:$0xff]  }
 0x105   : > { %8258 = vmatprep.subr.bf16.mxu0 %v9870_v16 }
 0x107   : > { %8195 = vmatmul.mubr.bf16.gmra.mrb[16].mxu0 %v10559_v33 }
 0x108   : > { %8198 = vmatprep.mubr.bf16.mxu0 %v10564_v37 }
 0x10b   : > { %8051 = vmatmul.mubr.bf16.gmra.mrb[16].mxu1 %v10620_v29 }
 0x10c   : > { %8054 = vmatprep.mubr.bf16.mxu1 %v10622_v34 }
 0x10f   : > { %8199 = vmatmul.mubr.bf16.gmra.mrb[20].mxu0 %v10568_v40 }
 0x110   : > { %8202 = vmatprep.mubr.bf16.mxu0 %v10574_v48 }
 0x113   : > { %8055 = vmatmul.mubr.bf16.gmra.mrb[20].mxu1 %v10626_v42 }
 0x114   : > { %8058 = vmatprep.mubr.bf16.mxu1 %v10628_v43 }
 0x117   : > { %8203 = vmatmul.mubr.bf16.gmra.mrb[24].mxu0 %v10578_v52 }
 0x118   : > { %8206 = vmatprep.mubr.bf16.mxu0 %v10581_v56 }
 0x11b   : > { %8059 = vmatmul.mubr.bf16.gmra.mrb[24].mxu1 %v10632_v49 }
 0x11c   : > { %8062 = vmatprep.mubr.bf16.mxu1 %v10634_v50 }
 0x11f   : > { %8207 = vmatmul.mubr.bf16.gmra.mrb[28].mxu0 %v10586_v59 }
 0x120   : > { %8226 = vmatprep.mubr.bf16.mxu0 %v10651_v10  ;;  %v9901_v10 = vld [vmem:[#allocation7 + $0xd0] sm:$0xff]  }
 0x121   : > { %8070 = vmatprep.subr.bf16.mxu1 %v9901_v10 }
 0x122   : > { %8071 = vmatpush3.bf16.msra.mxu1 %v9901_v10  ;;  %v2139_v10 = vld [vmem:[#allocation2 + $0x1d1] sm:$0xff] }
 0x123   : > { %8072 = vmatprep.subr.bf16.mxu1 %v9902_v11  ;;  %8063 = vmatmul.mubr.bf16.gmra.mrb[28].mxu1 %v10638_v57 }
 0x124   : > { %8082 = vmatprep.mubr.bf16.mxu1 %v10671_v44  ;;  %v10761_v44 = vpack.c.bf16 %v2129_v36, %v2128_v35 }
 0x126   : > { %8073 = vmatpush3.bf16.msra.mxu1 %v9902_v11  ;;  %v10773_v11 = vpack.c.bf16 %v2137_v1, %v2136_v0 }
 0x127   : > { %8227 = vmatmul.mubr.bf16.vlgmr.msra.gmra.mrb[0].mxu0 %v10531_v9  ;;  %8074 = vmatprep.subr.bf16.mxu1 %v9904_v13 }
 0x128   : > { %8259 = vmatpush3.bf16.msra.mxu0 %v9870_v16  ;;  %8230 = vmatprep.mubr.bf16.mxu0 %v10535_v12  ;;  %v9881_v16 = vld [vmem:[#allocation7 + $0x98] sm:$0xff]  }
 0x129   : > { %8260 = vmatprep.subr.bf16.mxu0 %v9871_v45 }
 0x12a   : > { %8075 = vmatpush3.bf16.msra.mxu1 %v9904_v13 }
 0x12b   : > { %8076 = vmatprep.subr.bf16.mxu1 %v9905_v14 }
 0x12c   : > { %8261 = vmatpush3.bf16.msra.mxu0 %v9871_v45 }
 0x12d   : > { %8262 = vmatprep.subr.bf16.mxu0 %v9872_v46 }
 0x12e   : > { %8077 = vmatpush3.bf16.msra.mxu1 %v9905_v14  ;;  %v2140_v14 = vld [vmem:[#allocation2 + $0x1e9] sm:$0xff] }
 0x12f   : > { %8231 = vmatmul.mubr.bf16.gmra.mrb[4].mxu0 %v10539_v15  ;;  %8078 = vmatprep.subr.bf16.mxu1 %v9907_v61 }
 0x130   : > { %8234 = vmatprep.mubr.bf16.mxu0 %v10542_v18  ;;  %8263 = vmatpush3.bf16.msra.mxu0 %v9872_v46  ;;  %v2132_v46 = vld [vmem:[#allocation2 + $0x169] sm:$0xff] }
 0x131   : > { %8264 = vmatprep.subr.bf16.mxu0 %v9873_v47 }
 0x132   : > { %8079 = vmatpush3.bf16.msra.mxu1 %v9907_v61  ;;  %v2141_v61 = vld [vmem:[#allocation2 + $0x1f1] sm:$0xff] }
 0x133   : > { %8080 = vmatprep.subr.bf16.mxu1 %v9908_v62 }
 0x134   : > { %8265 = vmatpush3.bf16.msra.mxu0 %v9873_v47  ;;  %v2133_v47 = vld [vmem:[#allocation2 + $0x171] sm:$0xff] }
 0x135   : > { %8266 = vmatprep.subr.bf16.mxu0 %v9874_v51 }
 0x136   : > { %8081 = vmatpush3.bf16.msra.mxu1 %v9908_v62  ;;  %v10779_v62 = vpack.c.bf16 %v2141_v61, %v2140_v14 }
 0x137   : > { %8235 = vmatmul.mubr.bf16.gmra.mrb[8].mxu0 %v10547_v22 }
 0x138   : > { %8238 = vmatprep.mubr.bf16.mxu0 %v10549_v23  ;;  %8267 = vmatpush3.bf16.msra.mxu0 %v9874_v51  ;;  %v2134_v51 = vld [vmem:[#allocation2 + $0x189] sm:$0xff] }
 0x139   : > { %8268 = vmatprep.subr.bf16.mxu0 %v9875_v53  ;;  %8083 = vmatmul.mubr.bf16.vlgmr.msra.gmra.mrb[0].mxu1 %v10556_v31 }
 0x13a   : > { %8086 = vmatprep.mubr.bf16.mxu1 %v10584_v58  ;;  %v9895_v58 = vld [vmem:[#allocation7 + $0x148] sm:$0xff]  }
 0x13c   : > { %8269 = vmatpush3.bf16.msra.mxu0 %v9875_v53  ;;  %v2135_v53 = vld [vmem:[#allocation2 + $0x191] sm:$0xff] }
 0x13d   : > { %8270 = vmatprep.subr.bf16.mxu0 %v9876_v54 }
 0x13f   : > { %8239 = vmatmul.mubr.bf16.gmra.mrb[12].mxu0 %v10554_v30 }
 0x140   : > { %8242 = vmatprep.mubr.bf16.mxu0 %v10559_v33  ;;  %8271 = vmatpush3.bf16.msra.mxu0 %v9876_v54  ;;  %v10767_v54 = vpack.c.bf16 %v2133_v47, %v2132_v46 }
 0x141   : > { %8272 = vmatprep.subr.bf16.mxu0 %v9877_v55  ;;  %8087 = vmatmul.mubr.bf16.gmra.mrb[4].mxu1 %v10588_v60  ;;  %v2117_v60 = vld [vmem:[#allocation2 + $0x71] sm:$0xff] }
 0x142   : > { %8090 = vmatprep.mubr.bf16.mxu1 %v10608_v7  ;;  %v2118_v7 = vld [vmem:[#allocation2 + $0x89] sm:$0xff] }
 0x144   : > { %8273 = vmatpush3.bf16.msra.mxu0 %v9877_v55  ;;  %v10769_v55 = vpack.c.bf16 %v2135_v53, %v2134_v51  ;;  %v9924_v51 = vld [vmem:[#allocation9 + $0x30] sm:$0xff]   ;;  %v9925_v53 = vld [vmem:[#allocation9 + $0x38] sm:$0xff]  }
 0x145   : > { %8306 = vmatprep.subr.bf16.mxu0 %v9878_v4 }
 0x147   : > { %8243 = vmatmul.mubr.bf16.gmra.mrb[16].mxu0 %v10564_v37 }
 0x148   : > { %8246 = vmatprep.mubr.bf16.mxu0 %v10568_v40 }
 0x149   : > { %8091 = vmatmul.mubr.bf16.gmra.mrb[8].mxu1 %v10610_v8  ;;  %v2119_v8 = vld [vmem:[#allocation2 + $0x91] sm:$0xff] }
 0x14a   : > { %8094 = vmatprep.mubr.bf16.mxu1 %v10614_v19  ;;  %v9896_v19 = vld [vmem:[#allocation7 + $0x150] sm:$0xff]  }
 0x14f   : > { %8247 = vmatmul.mubr.bf16.gmra.mrb[20].mxu0 %v10574_v48 }
 0x150   : > { %8250 = vmatprep.mubr.bf16.mxu0 %v10578_v52 }
 0x151   : > { %8095 = vmatmul.mubr.bf16.gmra.mrb[12].mxu1 %v10616_v20 }
 0x152   : > { %8098 = vmatprep.mubr.bf16.mxu1 %v10620_v29  ;;  %v10745_v29 = vpack.c.bf16 %v2119_v8, %v2118_v7 }
 0x157   : > { %8251 = vmatmul.mubr.bf16.gmra.mrb[24].mxu0 %v10581_v56 }
 0x158   : > { %8254 = vmatprep.mubr.bf16.mxu0 %v10586_v59 }
 0x159   : > { %8099 = vmatmul.mubr.bf16.gmra.mrb[16].mxu1 %v10622_v34  ;;  %v9897_v34 = vld [vmem:[#allocation7 + $0x158] sm:$0xff]  }
 0x15a   : > { %8102 = vmatprep.mubr.bf16.mxu1 %v10626_v42  ;;  %v2120_v42 = vld [vmem:[#allocation2 + $0xa9] sm:$0xff] }
 0x15f   : > { %8255 = vmatmul.mubr.bf16.gmra.mrb[28].mxu0 %v10646_v3 }
 0x160   : > { %8274 = vmatprep.mubr.bf16.mxu0 %v10531_v9  ;;  %v9884_v9 = vld [vmem:[#allocation7 + $0xa0] sm:$0xff]  }
 0x161   : > { %8103 = vmatmul.mubr.bf16.gmra.mrb[20].mxu1 %v10628_v43  ;;  %v2121_v43 = vld [vmem:[#allocation2 + $0xb1] sm:$0xff] }
 0x162   : > { %8106 = vmatprep.mubr.bf16.mxu1 %v10632_v49  ;;  %v2122_v49 = vld [vmem:[#allocation2 + $0xc9] sm:$0xff] }
 0x167   : > { %8275 = vmatmul.mubr.bf16.vlgmr.msra.gmra.mrb[0].mxu0 %v10535_v12  ;;  %v9887_v12 = vld [vmem:[#allocation7 + $0xa8] sm:$0xff]  }
 0x168   : > { %8307 = vmatpush3.bf16.msra.mxu0 %v9878_v4  ;;  %8278 = vmatprep.mubr.bf16.mxu0 %v10539_v15  ;;  %v9890_v15 = vld [vmem:[#allocation7 + $0xb0] sm:$0xff]  }
 0x169   : > { %8308 = vmatprep.subr.bf16.mxu0 %v9879_v2  ;;  %8107 = vmatmul.mubr.bf16.gmra.mrb[24].mxu1 %v10634_v50  ;;  %v2123_v50 = vld [vmem:[#allocation2 + $0xd1] sm:$0xff]  ;;  %v2138_v4 = vld [vmem:[#allocation2 + $0x1c9] sm:$0xff] }
 0x16a   : > { %8110 = vmatprep.mubr.bf16.mxu1 %v10638_v57  ;;  %v9900_v57 = vld [vmem:[#allocation7 + $0x160] sm:$0xff]   ;;  %v10775_v13 = vpack.c.bf16 %v2139_v10, %v2138_v4 }
 0x16c   : > { %8309 = vmatpush3.bf16.msra.mxu0 %v9879_v2  ;;  %v9918_v2 = vld [vmem:[#allocation9] sm:$0xff]  }
 0x16d   : > { %8310 = vmatprep.subr.bf16.mxu0 %v9880_v5  ;;  %8450 = vmatprep.subr.bf16.mxu1 %v9918_v2 }
 0x16e   : > { %8451 = vmatpush3.bf16.msra.mxu1 %v9918_v2 }
 0x16f   : > { %8279 = vmatmul.mubr.bf16.gmra.mrb[4].mxu0 %v10542_v18  ;;  %v9893_v18 = vld [vmem:[#allocation7 + $0xb8] sm:$0xff]  }
 0x170   : > { %8282 = vmatprep.mubr.bf16.mxu0 %v10547_v22  ;;  %8311 = vmatpush3.bf16.msra.mxu0 %v9880_v5  ;;  %v9894_v22 = vld [vmem:[#allocation7 + $0x140] sm:$0xff]   ;;  %v9919_v5 = vld [vmem:[#allocation9 + $0x8] sm:$0xff]  }
 0x171   : > { %8312 = vmatprep.subr.bf16.mxu0 %v9881_v16  ;;  %8111 = vmatmul.mubr.bf16.gmra.mrb[28].mxu1 %v10640_v63  ;;  %v10749_v63 = vpack.c.bf16 %v2121_v43, %v2120_v42 }
 0x172   : > { %8466 = vmatprep.mubr.bf16.mxu1 %v10668_v38  ;;  %v2130_v38 = vld [vmem:[#allocation2 + $0x149] sm:$0xff]  ;;  %8452 = vmatprep.subr.bf16.mxu1 %v9919_v5 }
 0x173   : > { %v10763_v45 = vpack.c.bf16 %v2131_v39, %v2130_v38  ;;  %8453 = vmatpush3.bf16.msra.mxu1 %v9919_v5 }
 0x174   : > { %8313 = vmatpush3.bf16.msra.mxu0 %v9881_v16  ;;  %v9920_v16 = vld [vmem:[#allocation9 + $0x10] sm:$0xff]  }
 0x175   : > { %8314 = vmatprep.subr.bf16.mxu0 %v9884_v9  ;;  %8454 = vmatprep.subr.bf16.mxu1 %v9920_v16 }
 0x177   : > { %8283 = vmatmul.mubr.bf16.gmra.mrb[8].mxu0 %v10549_v23  ;;  %v2110_v23 = vld [vmem:[#allocation2 + $0x9] sm:$0xff]  ;;  %8455 = vmatpush3.bf16.msra.mxu1 %v9920_v16 }
 0x178   : > { %8286 = vmatprep.mubr.bf16.mxu0 %v10554_v30  ;;  %8315 = vmatpush3.bf16.msra.mxu0 %v9884_v9  ;;  %v2111_v30 = vld [vmem:[#allocation2 + $0x11] sm:$0xff]  ;;  %v9911_v9 = vld [vmem:[#allocation7 + $0x208] sm:$0xff]  }
 0x179   : > { %8316 = vmatprep.subr.bf16.mxu0 %v9887_v12  ;;  %v2146_v31 = vpack.c.bf16 %v2111_v30, %v2110_v23  ;;  %v9914_v23 = vld [vmem:[#allocation7 + $0x220] sm:$0xff]   ;;  %v9923_v30 = vld [vmem:[#allocation9 + $0x28] sm:$0xff]  }
 0x17c   : > { %8317 = vmatpush3.bf16.msra.mxu0 %v9887_v12  ;;  %v9921_v12 = vld [vmem:[#allocation9 + $0x18] sm:$0xff]  }
 0x17d   : > { %8318 = vmatprep.subr.bf16.mxu0 %v9890_v15  ;;  %8456 = vmatprep.subr.bf16.mxu1 %v9921_v12 }
 0x17e   : > { %8457 = vmatpush3.bf16.msra.mxu1 %v9921_v12 }
 0x17f   : > { %8287 = vmatmul.mubr.bf16.gmra.mrb[12].mxu0 %v10559_v33  ;;  %v2112_v33 = vld [vmem:[#allocation2 + $0x29] sm:$0xff] }
 0x180   : > { %8290 = vmatprep.mubr.bf16.mxu0 %v10564_v37  ;;  %8319 = vmatpush3.bf16.msra.mxu0 %v9890_v15  ;;  %v2113_v37 = vld [vmem:[#allocation2 + $0x31] sm:$0xff] }
 0x181   : > { %8320 = vmatprep.subr.bf16.mxu0 %v9893_v18  ;;  %v9912_v15 = vld [vmem:[#allocation7 + $0x210] sm:$0xff]  }
 0x184   : > { %8321 = vmatpush3.bf16.msra.mxu0 %v9893_v18  ;;  %v9922_v18 = vld [vmem:[#allocation9 + $0x20] sm:$0xff]  }
 0x185   : > { %8354 = vmatprep.subr.bf16.mxu0 %v9894_v22  ;;  %8458 = vmatprep.subr.bf16.mxu1 %v9922_v18 }
 0x186   : > { %8459 = vmatpush3.bf16.msra.mxu1 %v9922_v18 }
 0x187   : > { %8291 = vmatmul.mubr.bf16.gmra.mrb[16].mxu0 %v10568_v40  ;;  %v2114_v40 = vld [vmem:[#allocation2 + $0x49] sm:$0xff]  ;;  %8460 = vmatprep.subr.bf16.mxu1 %v9923_v30 }
 0x188   : > { %8294 = vmatprep.mubr.bf16.mxu0 %v10574_v48  ;;  %v2115_v48 = vld [vmem:[#allocation2 + $0x51] sm:$0xff] }
 0x18a   : > { %8461 = vmatpush3.bf16.msra.mxu1 %v9923_v30 }
 0x18b   : > { %8462 = vmatprep.subr.bf16.mxu1 %v9924_v51 }
 0x18e   : > { %8463 = vmatpush3.bf16.msra.mxu1 %v9924_v51 }
 0x18f   : > { %8295 = vmatmul.mubr.bf16.gmra.mrb[20].mxu0 %v10578_v52  ;;  %v10737_v52 = vpack.c.bf16 %v2113_v37, %v2112_v33  ;;  %v9916_v33 = vld [vmem:[#allocation7 + $0x230] sm:$0xff]   ;;  %v9917_v37 = vld [vmem:[#allocation7 + $0x238] sm:$0xff]   ;;  %8464 = vmatprep.subr.bf16.mxu1 %v9925_v53 }
 0x190   : > { %8298 = vmatprep.mubr.bf16.mxu0 %v10581_v56  ;;  %v10739_v56 = vpack.c.bf16 %v2115_v48, %v2114_v40  ;;  %v2142_v40 = vld [vmem:[#allocation2 + $0x209] sm:$0xff]  ;;  %v2143_v48 = vld [vmem:[#allocation2 + $0x211] sm:$0xff] }
 0x192   : > { %8465 = vmatpush3.bf16.msra.mxu1 %v9925_v53  ;;  %v9927_v53 = vld [vmem:[#allocation9 + $0xc8] sm:$0xff]  }
 0x197   : > { %8299 = vmatmul.mubr.bf16.gmra.mrb[24].mxu0 %v10586_v59  ;;  %v2116_v59 = vld [vmem:[#allocation2 + $0x69] sm:$0xff] }
 0x198   : > { %8302 = vmatprep.mubr.bf16.mxu0 %v10646_v3  ;;  %v10743_v20 = vpack.c.bf16 %v2117_v60, %v2116_v59  ;;  %v10751_v3 = vpack.c.bf16 %v2123_v50, %v2122_v49 }
 0x19f   : > { %8303 = vmatmul.mubr.bf16.gmra.mrb[28].mxu0 %v10263_v6  ;;  %v9903_v6 = vld [vmem:[#allocation7 + $0x168] sm:$0xff]  }
 0x1a0   : > { %8322 = vmatprep.mubr.bf16.mxu0 %v2146_v31  ;;  %v9915_v31 = vld [vmem:[#allocation7 + $0x228] sm:$0xff]  }
 0x1a7   : > { %8323 = vmatmul.mubr.bf16.vlgmr.msra.gmra.mrb[0].mxu0 %v10737_v52 }
 0x1a8   : > { %8355 = vmatpush3.bf16.msra.mxu0 %v9894_v22  ;;  %8326 = vmatprep.mubr.bf16.mxu0 %v10739_v56  ;;  %v9913_v22 = vld [vmem:[#allocation7 + $0x218] sm:$0xff]  }
 0x1a9   : > { %8356 = vmatprep.subr.bf16.mxu0 %v9895_v58 }
 0x1ac   : > { %8357 = vmatpush3.bf16.msra.mxu0 %v9895_v58 }
 0x1ad   : > { %8358 = vmatprep.subr.bf16.mxu0 %v9896_v19 }
 0x1af   : > { %8327 = vmatmul.mubr.bf16.gmra.mrb[4].mxu0 %v10743_v20 }
 0x1b0   : > { %8330 = vmatprep.mubr.bf16.mxu0 %v10745_v29  ;;  %8359 = vmatpush3.bf16.msra.mxu0 %v9896_v19 }
 0x1b1   : > { %8360 = vmatprep.subr.bf16.mxu0 %v9897_v34 }
 0x1b4   : > { %8361 = vmatpush3.bf16.msra.mxu0 %v9897_v34 }
 0x1b5   : > { %8362 = vmatprep.subr.bf16.mxu0 %v9900_v57 }
 0x1b7   : > { %8331 = vmatmul.mubr.bf16.gmra.mrb[8].mxu0 %v10749_v63 }
 0x1b8   : > { %8334 = vmatprep.mubr.bf16.mxu0 %v10751_v3  ;;  %8363 = vmatpush3.bf16.msra.mxu0 %v9900_v57 }
 0x1b9   : > { %8364 = vmatprep.subr.bf16.mxu0 %v9903_v6 }
 0x1bc   : > { %8365 = vmatpush3.bf16.msra.mxu0 %v9903_v6 }
 0x1bd   : > { %8366 = vmatprep.subr.bf16.mxu0 %v9906_v26 }
 0x1bf   : > { %8335 = vmatmul.mubr.bf16.gmra.mrb[12].mxu0 %v10755_v27 }
 0x1c0   : > { %8338 = vmatprep.mubr.bf16.mxu0 %v10757_v28  ;;  %8367 = vmatpush3.bf16.msra.mxu0 %v9906_v26  ;;  %v2163_v26 = vpack.c.bf16 %v2145_v24, %v2144_v21  ;;  %v10898_v24 = vld [vmem:[#allocation2 + $0x40] sm:$0xff] }
 0x1c1   : > { %8368 = vmatprep.subr.bf16.mxu0 %v9909_v32 }
 0x1c4   : > { %8369 = vmatpush3.bf16.msra.mxu0 %v9909_v32 }
 0x1c5   : > { %8402 = vmatprep.subr.bf16.mxu0 %v9910_v41 }
 0x1c7   : > { %8339 = vmatmul.mubr.bf16.gmra.mrb[16].mxu0 %v10761_v44 }
 0x1c8   : > { %8342 = vmatprep.mubr.bf16.mxu0 %v10763_v45 }
 0x1cf   : > { %8343 = vmatmul.mubr.bf16.gmra.mrb[20].mxu0 %v10767_v54 }
 0x1d0   : > { %8346 = vmatprep.mubr.bf16.mxu0 %v10769_v55 }
 0x1d7   : > { %8347 = vmatmul.mubr.bf16.gmra.mrb[24].mxu0 %v10773_v11 }
 0x1d8   : > { %8350 = vmatprep.mubr.bf16.mxu0 %v10775_v13 }
 0x1df   : > { %8351 = vmatmul.mubr.bf16.gmra.mrb[28].mxu0 %v10779_v62 }
 0x1e0   : > { %8370 = vmatprep.mubr.bf16.mxu0 %v10737_v52  ;;  %v2162_v52 = vpack.c.bf16 %v2143_v48, %v2142_v40 }
 0x1e7   : > { %8371 = vmatmul.mubr.bf16.vlgmr.msra.gmra.mrb[0].mxu0 %v10739_v56 }
 0x1e8   : > { %8403 = vmatpush3.bf16.msra.mxu0 %v9910_v41  ;;  %8374 = vmatprep.mubr.bf16.mxu0 %v10743_v20 }
 0x1e9   : > { %8404 = vmatprep.subr.bf16.mxu0 %v9911_v9 }
 0x1ec   : > { %8405 = vmatpush3.bf16.msra.mxu0 %v9911_v9 }
 0x1ed   : > { %8406 = vmatprep.subr.bf16.mxu0 %v9912_v15 }
 0x1ef   : > { %8375 = vmatmul.mubr.bf16.gmra.mrb[4].mxu0 %v10745_v29 }
 0x1f0   : > { %8378 = vmatprep.mubr.bf16.mxu0 %v10749_v63  ;;  %8407 = vmatpush3.bf16.msra.mxu0 %v9912_v15 }
 0x1f1   : > { %8408 = vmatprep.subr.bf16.mxu0 %v9913_v22 }
 0x1f4   : > { %8409 = vmatpush3.bf16.msra.mxu0 %v9913_v22 }
 0x1f5   : > { %8410 = vmatprep.subr.bf16.mxu0 %v9914_v23 }
 0x1f7   : > { %8379 = vmatmul.mubr.bf16.gmra.mrb[8].mxu0 %v10751_v3 }
 0x1f8   : > { %8382 = vmatprep.mubr.bf16.mxu0 %v10755_v27  ;;  %8411 = vmatpush3.bf16.msra.mxu0 %v9914_v23 }
 0x1f9   : > { %8412 = vmatprep.subr.bf16.mxu0 %v9915_v31 }
 0x1fc   : > { %8413 = vmatpush3.bf16.msra.mxu0 %v9915_v31 }
 0x1fd   : > { %8414 = vmatprep.subr.bf16.mxu0 %v9916_v33 }
 0x1ff   : > { %8383 = vmatmul.mubr.bf16.gmra.mrb[12].mxu0 %v10757_v28 }
 0x200   : > { %8386 = vmatprep.mubr.bf16.mxu0 %v10761_v44  ;;  %8415 = vmatpush3.bf16.msra.mxu0 %v9916_v33 }
 0x201   : > { %8416 = vmatprep.subr.bf16.mxu0 %v9917_v37 }
 0x204   : > { %8417 = vmatpush3.bf16.msra.mxu0 %v9917_v37 }
 0x207   : > { %8387 = vmatmul.mubr.bf16.gmra.mrb[16].mxu0 %v10763_v45 }
 0x208   : > { %8390 = vmatprep.mubr.bf16.mxu0 %v10767_v54 }
 0x20c   : > { %v8084_v58 = vpop.f32.mrb[0].mxu1 }
 0x20d   : > { %v865_v59 = vpop.f32.mrb[1].mxu1 }
 0x20e   : > { %v8085_v60 = vpop.f32.mrb[2].mxu1 }
 0x20f   : > { %8391 = vmatmul.mubr.bf16.gmra.mrb[20].mxu0 %v10769_v55  ;;  %v868_v7 = vpop.f32.mrb[3].mxu1 }
 0x210   : > { %8394 = vmatprep.mubr.bf16.mxu0 %v10773_v11 }
 0x214   : > { %v10804_v8 = vpop.f32.mrb[4].mxu1 }
 0x215   : > { %v10806_v19 = vpop.f32.mrb[5].mxu1 }
 0x217   : > { %8395 = vmatmul.mubr.bf16.gmra.mrb[24].mxu0 %v10775_v13 }
 0x218   : > { %8398 = vmatprep.mubr.bf16.mxu0 %v10779_v62 }
 0x21f   : > { %8399 = vmatmul.mubr.bf16.gmra.mrb[28].mxu0 %v2162_v52 }
 0x220   : > { %8418 = vmatprep.mubr.bf16.mxu0 %v10739_v56  ;;  %v10809_v56 = vpop.f32.mrb[6].mxu1 }
 0x227   : > { %8419 = vmatmul.mubr.bf16.vlgmr.msra.gmra.mrb[0].mxu0 %v10743_v20  ;;  %v10812_v20 = vpop.f32.mrb[7].mxu1 }
 0x228   : > { %8422 = vmatprep.mubr.bf16.mxu0 %v10745_v29  ;;  %v10814_v29 = vpop.f32.mrb[8].mxu1 }
 0x229   : > { %v10816_v34 = vpop.f32.mrb[9].mxu1 }
 0x22a   : > { %v10819_v42 = vpop.f32.mrb[10].mxu1 }
 0x22b   : > { %v10822_v43 = vpop.f32.mrb[11].mxu1 }
 0x22c   : > { %v10824_v49 = vpop.f32.mrb[12].mxu1 }
 0x22d   : > { %v10826_v50 = vpop.f32.mrb[13].mxu1 }
 0x22e   : > { %v10829_v57 = vpop.f32.mrb[14].mxu1 }
 0x22f   : > { %8423 = vmatmul.mubr.bf16.gmra.mrb[4].mxu0 %v10749_v63  ;;  %v10832_v63 = vpop.f32.mrb[15].mxu1 }
 0x230   : > { %8426 = vmatprep.mubr.bf16.mxu0 %v10751_v3  ;;  %v10834_v3 = vpop.f32.mrb[16].mxu1 }
 0x231   : > { %v10836_v6 = vpop.f32.mrb[17].mxu1 }
 0x232   : > { %v10839_v17 = vpop.f32.mrb[18].mxu1 }
 0x233   : > { %v10841_v25 = vpop.f32.mrb[19].mxu1 }
 0x237   : > { %8427 = vmatmul.mubr.bf16.gmra.mrb[8].mxu0 %v10755_v27  ;;  %v10843_v27 = vpop.f32.mrb[20].mxu1 }
 0x238   : > { %8430 = vmatprep.mubr.bf16.mxu0 %v10757_v28  ;;  %v10845_v28 = vpop.f32.mrb[21].mxu1 }
 0x239   : > { %v10847_v32 = vpop.f32.mrb[22].mxu1 }
 0x23a   : > { %v10849_v35 = vpop.f32.mrb[23].mxu1 }
 0x23c   : > { %v10851_v36 = vpop.f32.mrb[24].mxu1 }
 0x23d   : > { %v10853_v38 = vpop.f32.mrb[25].mxu1 }
 0x23e   : > { %v10855_v39 = vpop.f32.mrb[26].mxu1 }
 0x23f   : > { %8431 = vmatmul.mubr.bf16.gmra.mrb[12].mxu0 %v10761_v44  ;;  %v10857_v41 = vpop.f32.mrb[27].mxu1 }
 0x240   : > { %8434 = vmatprep.mubr.bf16.mxu0 %v10763_v45 }
 0x244   : > { %v10859_v44 = vpop.f32.mrb[28].mxu1 }
 0x245   : > { %v10861_v45 = vpop.f32.mrb[29].mxu1 }
 0x246   : > { %v10863_v46 = vpop.f32.mrb[30].mxu1 }
 0x247   : > { %8435 = vmatmul.mubr.bf16.gmra.mrb[16].mxu0 %v10767_v54  ;;  %v10865_v47 = vpop.f32.mrb[31].mxu1  ;;  %v9926_v54 = vld [vmem:[#allocation9 + $0xc0] sm:$0xff]  }
 0x248   : > { %8438 = vmatprep.mubr.bf16.mxu0 %v10769_v55  ;;  %8498 = vmatprep.subr.bf16.mxu1 %v9926_v54  ;;  %v10870_v55 = vld [vmem:[%s11495_s2] ss:$0 sm:$0xff] }
 0x249   : > { %v9114_v0 = vadd.f32 %v8084_v58, %v10870_v55  ;;  %v9116_v1 = vadd.f32 %v10870_v55, %v865_v59  ;;  %v9118_v10 = vadd.f32 %v8085_v60, %v10870_v55  ;;  %v9120_v14 = vadd.f32 %v10870_v55, %v868_v7 }
 0x24a   : > { %v9122_v15 = vadd.f32 %v10804_v8, %v10870_v55  ;;  %v9124_v18 = vadd.f32 %v10870_v55, %v10806_v19  ;;  %v9126_v23 = vadd.f32 %v10809_v56, %v10870_v55  ;;  %v9128_v33 = vadd.f32 %v10870_v55, %v10812_v20 }
 0x24f   : > { %8439 = vmatmul.mubr.bf16.gmra.mrb[20].mxu0 %v10773_v11 }
 0x250   : > { %8442 = vmatprep.mubr.bf16.mxu0 %v10775_v13 }
 0x257   : > { %8443 = vmatmul.mubr.bf16.gmra.mrb[24].mxu0 %v10779_v62 }
 0x258   : > { %8446 = vmatprep.mubr.bf16.mxu0 %v2162_v52 }
 0x25f   : > { %8447 = vmatmul.mubr.bf16.gmra.mrb[28].mxu0 %v2163_v26 }
 0x2fa   : > { %v8420_v4 = vpop.f32.mrb[0].mxu0 }
 0x2fb   : > { %v9115_v11 = vadd.f32 %v9114_v0, %v8420_v4  ;;  %v2779_v13 = vpop.f32.mrb[1].mxu0 }
 0x2fc   : > { %v9117_v61 = vadd.f32 %v9116_v1, %v2779_v13  ;;  %v8421_v62 = vpop.f32.mrb[2].mxu0  ;;  %v9130_v1 = vadd.f32 %v10814_v29, %v10870_v55  ;;  %v9134_v13 = vadd.f32 %v10819_v42, %v10870_v55 }
 0x2fd   : > { %2940 = vst [vmem:[#allocation2 + $0x48] sm:$0xff] %v9115_v11  ;;  %v9119_v2 = vadd.f32 %v9118_v10, %v8421_v62  ;;  %v2782_v5 = vpop.f32.mrb[3].mxu0  ;;  %v9132_v10 = vadd.f32 %v10870_v55, %v10816_v34  ;;  %v9136_v62 = vadd.f32 %v10870_v55, %v10822_v43 }
 0x2fe   : > { %2938 = vst [vmem:[#allocation2 + $0x28] sm:$0xff] %v9117_v61  ;;  %v9121_v16 = vadd.f32 %v9120_v14, %v2782_v5  ;;  %v9928_v5 = vld [vmem:[#allocation9 + $0xd0] sm:$0xff]  }
 0x2ff   : > { %2941 = vst [vmem:[#allocation2 + $0x50] sm:$0xff] %v9119_v2  ;;  %v10876_v9 = vpack.c.bf16 %v9119_v2, %v9115_v11 }
 0x300   : > { %2939 = vst [vmem:[#allocation2 + $0x30] sm:$0xff] %v9121_v16  ;;  %v10878_v12 = vpack.c.bf16 %v9121_v16, %v9117_v61 }
 0x302   : > { %v8424_v22 = vpop.f32.mrb[4].mxu0 }
 0x303   : > { %v9123_v30 = vadd.f32 %v9122_v15, %v8424_v22  ;;  %v2795_v31 = vpop.f32.mrb[5].mxu0 }
 0x304   : > { %v9125_v37 = vadd.f32 %v9124_v18, %v2795_v31  ;;  %v8425_v40 = vpop.f32.mrb[6].mxu0  ;;  %v2981_v51 = vld [vmem:[#allocation2 + $0x47] sm:$0xff] }
 0x305   : > { %2944 = vst [vmem:[#allocation2 + $0x88] sm:$0xff] %v9123_v30  ;;  %v9127_v48 = vadd.f32 %v9126_v23, %v8425_v40  ;;  %v2798_v52 = vpop.f32.mrb[7].mxu0  ;;  %v2979_v58 = vld [vmem:[#allocation2 + $0x27] sm:$0xff]  ;;  %v9929_v40 = vld [vmem:[#allocation9 + $0xd8] sm:$0xff]  }
 0x306   : > { %2942 = vst [vmem:[#allocation2 + $0x68] sm:$0xff] %v9125_v37  ;;  %v9129_v59 = vadd.f32 %v9128_v33, %v2798_v52  ;;  %v2982_v60 = vld [vmem:[#allocation2 + $0x4f] sm:$0xff]  ;;  %v9138_v52 = vadd.f32 %v10824_v49, %v10870_v55 }
 0x307   : > { %v10888_v7 = vld [vmem:[#allocation2 + $0x49] sm:$0xff]  ;;  %v10890_v8 = vld [vmem:[#allocation2 + $0x51] sm:$0xff]  ;;  %2945 = vst [vmem:[#allocation2 + $0x90] sm:$0xff] %v9127_v48  ;;  %v10892_v56 = vpack.c.bf16 %v9127_v48, %v9123_v30  ;;  %v10908_v4 = vpack.c.bf16 %v2982_v60, %v2981_v51 }
 0x308   : > { %v2980_v19 = vld [vmem:[#allocation2 + $0x2f] sm:$0xff]  ;;  %5594 = vst [vmem:[#allocation2 + $0x50] sm:$0xff] %v10898_v24  ;;  %2943 = vst [vmem:[#allocation2 + $0x70] sm:$0xff] %v9129_v59  ;;  %v10903_v0 = vpack.c.bf16 %v9129_v59, %v9125_v37  ;;  %v9140_v59 = vadd.f32 %v10870_v55, %v10826_v50 }
 0x309   : > { %v10894_v21 = vld [vmem:[#allocation2 + $0x29] sm:$0xff]  ;;  %v10896_v20 = vld [vmem:[#allocation2 + $0x31] sm:$0xff]  ;;  %v10901_v26 = vpack.c.bf16 %v2980_v19, %v2979_v58  ;;  %v9142_v19 = vadd.f32 %v10829_v57, %v10870_v55 }
 0x30a   : > { %5593 = vst [vmem:[#allocation2 + $0x30] sm:$0xff] %v10898_v24  ;;  %v8428_v11 = vpop.f32.mrb[8].mxu0 }
 0x30b   : > { %8467 = vmatmul.mubr.bf16.vlgmr.msra.gmra.mrb[32].mxu1 %v10901_v26  ;;  %v9131_v14 = vadd.f32 %v9130_v1, %v8428_v11  ;;  %v2811_v61 = vpop.f32.mrb[9].mxu0  ;;  %v9144_v1 = vadd.f32 %v10870_v55, %v10832_v63  ;;  %v9930_v11 = vld [vmem:[#allocation9 + $0xe0] sm:$0xff]  }
 0x30c   : > { %8470 = vmatprep.mubr.bf16.mxu1 %v10908_v4  ;;  %8499 = vmatpush3.bf16.msra.mxu1 %v9926_v54  ;;  %v9133_v29 = vadd.f32 %v9132_v10, %v2811_v61  ;;  %v8429_v2 = vpop.f32.mrb[10].mxu0  ;;  %v2985_v37 = vld [vmem:[#allocation2 + $0x87] sm:$0xff] }
 0x30d   : > { %8500 = vmatprep.subr.bf16.mxu1 %v9927_v53  ;;  %2948 = vst [vmem:[#allocation2 + $0xc8] sm:$0xff] %v9131_v14  ;;  %v9135_v34 = vadd.f32 %v9134_v13, %v8429_v2  ;;  %v2814_v16 = vpop.f32.mrb[11].mxu0  ;;  %v2983_v15 = vld [vmem:[#allocation2 + $0x67] sm:$0xff] }
 0x30e   : > { %2946 = vst [vmem:[#allocation2 + $0xa8] sm:$0xff] %v9133_v29  ;;  %v9137_v18 = vadd.f32 %v9136_v62, %v2814_v16  ;;  %v2986_v22 = vld [vmem:[#allocation2 + $0x8f] sm:$0xff] }
 0x30f   : > { %v10918_v42 = vld [vmem:[#allocation2 + $0x89] sm:$0xff]  ;;  %v10920_v23 = vld [vmem:[#allocation2 + $0x91] sm:$0xff]  ;;  %2949 = vst [vmem:[#allocation2 + $0xd0] sm:$0xff] %v9135_v34  ;;  %v10922_v30 = vpack.c.bf16 %v9135_v34, %v9131_v14  ;;  %v10936_v58 = vpack.c.bf16 %v2986_v22, %v2985_v37 }
 0x310   : > { %v2984_v54 = vld [vmem:[#allocation2 + $0x6f] sm:$0xff]  ;;  %8501 = vmatpush3.bf16.msra.mxu1 %v9927_v53  ;;  %5596 = vst [vmem:[#allocation2 + $0x90] sm:$0xff] %v10898_v24  ;;  %2947 = vst [vmem:[#allocation2 + $0xb0] sm:$0xff] %v9137_v18  ;;  %v10931_v48 = vpack.c.bf16 %v9137_v18, %v9133_v29 }
 0x311   : > { %v10924_v43 = vld [vmem:[#allocation2 + $0x69] sm:$0xff]  ;;  %v10926_v31 = vld [vmem:[#allocation2 + $0x71] sm:$0xff]  ;;  %v10929_v33 = vpack.c.bf16 %v2984_v54, %v2983_v15  ;;  %8502 = vmatprep.subr.bf16.mxu1 %v9928_v5  ;;  %v9146_v54 = vadd.f32 %v10834_v3, %v10870_v55 }
 0x312   : > { %5595 = vst [vmem:[#allocation2 + $0x70] sm:$0xff] %v10898_v24  ;;  %v8432_v60 = vpop.f32.mrb[12].mxu0  ;;  %v9931_v18 = vld [vmem:[#allocation9 + $0xe8] sm:$0xff]  }
 0x313   : > { %8471 = vmatmul.mubr.bf16.gmra.mrb[36].mxu1 %v10929_v33  ;;  %v9139_v51 = vadd.f32 %v9138_v52, %v8432_v60  ;;  %v2827_v53 = vpop.f32.mrb[13].mxu0 }
 0x314   : > { %8474 = vmatprep.mubr.bf16.mxu1 %v10936_v58  ;;  %8503 = vmatpush3.bf16.msra.mxu1 %v9928_v5  ;;  %v9141_v49 = vadd.f32 %v9140_v59, %v2827_v53  ;;  %v8433_v10 = vpop.f32.mrb[14].mxu0  ;;  %v2989_v15 = vld [vmem:[#allocation2 + $0xc7] sm:$0xff]  ;;  %v9150_v59 = vadd.f32 %v10839_v17, %v10870_v55 }
 0x315   : > { %8504 = vmatprep.subr.bf16.mxu1 %v9929_v40  ;;  %2952 = vst [vmem:[#allocation2 + $0x108] sm:$0xff] %v9139_v51  ;;  %v9143_v50 = vadd.f32 %v9142_v19, %v8433_v10  ;;  %v2830_v13 = vpop.f32.mrb[15].mxu0  ;;  %v2987_v14 = vld [vmem:[#allocation2 + $0xa7] sm:$0xff] }
 0x316   : > { %2950 = vst [vmem:[#allocation2 + $0xe8] sm:$0xff] %v9141_v49  ;;  %v9145_v61 = vadd.f32 %v9144_v1, %v2830_v13  ;;  %v2990_v62 = vld [vmem:[#allocation2 + $0xcf] sm:$0xff] }
 0x317   : > { %v10946_v57 = vld [vmem:[#allocation2 + $0xc9] sm:$0xff]  ;;  %v10948_v29 = vld [vmem:[#allocation2 + $0xd1] sm:$0xff]  ;;  %2953 = vst [vmem:[#allocation2 + $0x110] sm:$0xff] %v9143_v50  ;;  %v10950_v5 = vpack.c.bf16 %v9143_v50, %v9139_v51  ;;  %v10964_v37 = vpack.c.bf16 %v2990_v62, %v2989_v15  ;;  %v9152_v51 = vadd.f32 %v10870_v55, %v10841_v25 }
 0x318   : > { %v2988_v2 = vld [vmem:[#allocation2 + $0xaf] sm:$0xff]  ;;  %8505 = vmatpush3.bf16.msra.mxu1 %v9929_v40  ;;  %5598 = vst [vmem:[#allocation2 + $0xd0] sm:$0xff] %v10898_v24  ;;  %2951 = vst [vmem:[#allocation2 + $0xf0] sm:$0xff] %v9145_v61  ;;  %v10959_v22 = vpack.c.bf16 %v9145_v61, %v9141_v49  ;;  %v9148_v40 = vadd.f32 %v10870_v55, %v10836_v6 }
 0x319   : > { %v10952_v63 = vld [vmem:[#allocation2 + $0xa9] sm:$0xff]  ;;  %v10954_v34 = vld [vmem:[#allocation2 + $0xb1] sm:$0xff]  ;;  %v10957_v16 = vpack.c.bf16 %v2988_v2, %v2987_v14  ;;  %8506 = vmatprep.subr.bf16.mxu1 %v9930_v11 }
 0x31a   : > { %5597 = vst [vmem:[#allocation2 + $0xb0] sm:$0xff] %v10898_v24  ;;  %v8436_v52 = vpop.f32.mrb[16].mxu0  ;;  %v9932_v1 = vld [vmem:[#allocation9 + $0xf0] sm:$0xff]  }
 0x31b   : > { %8475 = vmatmul.mubr.bf16.gmra.mrb[40].mxu1 %v10957_v16  ;;  %v9147_v60 = vadd.f32 %v9146_v54, %v8436_v52  ;;  %v2843_v19 = vpop.f32.mrb[17].mxu0  ;;  %v9933_v54 = vld [vmem:[#allocation9 + $0xf8] sm:$0xff]  }
 0x31c   : > { %8478 = vmatprep.mubr.bf16.mxu1 %v10964_v37  ;;  %8507 = vmatpush3.bf16.msra.mxu1 %v9930_v11  ;;  %v9149_v3 = vadd.f32 %v9148_v40, %v2843_v19  ;;  %v8437_v53 = vpop.f32.mrb[18].mxu0  ;;  %v2993_v15 = vld [vmem:[#allocation2 + $0x107] sm:$0xff]  ;;  %v9158_v19 = vadd.f32 %v10847_v32, %v10870_v55 }
 0x31d   : > { %8508 = vmatprep.subr.bf16.mxu1 %v9931_v18  ;;  %2956 = vst [vmem:[#allocation2 + $0x148] sm:$0xff] %v9147_v60  ;;  %v9151_v6 = vadd.f32 %v9150_v59, %v8437_v53  ;;  %v2846_v49 = vpop.f32.mrb[19].mxu0  ;;  %v2991_v10 = vld [vmem:[#allocation2 + $0xe7] sm:$0xff]  ;;  %v9156_v59 = vadd.f32 %v10870_v55, %v10845_v28 }
 0x31e   : > { %2954 = vst [vmem:[#allocation2 + $0x128] sm:$0xff] %v9149_v3  ;;  %v9153_v50 = vadd.f32 %v9152_v51, %v2846_v49  ;;  %v2994_v13 = vld [vmem:[#allocation2 + $0x10f] sm:$0xff]  ;;  %v11002_v49 = vld [vmem:[#allocation9 + $0x180] sm:$0xff]  }
 0x31f   : > { %v10974_v17 = vld [vmem:[#allocation2 + $0x109] sm:$0xff]  ;;  %v10976_v14 = vld [vmem:[#allocation2 + $0x111] sm:$0xff]  ;;  %2957 = vst [vmem:[#allocation2 + $0x150] sm:$0xff] %v9151_v6  ;;  %v10978_v61 = vpack.c.bf16 %v9151_v6, %v9147_v60  ;;  %v10992_v52 = vpack.c.bf16 %v2994_v13, %v2993_v15 }
 0x320   : > { %v2992_v11 = vld [vmem:[#allocation2 + $0xef] sm:$0xff]  ;;  %8509 = vmatpush3.bf16.msra.mxu1 %v9931_v18  ;;  %5600 = vst [vmem:[#allocation2 + $0x110] sm:$0xff] %v10898_v24  ;;  %2955 = vst [vmem:[#allocation2 + $0x130] sm:$0xff] %v9153_v50  ;;  %v10987_v40 = vpack.c.bf16 %v9153_v50, %v9149_v3  ;;  %v9154_v18 = vadd.f32 %v10843_v27, %v10870_v55  ;;  %v9160_v3 = vadd.f32 %v10870_v55, %v10849_v35 }
 0x321   : > { %v10980_v25 = vld [vmem:[#allocation2 + $0xe9] sm:$0xff]  ;;  %v10982_v62 = vld [vmem:[#allocation2 + $0xf1] sm:$0xff]  ;;  %v10985_v2 = vpack.c.bf16 %v2992_v11, %v2991_v10  ;;  %8510 = vmatprep.subr.bf16.mxu1 %v9932_v1 }
 0x322   : > { %5599 = vst [vmem:[#allocation2 + $0xf0] sm:$0xff] %v10898_v24  ;;  %v8440_v60 = vpop.f32.mrb[20].mxu0 }
 0x323   : > { %8479 = vmatmul.mubr.bf16.gmra.mrb[44].mxu1 %v10985_v2  ;;  %v9155_v51 = vadd.f32 %v9154_v18, %v8440_v60  ;;  %v2859_v53 = vpop.f32.mrb[21].mxu0 }
 0x324   : > { %8482 = vmatprep.mubr.bf16.mxu1 %v10992_v52  ;;  %8511 = vmatpush3.bf16.msra.mxu1 %v9932_v1  ;;  %v9157_v27 = vadd.f32 %v9156_v59, %v2859_v53  ;;  %v8441_v6 = vpop.f32.mrb[22].mxu0  ;;  %v2997_v59 = vld [vmem:[#allocation2 + $0x147] sm:$0xff]  ;;  %v9164_v53 = vadd.f32 %v10870_v55, %v10853_v38 }
 0x325   : > { %8512 = vmatprep.subr.bf16.mxu1 %v9933_v54  ;;  %2960 = vst [vmem:[#allocation2 + $0x188] sm:$0xff] %v9155_v51  ;;  %v9159_v28 = vadd.f32 %v9158_v19, %v8441_v6  ;;  %v2862_v10 = vpop.f32.mrb[23].mxu0  ;;  %v2995_v50 = vld [vmem:[#allocation2 + $0x127] sm:$0xff] }
 0x326   : > { %2958 = vst [vmem:[#allocation2 + $0x168] sm:$0xff] %v9157_v27  ;;  %v9161_v13 = vadd.f32 %v9160_v3, %v2862_v10  ;;  %5588 = vst [vmem:[#allocation2 + $0x120] sm:$0xff] %v10898_v24  ;;  %v2998_v32 = vld [vmem:[#allocation2 + $0x14f] sm:$0xff]  ;;  %v9168_v10 = vadd.f32 %v10870_v55, %v10857_v41  ;;  %v9170_v41 = vadd.f32 %v10859_v44, %v10870_v55 }
 0x327   : > { %2961 = vst [vmem:[#allocation2 + $0x190] sm:$0xff] %v9159_v28  ;;  %v2996_v11 = vld [vmem:[#allocation2 + $0x12f] sm:$0xff]  ;;  %v11005_v1 = vpack.c.bf16 %v9159_v28, %v9155_v51  ;;  %v11019_v51 = vpack.c.bf16 %v2998_v32, %v2997_v59 }
 0x328   : > { %8513 = vmatpush3.bf16.msra.mxu1 %v9933_v54  ;;  %v4650_v35 = vld [vmem:[#allocation2 + $0x129] sm:$0xff]  ;;  %v4651_v15 = vld [vmem:[#allocation2 + $0x131] sm:$0xff]  ;;  %2959 = vst [vmem:[#allocation2 + $0x170] sm:$0xff] %v9161_v13  ;;  %v11007_v18 = vpack.c.bf16 %v2996_v11, %v2995_v50  ;;  %v11010_v60 = vpack.c.bf16 %v9161_v13, %v9157_v27  ;;  %v9162_v54 = vadd.f32 %v10851_v36, %v10870_v55 }
 0x329   : > { %8546 = vmatprep.subr.bf16.mxu1 %v11002_v49  ;;  %v11012_v19 = vpack.c.bf16 %v4651_v15, %v4650_v35  ;;  %5589 = vst [vmem:[#allocation2 + $0x128] sm:$0xff] %v10898_v24  ;;  %5591 = vst [vmem:[#allocation2 + $0x138] sm:$0xff] %v10898_v24  ;;  %v9166_v27 = vadd.f32 %v10855_v39, %v10870_v55 }
 0x32a   : > { %5601 = vst [vmem:[#allocation2 + $0x130] sm:$0xff] %v10898_v24  ;;  %v8444_v3 = vpop.f32.mrb[24].mxu0 }
 0x32b   : > { %8483 = vmatmul.mubr.bf16.gmra.mrb[48].mxu1 %v11007_v18  ;;  %v9163_v6 = vadd.f32 %v9162_v54, %v8444_v3  ;;  %v2875_v28 = vpop.f32.mrb[25].mxu0 }
 0x32c   : > { %8486 = vmatprep.mubr.bf16.mxu1 %v11019_v51  ;;  %v9165_v50 = vadd.f32 %v9164_v53, %v2875_v28  ;;  %v8445_v36 = vpop.f32.mrb[26].mxu0  ;;  %v3001_v54 = vld [vmem:[#allocation2 + $0x187] sm:$0xff] }
 0x32d   : > { %2964 = vst [vmem:[#allocation2 + $0x1c8] sm:$0xff] %v9163_v6  ;;  %v9167_v13 = vadd.f32 %v9166_v27, %v8445_v36  ;;  %v2878_v32 = vpop.f32.mrb[27].mxu0  ;;  %v2999_v35 = vld [vmem:[#allocation2 + $0x167] sm:$0xff]  ;;  %v9172_v27 = vadd.f32 %v10870_v55, %v10861_v45 }
 0x32e   : > { %2962 = vst [vmem:[#allocation2 + $0x1a8] sm:$0xff] %v9165_v50  ;;  %v9169_v38 = vadd.f32 %v9168_v10, %v2878_v32  ;;  %v3002_v11 = vld [vmem:[#allocation2 + $0x18f] sm:$0xff] }
 0x32f   : > { %2965 = vst [vmem:[#allocation2 + $0x1d0] sm:$0xff] %v9167_v13  ;;  %v3000_v15 = vld [vmem:[#allocation2 + $0x16f] sm:$0xff]  ;;  %v11029_v59 = vpack.c.bf16 %v9167_v13, %v9163_v6  ;;  %v11037_v53 = vpack.c.bf16 %v3002_v11, %v3001_v54  ;;  %v9174_v6 = vadd.f32 %v10863_v46, %v10870_v55 }
 0x330   : > { %2963 = vst [vmem:[#allocation2 + $0x1b0] sm:$0xff] %v9169_v38  ;;  %v11031_v39 = vpack.c.bf16 %v3000_v15, %v2999_v35  ;;  %v11033_v3 = vpack.c.bf16 %v9169_v38, %v9165_v50  ;;  %v9176_v50 = vadd.f32 %v10870_v55, %v10865_v47 }
 0x332   : > { %v8448_v28 = vpop.f32.mrb[28].mxu0 }
 0x333   : > { %8487 = vmatmul.mubr.bf16.gmra.mrb[52].mxu1 %v11031_v39  ;;  %v9171_v10 = vadd.f32 %v9170_v41, %v8448_v28  ;;  %v2891_v36 = vpop.f32.mrb[29].mxu0 }
 0x334   : > { %8490 = vmatprep.mubr.bf16.mxu1 %v11037_v53  ;;  %v9173_v13 = vadd.f32 %v9172_v27, %v2891_v36  ;;  %v8449_v44 = vpop.f32.mrb[30].mxu0  ;;  %v3005_v41 = vld [vmem:[#allocation2 + $0x1c7] sm:$0xff]  ;;  %v9936_v36 = vld [vmem:[#allocation9 + $0x190] sm:$0xff]  }
 0x335   : > { %2968 = vst [vmem:[#allocation2 + $0x208] sm:$0xff] %v9171_v10  ;;  %v9175_v32 = vadd.f32 %v9174_v6, %v8449_v44  ;;  %v2894_v38 = vpop.f32.mrb[31].mxu0  ;;  %v3003_v35 = vld [vmem:[#allocation2 + $0x1a7] sm:$0xff]  ;;  %v9941_v44 = vld [vmem:[#allocation9 + $0x1b8] sm:$0xff]  }
 0x336   : > { %2966 = vst [vmem:[#allocation2 + $0x1e8] sm:$0xff] %v9173_v13  ;;  %v9177_v45 = vadd.f32 %v9176_v50, %v2894_v38  ;;  %v3006_v11 = vld [vmem:[#allocation2 + $0x1cf] sm:$0xff]  ;;  %v9937_v50 = vld [vmem:[#allocation9 + $0x198] sm:$0xff]  }
 0x337   : > { %2969 = vst [vmem:[#allocation2 + $0x210] sm:$0xff] %v9175_v32  ;;  %v3004_v15 = vld [vmem:[#allocation2 + $0x1af] sm:$0xff]  ;;  %v11047_v54 = vpack.c.bf16 %v9175_v32, %v9171_v10  ;;  %v11053_v47 = vpack.c.bf16 %v3006_v11, %v3005_v41  ;;  %v9942_v32 = vld [vmem:[#allocation9 + $0x40] sm:$0xff]   ;;  %v9945_v41 = vld [vmem:[#allocation9 + $0x58] sm:$0xff]  }
 0x338   : > { %2967 = vst [vmem:[#allocation2 + $0x1f0] sm:$0xff] %v9177_v45  ;;  %v11049_v46 = vpack.c.bf16 %v3004_v15, %v3003_v35  ;;  %v11051_v28 = vpack.c.bf16 %v9177_v45, %v9173_v13  ;;  %v9935_v10 = vld [vmem:[#allocation9 + $0x188] sm:$0xff]   ;;  %v9938_v13 = vld [vmem:[#allocation9 + $0x1a0] sm:$0xff]   ;;  %v9944_v15 = vld [vmem:[#allocation9 + $0x50] sm:$0xff]  }
 0x339   : > { %v9943_v35 = vld [vmem:[#allocation9 + $0x48] sm:$0xff]  }
 0x33b   : > { %8491 = vmatmul.mubr.bf16.gmra.mrb[56].mxu1 %v11049_v46 }
 0x33c   : > { %8494 = vmatprep.mubr.bf16.mxu1 %v11053_v47  ;;  %v3009_v45 = vld [vmem:[#allocation2 + $0x207] sm:$0xff] }
 0x33d   : > { %v3007_v55 = vld [vmem:[#allocation2 + $0x1e7] sm:$0xff] }
 0x33e   : > { %v3010_v38 = vld [vmem:[#allocation2 + $0x20f] sm:$0xff] }
 0x33f   : > { %v3008_v27 = vld [vmem:[#allocation2 + $0x1ef] sm:$0xff]  ;;  %v3029_v11 = vpack.c.bf16 %v3010_v38, %v3009_v45  ;;  %v9965_v38 = vld [vmem:[#allocation9 + $0x1f8] sm:$0xff]   ;;  %v9966_v45 = vld [vmem:[#allocation9 + $0x80] sm:$0xff]  }
 0x340   : > { %v11057_v6 = vpack.c.bf16 %v3008_v27, %v3007_v55  ;;  %v9946_v55 = vld [vmem:[#allocation9 + $0x60] sm:$0xff]   ;;  %v9956_v27 = vld [vmem:[#allocation9 + $0x130] sm:$0xff]  }
 0x343   : > { %8495 = vmatmul.mubr.bf16.gmra.mrb[60].mxu1 %v11057_v6 }
 0x344   : > { %8514 = vmatprep.mubr.bf16.mxu1 %v10901_v26  ;;  %v9939_v26 = vld [vmem:[#allocation9 + $0x1a8] sm:$0xff]  }
 0x34b   : > { %8515 = vmatmul.mubr.bf16.vlgmr.msra.gmra.mrb[32].mxu1 %v10908_v4 }
 0x34c   : > { %8518 = vmatprep.mubr.bf16.mxu1 %v10929_v33  ;;  %8547 = vmatpush3.bf16.msra.mxu1 %v11002_v49  ;;  %v9940_v49 = vld [vmem:[#allocation9 + $0x1b0] sm:$0xff]  }
 0x34d   : > { %8548 = vmatprep.subr.bf16.mxu1 %v9935_v10 }
 0x350   : > { %8549 = vmatpush3.bf16.msra.mxu1 %v9935_v10  ;;  %v9958_v10 = vld [vmem:[#allocation9 + $0x1c0] sm:$0xff]  }
 0x351   : > { %8550 = vmatprep.subr.bf16.mxu1 %v9936_v36 }
 0x353   : > { %8519 = vmatmul.mubr.bf16.gmra.mrb[36].mxu1 %v10936_v58 }
 0x354   : > { %8522 = vmatprep.mubr.bf16.mxu1 %v10957_v16  ;;  %8551 = vmatpush3.bf16.msra.mxu1 %v9936_v36  ;;  %v11110_v36 = vld [vmem:[#allocation2 + $0x9] sm:$0xff] }
 0x355   : > { %8552 = vmatprep.subr.bf16.mxu1 %v9937_v50 }
 0x358   : > { %8553 = vmatpush3.bf16.msra.mxu1 %v9937_v50  ;;  %v11112_v50 = vld [vmem:[#allocation2 + $0x11] sm:$0xff] }
 0x359   : > { %8554 = vmatprep.subr.bf16.mxu1 %v9938_v13  ;;  %5592 = vst [vmem:[#allocation2 + $0x10] sm:$0xff] %v10898_v24 }
 0x35b   : > { %8523 = vmatmul.mubr.bf16.gmra.mrb[40].mxu1 %v10964_v37 }
 0x35c   : > { %8526 = vmatprep.mubr.bf16.mxu1 %v10985_v2  ;;  %8555 = vmatpush3.bf16.msra.mxu1 %v9938_v13  ;;  %v4668_v13 = vpack.c.bf16 %v11112_v50, %v11110_v36  ;;  %v4665_v36 = vld [vmem:[#allocation2 + $0x211] sm:$0xff] }
 0x35d   : > { %8556 = vmatprep.subr.bf16.mxu1 %v9939_v26 }
 0x360   : > { %8557 = vmatpush3.bf16.msra.mxu1 %v9939_v26  ;;  %v9959_v26 = vld [vmem:[#allocation9 + $0x1c8] sm:$0xff]  }
 0x361   : > { %8558 = vmatprep.subr.bf16.mxu1 %v9940_v49 }
 0x363   : > { %8527 = vmatmul.mubr.bf16.gmra.mrb[44].mxu1 %v10992_v52 }
 0x364   : > { %8530 = vmatprep.mubr.bf16.mxu1 %v11007_v18  ;;  %8559 = vmatpush3.bf16.msra.mxu1 %v9940_v49  ;;  %v9960_v49 = vld [vmem:[#allocation9 + $0x1d0] sm:$0xff]  }
 0x365   : > { %8560 = vmatprep.subr.bf16.mxu1 %v9941_v44 }
 0x368   : > { %8561 = vmatpush3.bf16.msra.mxu1 %v9941_v44  ;;  %v9961_v44 = vld [vmem:[#allocation9 + $0x1d8] sm:$0xff]  }
 0x369   : > { %8594 = vmatprep.subr.bf16.mxu1 %v9942_v32 }
 0x36b   : > { %8531 = vmatmul.mubr.bf16.gmra.mrb[48].mxu1 %v11019_v51 }
 0x36c   : > { %8534 = vmatprep.mubr.bf16.mxu1 %v11031_v39 }
 0x373   : > { %8535 = vmatmul.mubr.bf16.gmra.mrb[52].mxu1 %v11037_v53 }
 0x374   : > { %8538 = vmatprep.mubr.bf16.mxu1 %v11049_v46 }
 0x37b   : > { %8539 = vmatmul.mubr.bf16.gmra.mrb[56].mxu1 %v11053_v47 }
 0x37c   : > { %8542 = vmatprep.mubr.bf16.mxu1 %v11057_v6 }
 0x383   : > { %8543 = vmatmul.mubr.bf16.gmra.mrb[60].mxu1 %v3029_v11 }
 0x384   : > { %8562 = vmatprep.mubr.bf16.mxu1 %v10908_v4  ;;  %v9947_v4 = vld [vmem:[#allocation9 + $0x68] sm:$0xff]  }
 0x38b   : > { %8563 = vmatmul.mubr.bf16.vlgmr.msra.gmra.mrb[32].mxu1 %v10929_v33  ;;  %v9948_v33 = vld [vmem:[#allocation9 + $0x70] sm:$0xff]  }
 0x38c   : > { %8566 = vmatprep.mubr.bf16.mxu1 %v10936_v58  ;;  %8595 = vmatpush3.bf16.msra.mxu1 %v9942_v32  ;;  %v9949_v58 = vld [vmem:[#allocation9 + $0x78] sm:$0xff]   ;;  %v9964_v32 = vld [vmem:[#allocation9 + $0x1f0] sm:$0xff]  }
 0x38d   : > { %8596 = vmatprep.subr.bf16.mxu1 %v9943_v35 }
 0x390   : > { %8597 = vmatpush3.bf16.msra.mxu1 %v9943_v35  ;;  %v9968_v35 = vld [vmem:[#allocation9 + $0x90] sm:$0xff]  }
 0x391   : > { %8598 = vmatprep.subr.bf16.mxu1 %v9944_v15 }
 0x393   : > { %8567 = vmatmul.mubr.bf16.gmra.mrb[36].mxu1 %v10957_v16  ;;  %v9950_v16 = vld [vmem:[#allocation9 + $0x100] sm:$0xff]  }
 0x394   : > { %8570 = vmatprep.mubr.bf16.mxu1 %v10964_v37  ;;  %8599 = vmatpush3.bf16.msra.mxu1 %v9944_v15  ;;  %v3011_v37 = vld [vmem:[#allocation2 + $0x227] sm:$0xff]  ;;  %v9969_v15 = vld [vmem:[#allocation9 + $0x98] sm:$0xff]  }
 0x395   : > { %8600 = vmatprep.subr.bf16.mxu1 %v9945_v41 }
 0x398   : > { %8601 = vmatpush3.bf16.msra.mxu1 %v9945_v41  ;;  %v9970_v41 = vld [vmem:[#allocation9 + $0xa0] sm:$0xff]  }
 0x399   : > { %8602 = vmatprep.subr.bf16.mxu1 %v9946_v55 }
 0x39b   : > { %8571 = vmatmul.mubr.bf16.gmra.mrb[40].mxu1 %v10985_v2  ;;  %v3012_v2 = vld [vmem:[#allocation2 + $0x22f] sm:$0xff] }
 0x39c   : > { %8574 = vmatprep.mubr.bf16.mxu1 %v10992_v52  ;;  %8603 = vmatpush3.bf16.msra.mxu1 %v9946_v55  ;;  %v3030_v52 = vpack.c.bf16 %v3012_v2, %v3011_v37  ;;  %v4660_v55 = vld [vmem:[#allocation2 + $0x1c9] sm:$0xff]  ;;  %v4663_v37 = vld [vmem:[#allocation2 + $0x1f1] sm:$0xff] }
 0x39d   : > { %8604 = vmatprep.subr.bf16.mxu1 %v9947_v4 }
 0x3a0   : > { %8605 = vmatpush3.bf16.msra.mxu1 %v9947_v4  ;;  %v4661_v4 = vld [vmem:[#allocation2 + $0x1d1] sm:$0xff] }
 0x3a1   : > { %8606 = vmatprep.subr.bf16.mxu1 %v9948_v33 }
 0x3a3   : > { %8575 = vmatmul.mubr.bf16.gmra.mrb[44].mxu1 %v11007_v18  ;;  %v11092_v18 = vpack.c.bf16 %v10898_v24, %v10898_v24  ;;  %v9963_v24 = vld [vmem:[#allocation9 + $0x1e8] sm:$0xff]  }
 0x3a4   : > { %8578 = vmatprep.mubr.bf16.mxu1 %v11019_v51  ;;  %8607 = vmatpush3.bf16.msra.mxu1 %v9948_v33  ;;  %v9951_v51 = vld [vmem:[#allocation9 + $0x108] sm:$0xff]  }
 0x3a5   : > { %8608 = vmatprep.subr.bf16.mxu1 %v9949_v58 }
 0x3a8   : > { %8609 = vmatpush3.bf16.msra.mxu1 %v9949_v58  ;;  %v11204_v58 = vpack.c.bf16 %v4661_v4, %v4660_v55 }
 0x3a9   : > { %8642 = vmatprep.subr.bf16.mxu1 %v9950_v16 }
 0x3ab   : > { %8579 = vmatmul.mubr.bf16.gmra.mrb[48].mxu1 %v11031_v39  ;;  %v9952_v39 = vld [vmem:[#allocation9 + $0x110] sm:$0xff]  }
 0x3ac   : > { %8582 = vmatprep.mubr.bf16.mxu1 %v11037_v53  ;;  %v9953_v53 = vld [vmem:[#allocation9 + $0x118] sm:$0xff]  }
 0x3b3   : > { %8583 = vmatmul.mubr.bf16.gmra.mrb[52].mxu1 %v11049_v46  ;;  %v9954_v46 = vld [vmem:[#allocation9 + $0x120] sm:$0xff]  }
 0x3b4   : > { %8586 = vmatprep.mubr.bf16.mxu1 %v11053_v47  ;;  %v9955_v47 = vld [vmem:[#allocation9 + $0x128] sm:$0xff]  }
 0x3bb   : > { %8587 = vmatmul.mubr.bf16.gmra.mrb[56].mxu1 %v11057_v6  ;;  %v9957_v6 = vld [vmem:[#allocation9 + $0x138] sm:$0xff]  }
 0x3bc   : > { %8590 = vmatprep.mubr.bf16.mxu1 %v3029_v11  ;;  %v9967_v11 = vld [vmem:[#allocation9 + $0x88] sm:$0xff]  }
 0x3c3   : > { %8591 = vmatmul.mubr.bf16.gmra.mrb[60].mxu1 %v3030_v52  ;;  %v9990_v52 = vld [vmem:[#allocation10] sm:$0xff]  }
 0x3c4   : > { %8610 = vmatprep.mubr.bf16.mxu1 %v11092_v18  ;;  %8882 = vmatprep.subr.bf16.mxu0 %v9990_v52 }
 0x3c5   : > { %8883 = vmatpush3.bf16.msra.mxu0 %v9990_v52 }
 0x3cb   : > { %8611 = vmatmul.mubr.bf16.vlgmr.msra.gmra.mrb[32].mxu1 %v10878_v12 }
 0x3cc   : > { %8614 = vmatprep.mubr.bf16.mxu1 %v10876_v9  ;;  %8643 = vmatpush3.bf16.msra.mxu1 %v9950_v16  ;;  %v4662_v16 = vld [vmem:[#allocation2 + $0x1e9] sm:$0xff] }
 0x3cd   : > { %8644 = vmatprep.subr.bf16.mxu1 %v9951_v51  ;;  %v4683_v2 = vpack.c.bf16 %v4663_v37, %v4662_v16 }
 0x3d0   : > { %8645 = vmatpush3.bf16.msra.mxu1 %v9951_v51  ;;  %v9983_v51 = vld [vmem:[#allocation9 + $0x208] sm:$0xff]  }
 0x3d1   : > { %8646 = vmatprep.subr.bf16.mxu1 %v9952_v39 }
 0x3d3   : > { %8615 = vmatmul.mubr.bf16.gmra.mrb[36].mxu1 %v10903_v0 }
 0x3d4   : > { %8618 = vmatprep.mubr.bf16.mxu1 %v10892_v56  ;;  %8647 = vmatpush3.bf16.msra.mxu1 %v9952_v39  ;;  %v9984_v39 = vld [vmem:[#allocation9 + $0x210] sm:$0xff]  }
 0x3d5   : > { %8648 = vmatprep.subr.bf16.mxu1 %v9953_v53 }
 0x3d8   : > { %8649 = vmatpush3.bf16.msra.mxu1 %v9953_v53  ;;  %v9985_v53 = vld [vmem:[#allocation9 + $0x218] sm:$0xff]  }
 0x3d9   : > { %8650 = vmatprep.subr.bf16.mxu1 %v9954_v46 }
 0x3db   : > { %8619 = vmatmul.mubr.bf16.gmra.mrb[40].mxu1 %v10931_v48 }
 0x3dc   : > { %8622 = vmatprep.mubr.bf16.mxu1 %v10922_v30  ;;  %8651 = vmatpush3.bf16.msra.mxu1 %v9954_v46  ;;  %v9986_v46 = vld [vmem:[#allocation9 + $0x220] sm:$0xff]  }
 0x3dd   : > { %8652 = vmatprep.subr.bf16.mxu1 %v9955_v47 }
 0x3e0   : > { %8653 = vmatpush3.bf16.msra.mxu1 %v9955_v47  ;;  %v9987_v47 = vld [vmem:[#allocation9 + $0x228] sm:$0xff]  }
 0x3e1   : > { %8654 = vmatprep.subr.bf16.mxu1 %v9956_v27 }
 0x3e3   : > { %8623 = vmatmul.mubr.bf16.gmra.mrb[44].mxu1 %v10959_v22 }
 0x3e4   : > { %8626 = vmatprep.mubr.bf16.mxu1 %v10950_v5  ;;  %8655 = vmatpush3.bf16.msra.mxu1 %v9956_v27  ;;  %v9988_v27 = vld [vmem:[#allocation9 + $0x230] sm:$0xff]  }
 0x3e5   : > { %8656 = vmatprep.subr.bf16.mxu1 %v9957_v6 }
 0x3e8   : > { %8657 = vmatpush3.bf16.msra.mxu1 %v9957_v6  ;;  %v9989_v6 = vld [vmem:[#allocation9 + $0x238] sm:$0xff]  }
 0x3e9   : > { %8690 = vmatprep.subr.bf16.mxu1 %v9958_v10 }
 0x3eb   : > { %8627 = vmatmul.mubr.bf16.gmra.mrb[48].mxu1 %v10987_v40 }
 0x3ec   : > { %8630 = vmatprep.mubr.bf16.mxu1 %v10978_v61 }
 0x3f3   : > { %8631 = vmatmul.mubr.bf16.gmra.mrb[52].mxu1 %v11010_v60 }
 0x3f4   : > { %8634 = vmatprep.mubr.bf16.mxu1 %v11005_v1 }
 0x3fb   : > { %8635 = vmatmul.mubr.bf16.gmra.mrb[56].mxu1 %v11033_v3 }
 0x3fc   : > { %8638 = vmatprep.mubr.bf16.mxu1 %v11029_v59 }
 0x403   : > { %8639 = vmatmul.mubr.bf16.gmra.mrb[60].mxu1 %v11051_v28 }
 0x404   : > { %8658 = vmatprep.mubr.bf16.mxu1 %v10878_v12  ;;  %v9962_v12 = vld [vmem:[#allocation9 + $0x1e0] sm:$0xff]  }
 0x40b   : > { %8659 = vmatmul.mubr.bf16.vlgmr.msra.gmra.mrb[32].mxu1 %v10876_v9 }
 0x40c   : > { %8662 = vmatprep.mubr.bf16.mxu1 %v10903_v0  ;;  %8691 = vmatpush3.bf16.msra.mxu1 %v9958_v10  ;;  %v4664_v10 = vld [vmem:[#allocation2 + $0x209] sm:$0xff] }
 0x40d   : > { %8692 = vmatprep.subr.bf16.mxu1 %v9959_v26  ;;  %v4684_v50 = vpack.c.bf16 %v4665_v36, %v4664_v10 }
 0x410   : > { %8693 = vmatpush3.bf16.msra.mxu1 %v9959_v26  ;;  %v4667_v26 = vld [vmem:[#allocation2 + $0x231] sm:$0xff] }
 0x411   : > { %8694 = vmatprep.subr.bf16.mxu1 %v9960_v49 }
 0x413   : > { %8663 = vmatmul.mubr.bf16.gmra.mrb[36].mxu1 %v10892_v56 }
 0x414   : > { %8666 = vmatprep.mubr.bf16.mxu1 %v10931_v48  ;;  %8695 = vmatpush3.bf16.msra.mxu1 %v9960_v49 }
 0x415   : > { %8696 = vmatprep.subr.bf16.mxu1 %v9961_v44 }
 0x418   : > { %8697 = vmatpush3.bf16.msra.mxu1 %v9961_v44  ;;  %v9992_v44 = vld [vmem:[#allocation10 + $0x10] sm:$0xff]  }
 0x419   : > { %8698 = vmatprep.subr.bf16.mxu1 %v9962_v12 }
 0x41b   : > { %8667 = vmatmul.mubr.bf16.gmra.mrb[40].mxu1 %v10922_v30 }
 0x41c   : > { %8670 = vmatprep.mubr.bf16.mxu1 %v10959_v22  ;;  %8699 = vmatpush3.bf16.msra.mxu1 %v9962_v12  ;;  %v9994_v12 = vld [vmem:[#allocation10 + $0x20] sm:$0xff]  }
 0x41d   : > { %8700 = vmatprep.subr.bf16.mxu1 %v9963_v24 }
 0x420   : > { %8701 = vmatpush3.bf16.msra.mxu1 %v9963_v24  ;;  %v9995_v24 = vld [vmem:[#allocation10 + $0x28] sm:$0xff]  }
 0x421   : > { %8702 = vmatprep.subr.bf16.mxu1 %v9964_v32 }
 0x423   : > { %8671 = vmatmul.mubr.bf16.gmra.mrb[44].mxu1 %v10950_v5 }
 0x424   : > { %8674 = vmatprep.mubr.bf16.mxu1 %v10987_v40  ;;  %8703 = vmatpush3.bf16.msra.mxu1 %v9964_v32  ;;  %v9996_v32 = vld [vmem:[#allocation10 + $0x30] sm:$0xff]  }
 0x425   : > { %8704 = vmatprep.subr.bf16.mxu1 %v9965_v38 }
 0x428   : > { %8705 = vmatpush3.bf16.msra.mxu1 %v9965_v38  ;;  %v9997_v38 = vld [vmem:[#allocation10 + $0x38] sm:$0xff]  }
 0x429   : > { %8738 = vmatprep.subr.bf16.mxu1 %v9966_v45 }
 0x42b   : > { %8675 = vmatmul.mubr.bf16.gmra.mrb[48].mxu1 %v10978_v61 }
 0x42c   : > { %8678 = vmatprep.mubr.bf16.mxu1 %v11010_v60 }
 0x433   : > { %8679 = vmatmul.mubr.bf16.gmra.mrb[52].mxu1 %v11005_v1 }
 0x434   : > { %8682 = vmatprep.mubr.bf16.mxu1 %v11033_v3 }
 0x43b   : > { %8683 = vmatmul.mubr.bf16.gmra.mrb[56].mxu1 %v11029_v59 }
 0x43c   : > { %8686 = vmatprep.mubr.bf16.mxu1 %v11051_v28 }
 0x443   : > { %8687 = vmatmul.mubr.bf16.gmra.mrb[60].mxu1 %v11047_v54 }
 0x444   : > { %8706 = vmatprep.mubr.bf16.mxu1 %v10876_v9  ;;  %v9971_v9 = vld [vmem:[#allocation9 + $0xa8] sm:$0xff]  }
 0x44b   : > { %8707 = vmatmul.mubr.bf16.vlgmr.msra.gmra.mrb[32].mxu1 %v10903_v0  ;;  %v9973_v0 = vld [vmem:[#allocation9 + $0xb8] sm:$0xff]  }
 0x44c   : > { %8710 = vmatprep.mubr.bf16.mxu1 %v10892_v56  ;;  %8739 = vmatpush3.bf16.msra.mxu1 %v9966_v45  ;;  %v9972_v56 = vld [vmem:[#allocation9 + $0xb0] sm:$0xff]   ;;  %v11235_v45 = vld [vmem:[#allocation10 + $0xc0] sm:$0xff]  }
 0x44d   : > { %8740 = vmatprep.subr.bf16.mxu1 %v9967_v11 }
 0x450   : > { %8741 = vmatpush3.bf16.msra.mxu1 %v9967_v11  ;;  %v11237_v11 = vld [vmem:[#allocation10 + $0x200] sm:$0xff]  }
 0x451   : > { %8742 = vmatprep.subr.bf16.mxu1 %v9968_v35 }
 0x453   : > { %8711 = vmatmul.mubr.bf16.gmra.mrb[36].mxu1 %v10931_v48  ;;  %v11154_v48 = vpack.c.bf16 %v10896_v20, %v10894_v21  ;;  %v9977_v21 = vld [vmem:[#allocation9 + $0x158] sm:$0xff]   ;;  %v11168_v20 = vpack.c.bf16 %v10920_v23, %v10918_v42  ;;  %v9980_v42 = vld [vmem:[#allocation9 + $0x170] sm:$0xff]   ;;  %v11184_v23 = vpack.c.bf16 %v10982_v62, %v10980_v25 }
 0x454   : > { %8714 = vmatprep.mubr.bf16.mxu1 %v10922_v30  ;;  %8743 = vmatpush3.bf16.msra.mxu1 %v9968_v35  ;;  %v9974_v30 = vld [vmem:[#allocation9 + $0x140] sm:$0xff]   ;;  %v4654_v25 = vld [vmem:[#allocation2 + $0x169] sm:$0xff]  ;;  %v4657_v62 = vld [vmem:[#allocation2 + $0x191] sm:$0xff] }
 0x455   : > { %8744 = vmatprep.subr.bf16.mxu1 %v9969_v15  ;;  %v11242_v35 = vld [vmem:[#allocation10 + $0x208] sm:$0xff]  }
 0x458   : > { %8745 = vmatpush3.bf16.msra.mxu1 %v9969_v15  ;;  %v11246_v15 = vld [vmem:[#allocation10 + $0x210] sm:$0xff]  }
 0x459   : > { %8746 = vmatprep.subr.bf16.mxu1 %v9970_v41 }
 0x45b   : > { %8715 = vmatmul.mubr.bf16.gmra.mrb[40].mxu1 %v10959_v22  ;;  %v11158_v22 = vpack.c.bf16 %v10890_v8, %v10888_v7  ;;  %v9978_v7 = vld [vmem:[#allocation9 + $0x160] sm:$0xff]   ;;  %v11174_v8 = vpack.c.bf16 %v10954_v34, %v10952_v63  ;;  %v9981_v63 = vld [vmem:[#allocation9 + $0x178] sm:$0xff]   ;;  %v11188_v34 = vpack.c.bf16 %v10976_v14, %v10974_v17  ;;  %v4656_v14 = vld [vmem:[#allocation2 + $0x189] sm:$0xff] }
 0x45c   : > { %8718 = vmatprep.mubr.bf16.mxu1 %v10950_v5  ;;  %8747 = vmatpush3.bf16.msra.mxu1 %v9970_v41  ;;  %v9975_v5 = vld [vmem:[#allocation9 + $0x148] sm:$0xff]   ;;  %v4655_v17 = vld [vmem:[#allocation2 + $0x171] sm:$0xff] }
 0x45d   : > { %8748 = vmatprep.subr.bf16.mxu1 %v9971_v9  ;;  %v11250_v41 = vld [vmem:[#allocation10 + $0x218] sm:$0xff]  }
 0x460   : > { %8749 = vmatpush3.bf16.msra.mxu1 %v9971_v9  ;;  %v11254_v9 = vld [vmem:[#allocation10 + $0x220] sm:$0xff]  }
 0x461   : > { %8750 = vmatprep.subr.bf16.mxu1 %v9972_v56 }
 0x463   : > { %8719 = vmatmul.mubr.bf16.gmra.mrb[44].mxu1 %v10987_v40  ;;  %v11164_v40 = vpack.c.bf16 %v10926_v31, %v10924_v43  ;;  %v9979_v43 = vld [vmem:[#allocation9 + $0x168] sm:$0xff]   ;;  %v11178_v31 = vpack.c.bf16 %v10948_v29, %v10946_v57  ;;  %v9982_v57 = vld [vmem:[#allocation9 + $0x200] sm:$0xff]  }
 0x464   : > { %8722 = vmatprep.mubr.bf16.mxu1 %v10978_v61  ;;  %8751 = vmatpush3.bf16.msra.mxu1 %v9972_v56  ;;  %v9976_v61 = vld [vmem:[#allocation9 + $0x150] sm:$0xff]   ;;  %v11258_v56 = vld [vmem:[#allocation10 + $0x228] sm:$0xff]  }
 0x465   : > { %8752 = vmatprep.subr.bf16.mxu1 %v9973_v0  ;;  %v4652_v29 = vld [vmem:[#allocation2 + $0x149] sm:$0xff] }
 0x468   : > { %8753 = vmatpush3.bf16.msra.mxu1 %v9973_v0  ;;  %v11262_v0 = vld [vmem:[#allocation10 + $0x230] sm:$0xff]  }
 0x469   : > { %8786 = vmatprep.subr.bf16.mxu1 %v9974_v30 }
 0x46b   : > { %8723 = vmatmul.mubr.bf16.gmra.mrb[48].mxu1 %v11010_v60 }
 0x46c   : > { %8726 = vmatprep.mubr.bf16.mxu1 %v11005_v1  ;;  %v4653_v1 = vld [vmem:[#allocation2 + $0x151] sm:$0xff] }
 0x46d   : > { %v11192_v60 = vpack.c.bf16 %v4653_v1, %v4652_v29 }
 0x473   : > { %8727 = vmatmul.mubr.bf16.gmra.mrb[52].mxu1 %v11033_v3  ;;  %v11198_v3 = vpack.c.bf16 %v4657_v62, %v4656_v14 }
 0x474   : > { %8730 = vmatprep.mubr.bf16.mxu1 %v11029_v59  ;;  %v11196_v59 = vpack.c.bf16 %v4655_v17, %v4654_v25 }
 0x47b   : > { %8731 = vmatmul.mubr.bf16.gmra.mrb[56].mxu1 %v11051_v28  ;;  %v4659_v28 = vld [vmem:[#allocation2 + $0x1b1] sm:$0xff] }
 0x47c   : > { %8734 = vmatprep.mubr.bf16.mxu1 %v11047_v54  ;;  %v4658_v54 = vld [vmem:[#allocation2 + $0x1a9] sm:$0xff] }
 0x47d   : > { %v11202_v33 = vpack.c.bf16 %v4659_v28, %v4658_v54 }
 0x483   : > { %8735 = vmatmul.mubr.bf16.gmra.mrb[60].mxu1 %v11092_v18  ;;  %v9991_v18 = vld [vmem:[#allocation10 + $0x8] sm:$0xff]  }
 0x484   : > { %8754 = vmatprep.mubr.bf16.mxu1 %v4668_v13  ;;  %8884 = vmatprep.subr.bf16.mxu0 %v9991_v18  ;;  %v4666_v13 = vld [vmem:[#allocation2 + $0x229] sm:$0xff] }
 0x485   : > { %8885 = vmatpush3.bf16.msra.mxu0 %v9991_v18  ;;  %v4685_v49 = vpack.c.bf16 %v4667_v26, %v4666_v13 }
 0x486   : > { %8886 = vmatprep.subr.bf16.mxu0 %v9992_v44 }
 0x489   : > { %8887 = vmatpush3.bf16.msra.mxu0 %v9992_v44 }
 0x48b   : > { %8755 = vmatmul.mubr.bf16.vlgmr.msra.gmra.mrb[32].mxu1 %v11154_v48 }
 0x48c   : > { %8758 = vmatprep.mubr.bf16.mxu1 %v11158_v22  ;;  %8787 = vmatpush3.bf16.msra.mxu1 %v9974_v30  ;;  %v11266_v30 = vld [vmem:[#allocation10 + $0x238] sm:$0xff]  }
 0x48d   : > { %8788 = vmatprep.subr.bf16.mxu1 %v9975_v5 }
 0x490   : > { %8789 = vmatpush3.bf16.msra.mxu1 %v9975_v5 }
 0x491   : > { %8790 = vmatprep.subr.bf16.mxu1 %v9976_v61 }
 0x493   : > { %8759 = vmatmul.mubr.bf16.gmra.mrb[36].mxu1 %v11164_v40 }
 0x494   : > { %8762 = vmatprep.mubr.bf16.mxu1 %v11168_v20  ;;  %8791 = vmatpush3.bf16.msra.mxu1 %v9976_v61 }
 0x495   : > { %8792 = vmatprep.subr.bf16.mxu1 %v9977_v21 }
 0x498   : > { %8793 = vmatpush3.bf16.msra.mxu1 %v9977_v21 }
 0x499   : > { %8794 = vmatprep.subr.bf16.mxu1 %v9978_v7 }
 0x49b   : > { %8763 = vmatmul.mubr.bf16.gmra.mrb[40].mxu1 %v11174_v8 }
 0x49c   : > { %8766 = vmatprep.mubr.bf16.mxu1 %v11178_v31  ;;  %8795 = vmatpush3.bf16.msra.mxu1 %v9978_v7 }
 0x49d   : > { %8796 = vmatprep.subr.bf16.mxu1 %v9979_v43 }
 0x4a0   : > { %8797 = vmatpush3.bf16.msra.mxu1 %v9979_v43 }
 0x4a1   : > { %8798 = vmatprep.subr.bf16.mxu1 %v9980_v42 }
 0x4a3   : > { %8767 = vmatmul.mubr.bf16.gmra.mrb[44].mxu1 %v11184_v23 }
 0x4a4   : > { %8770 = vmatprep.mubr.bf16.mxu1 %v11188_v34  ;;  %8799 = vmatpush3.bf16.msra.mxu1 %v9980_v42 }
 0x4a5   : > { %8800 = vmatprep.subr.bf16.mxu1 %v9981_v63 }
 0x4a8   : > { %8801 = vmatpush3.bf16.msra.mxu1 %v9981_v63 }
 0x4a9   : > { %8834 = vmatprep.subr.bf16.mxu1 %v9982_v57 }
 0x4ab   : > { %8771 = vmatmul.mubr.bf16.gmra.mrb[48].mxu1 %v11012_v19 }
 0x4ac   : > { %8774 = vmatprep.mubr.bf16.mxu1 %v11192_v60 }
 0x4b3   : > { %8775 = vmatmul.mubr.bf16.gmra.mrb[52].mxu1 %v11196_v59 }
 0x4b4   : > { %8778 = vmatprep.mubr.bf16.mxu1 %v11198_v3 }
 0x4bb   : > { %8779 = vmatmul.mubr.bf16.gmra.mrb[56].mxu1 %v11202_v33 }
 0x4bc   : > { %8782 = vmatprep.mubr.bf16.mxu1 %v11204_v58 }
 0x4c3   : > { %8783 = vmatmul.mubr.bf16.gmra.mrb[60].mxu1 %v4683_v2 }
 0x4c4   : > { %8802 = vmatprep.mubr.bf16.mxu1 %v11154_v48  ;;  %v11273_v48 = vld [vmem:[%s11497_s4] ss:$0 sm:$0xff] }
 0x4cb   : > { %8803 = vmatmul.mubr.bf16.vlgmr.msra.gmra.mrb[32].mxu1 %v11158_v22 }
 0x4cc   : > { %8806 = vmatprep.mubr.bf16.mxu1 %v11164_v40  ;;  %8835 = vmatpush3.bf16.msra.mxu1 %v9982_v57 }
 0x4cd   : > { %8836 = vmatprep.subr.bf16.mxu1 %v9983_v51 }
 0x4d0   : > { %8837 = vmatpush3.bf16.msra.mxu1 %v9983_v51 }
 0x4d1   : > { %8838 = vmatprep.subr.bf16.mxu1 %v9984_v39 }
 0x4d3   : > { %8807 = vmatmul.mubr.bf16.gmra.mrb[36].mxu1 %v11168_v20 }
 0x4d4   : > { %8810 = vmatprep.mubr.bf16.mxu1 %v11174_v8  ;;  %8839 = vmatpush3.bf16.msra.mxu1 %v9984_v39 }
 0x4d5   : > { %8840 = vmatprep.subr.bf16.mxu1 %v9985_v53 }
 0x4d8   : > { %8841 = vmatpush3.bf16.msra.mxu1 %v9985_v53  ;;  %v5609_v53 = vld [vmem:[#allocation2 + $0x7] sm:$0xff] }
 0x4d9   : > { %8842 = vmatprep.subr.bf16.mxu1 %v9986_v46 }
 0x4db   : > { %8811 = vmatmul.mubr.bf16.gmra.mrb[40].mxu1 %v11178_v31 }
 0x4dc   : > { %8814 = vmatprep.mubr.bf16.mxu1 %v11184_v23  ;;  %8843 = vmatpush3.bf16.msra.mxu1 %v9986_v46 }
 0x4dd   : > { %8844 = vmatprep.subr.bf16.mxu1 %v9987_v47 }
 0x4e0   : > { %8845 = vmatpush3.bf16.msra.mxu1 %v9987_v47 }
 0x4e1   : > { %8846 = vmatprep.subr.bf16.mxu1 %v9988_v27 }
 0x4e3   : > { %8815 = vmatmul.mubr.bf16.gmra.mrb[44].mxu1 %v11188_v34 }
 0x4e4   : > { %8818 = vmatprep.mubr.bf16.mxu1 %v11012_v19  ;;  %8847 = vmatpush3.bf16.msra.mxu1 %v9988_v27 }
 0x4e5   : > { %8848 = vmatprep.subr.bf16.mxu1 %v9989_v6 }
 0x4e8   : > { %8849 = vmatpush3.bf16.msra.mxu1 %v9989_v6 }
 0x4e9   : > { %9098 = vmatprep.subr.bf16.mxu1 %v11237_v11 }
 0x4eb   : > { %8819 = vmatmul.mubr.bf16.gmra.mrb[48].mxu1 %v11192_v60 }
 0x4ec   : > { %8822 = vmatprep.mubr.bf16.mxu1 %v11196_v59 }
 0x4f3   : > { %8823 = vmatmul.mubr.bf16.gmra.mrb[52].mxu1 %v11198_v3 }
 0x4f4   : > { %8826 = vmatprep.mubr.bf16.mxu1 %v11202_v33 }
 0x4fb   : > { %8827 = vmatmul.mubr.bf16.gmra.mrb[56].mxu1 %v11204_v58 }
 0x4fc   : > { %8830 = vmatprep.mubr.bf16.mxu1 %v4683_v2 }
 0x503   : > { %8831 = vmatmul.mubr.bf16.gmra.mrb[60].mxu1 %v4684_v50 }
 0x504   : > { %8850 = vmatprep.mubr.bf16.mxu1 %v11158_v22 }
 0x50b   : > { %8851 = vmatmul.mubr.bf16.vlgmr.msra.gmra.mrb[32].mxu1 %v11164_v40 }
 0x50c   : > { %8854 = vmatprep.mubr.bf16.mxu1 %v11168_v20  ;;  %9106 = vmatpush3.bf16.msra.mxu1 %v11237_v11 }
 0x50d   : > { %9099 = vmatprep.subr.bf16.mxu1 %v11242_v35 }
 0x510   : > { %9107 = vmatpush3.bf16.msra.mxu1 %v11242_v35 }
 0x511   : > { %9100 = vmatprep.subr.bf16.mxu1 %v11246_v15 }
 0x513   : > { %8855 = vmatmul.mubr.bf16.gmra.mrb[36].mxu1 %v11174_v8 }
 0x514   : > { %8858 = vmatprep.mubr.bf16.mxu1 %v11178_v31  ;;  %9108 = vmatpush3.bf16.msra.mxu1 %v11246_v15 }
 0x515   : > { %9101 = vmatprep.subr.bf16.mxu1 %v11250_v41 }
 0x518   : > { %9109 = vmatpush3.bf16.msra.mxu1 %v11250_v41 }
 0x519   : > { %9102 = vmatprep.subr.bf16.mxu1 %v11254_v9 }
 0x51b   : > { %8859 = vmatmul.mubr.bf16.gmra.mrb[40].mxu1 %v11184_v23 }
 0x51c   : > { %8862 = vmatprep.mubr.bf16.mxu1 %v11188_v34  ;;  %9110 = vmatpush3.bf16.msra.mxu1 %v11254_v9 }
 0x51d   : > { %9103 = vmatprep.subr.bf16.mxu1 %v11258_v56 }
 0x520   : > { %9111 = vmatpush3.bf16.msra.mxu1 %v11258_v56 }
 0x521   : > { %9104 = vmatprep.subr.bf16.mxu1 %v11262_v0 }
 0x523   : > { %8863 = vmatmul.mubr.bf16.gmra.mrb[44].mxu1 %v11012_v19  ;;  %v9993_v19 = vld [vmem:[#allocation10 + $0x18] sm:$0xff]  }
 0x524   : > { %8866 = vmatprep.mubr.bf16.mxu1 %v11192_v60  ;;  %8888 = vmatprep.subr.bf16.mxu0 %v9993_v19 }
 0x525   : > { %8889 = vmatpush3.bf16.msra.mxu0 %v9993_v19  ;;  %9112 = vmatpush3.bf16.msra.mxu1 %v11262_v0 }
 0x526   : > { %8890 = vmatprep.subr.bf16.mxu0 %v9994_v12  ;;  %9105 = vmatprep.subr.bf16.mxu1 %v11266_v30 }
 0x529   : > { %8891 = vmatpush3.bf16.msra.mxu0 %v9994_v12  ;;  %9113 = vmatpush3.bf16.msra.mxu1 %v11266_v30 }
 0x52a   : > { %8892 = vmatprep.subr.bf16.mxu0 %v9995_v24 }
 0x52b   : > { %8867 = vmatmul.mubr.bf16.gmra.mrb[48].mxu1 %v11196_v59 }
 0x52c   : > { %8870 = vmatprep.mubr.bf16.mxu1 %v11198_v3 }
 0x52d   : > { %8893 = vmatpush3.bf16.msra.mxu0 %v9995_v24 }
 0x52e   : > { %8894 = vmatprep.subr.bf16.mxu0 %v9996_v32 }
 0x531   : > { %8895 = vmatpush3.bf16.msra.mxu0 %v9996_v32 }
 0x532   : > { %8896 = vmatprep.subr.bf16.mxu0 %v9997_v38 }
 0x533   : > { %8871 = vmatmul.mubr.bf16.gmra.mrb[52].mxu1 %v11202_v33 }
 0x534   : > { %8874 = vmatprep.mubr.bf16.mxu1 %v11204_v58 }
 0x535   : > { %8897 = vmatpush3.bf16.msra.mxu0 %v9997_v38 }
 0x536   : > { %8906 = vmatprep.subr.bf16.mxu0 %v11235_v45 }
 0x53b   : > { %8875 = vmatmul.mubr.bf16.gmra.mrb[56].mxu1 %v4683_v2 }
 0x53c   : > { %8878 = vmatprep.mubr.bf16.mxu1 %v4684_v50 }
 0x543   : > { %8879 = vmatmul.mubr.bf16.gmra.mrb[60].mxu1 %v4685_v49 }
 0x5de   : > { %v8852_v5 = vpop.f32.mrb[32].mxu1 }
 0x5df   : > { %v9178_v22 = vadd.f32 %v8852_v5, %v11273_v48  ;;  %v5301_v61 = vpop.f32.mrb[33].mxu1 }
 0x5e0   : > { %v9179_v40 = vadd.f32 %v11273_v48, %v5301_v61  ;;  %v8853_v21 = vpop.f32.mrb[34].mxu1 }
 0x5e1   : > { %5462 = vst [vmem:[#allocation3 + $0x10] sm:$0xff] %v9178_v22  ;;  %v9180_v20 = vadd.f32 %v8853_v21, %v11273_v48  ;;  %v5304_v7 = vpop.f32.mrb[35].mxu1 }
 0x5e2   : > { %5460 = vst [vmem:[#allocation3] sm:$0xff] %v9179_v40  ;;  %v9181_v8 = vadd.f32 %v11273_v48, %v5304_v7 }
 0x5e3   : > { %5463 = vst [vmem:[#allocation3 + $0x18] sm:$0xff] %v9180_v20 }
 0x5e4   : > { %5461 = vst [vmem:[#allocation3 + $0x8] sm:$0xff] %v9181_v8 }
 0x5e6   : > { %v8856_v43 = vpop.f32.mrb[36].mxu1 }
 0x5e7   : > { %v9182_v31 = vadd.f32 %v8856_v43, %v11273_v48  ;;  %v5317_v42 = vpop.f32.mrb[37].mxu1 }
 0x5e8   : > { %v9183_v23 = vadd.f32 %v11273_v48, %v5317_v42  ;;  %v8857_v63 = vpop.f32.mrb[38].mxu1 }
 0x5e9   : > { %5466 = vst [vmem:[#allocation3 + $0x30] sm:$0xff] %v9182_v31  ;;  %v9184_v34 = vadd.f32 %v8857_v63, %v11273_v48  ;;  %v5320_v57 = vpop.f32.mrb[39].mxu1 }
 0x5ea   : > { %v5494_v29 = vld [vmem:[#allocation3 + $0x10] ss:$2 sm:$0xff]  ;;  %v5526_v1 = vld [vmem:[#allocation3 + $0x11] ss:$2 sm:$0xff]  ;;  %5464 = vst [vmem:[#allocation3 + $0x20] sm:$0xff] %v9183_v23  ;;  %v9185_v60 = vadd.f32 %v11273_v48, %v5320_v57 }
 0x5eb   : > { %v5556_v25 = vmax.f32 %v5494_v29, %v5526_v1  ;;  %v5492_v17 = vld [vmem:[#allocation3] ss:$2 sm:$0xff]  ;;  %v5524_v14 = vld [vmem:[#allocation3 + $0x1] ss:$2 sm:$0xff]  ;;  %5467 = vst [vmem:[#allocation3 + $0x38] sm:$0xff] %v9184_v34 }
 0x5ec   : > { %v5555_v62 = vmax.f32 %v5492_v17, %v5524_v14  ;;  %5465 = vst [vmem:[#allocation3 + $0x28] sm:$0xff] %v9185_v60 }
 0x5ee   : > { %v11283_v59 = vmax.f32 %v5555_v62, %v5556_v25  ;;  %v8860_v3 = vpop.f32.mrb[40].mxu1 }
 0x5ef   : > { %v9186_v54 = vadd.f32 %v8860_v3, %v11273_v48  ;;  %v5333_v28 = vpop.f32.mrb[41].mxu1 }
 0x5f0   : > { %5579 = vst [vmem:[#allocation2 + $0x28] sm:$0xff] %v11283_v59  ;;  %v9187_v55 = vadd.f32 %v11273_v48, %v5333_v28  ;;  %v8861_v4 = vpop.f32.mrb[42].mxu1 }
 0x5f1   : > { %5470 = vst [vmem:[#allocation3 + $0x50] sm:$0xff] %v9186_v54  ;;  %v9188_v33 = vadd.f32 %v8861_v4, %v11273_v48  ;;  %v5336_v58 = vpop.f32.mrb[43].mxu1 }
 0x5f2   : > { %v5498_v16 = vld [vmem:[#allocation3 + $0x30] ss:$2 sm:$0xff]  ;;  %v5530_v37 = vld [vmem:[#allocation3 + $0x31] ss:$2 sm:$0xff]  ;;  %5468 = vst [vmem:[#allocation3 + $0x40] sm:$0xff] %v9187_v55  ;;  %v9189_v2 = vadd.f32 %v11273_v48, %v5336_v58 }
 0x5f3   : > { %v5558_v52 = vmax.f32 %v5498_v16, %v5530_v37  ;;  %v5496_v18 = vld [vmem:[#allocation3 + $0x20] ss:$2 sm:$0xff]  ;;  %v5528_v51 = vld [vmem:[#allocation3 + $0x21] ss:$2 sm:$0xff]  ;;  %5471 = vst [vmem:[#allocation3 + $0x58] sm:$0xff] %v9188_v33 }
 0x5f4   : > { %v5557_v39 = vmax.f32 %v5496_v18, %v5528_v51  ;;  %5469 = vst [vmem:[#allocation3 + $0x48] sm:$0xff] %v9189_v2  ;;  %v10000_v33 = vld [vmem:[#allocation10 + $0xc8] sm:$0xff]  }
 0x5f6   : > { %v11290_v46 = vmax.f32 %v5557_v39, %v5558_v52  ;;  %v8864_v47 = vpop.f32.mrb[44].mxu1 }
 0x5f7   : > { %v9190_v27 = vadd.f32 %v8864_v47, %v11273_v48  ;;  %v5349_v6 = vpop.f32.mrb[45].mxu1  ;;  %v11293_v10 = vld [vmem:[#allocation2 + $0x27] sm:$0xff] }
 0x5f8   : > { %5580 = vst [vmem:[#allocation2 + $0x48] sm:$0xff] %v11290_v46  ;;  %v9191_v36 = vadd.f32 %v11273_v48, %v5349_v6  ;;  %v8865_v50 = vpop.f32.mrb[46].mxu1  ;;  %v7450_v13 = vpack.c.bf16 %v11293_v10, %v5609_v53  ;;  %v7463_v26 = vpack.c.bf16 %v11290_v46, %v11283_v59 }
 0x5f9   : > { %5474 = vst [vmem:[#allocation3 + $0x70] sm:$0xff] %v9190_v27  ;;  %v9192_v49 = vadd.f32 %v8865_v50, %v11273_v48  ;;  %v5352_v44 = vpop.f32.mrb[47].mxu1  ;;  %v10002_v27 = vld [vmem:[#allocation10 + $0xd0] sm:$0xff]  }
 0x5fa   : > { %v5502_v19 = vld [vmem:[#allocation3 + $0x50] ss:$2 sm:$0xff]  ;;  %v5534_v12 = vld [vmem:[#allocation3 + $0x51] ss:$2 sm:$0xff]  ;;  %5472 = vst [vmem:[#allocation3 + $0x60] sm:$0xff] %v9191_v36  ;;  %v9193_v24 = vadd.f32 %v11273_v48, %v5352_v44  ;;  %8898 = vmatprep.mubr.bf16.mxu0 %v7450_v13 }
 0x5fb   : > { %v5560_v32 = vmax.f32 %v5502_v19, %v5534_v12  ;;  %v5500_v38 = vld [vmem:[#allocation3 + $0x40] ss:$2 sm:$0xff]  ;;  %v5532_v5 = vld [vmem:[#allocation3 + $0x41] ss:$2 sm:$0xff]  ;;  %5475 = vst [vmem:[#allocation3 + $0x78] sm:$0xff] %v9192_v49  ;;  %v10004_v19 = vld [vmem:[#allocation10 + $0xd8] sm:$0xff]  }
 0x5fc   : > { %v5559_v22 = vmax.f32 %v5500_v38, %v5532_v5  ;;  %5473 = vst [vmem:[#allocation3 + $0x68] sm:$0xff] %v9193_v24 }
 0x5fe   : > { %v11302_v61 = vmax.f32 %v5559_v22, %v5560_v32  ;;  %v8868_v40 = vpop.f32.mrb[48].mxu1 }
 0x5ff   : > { %v9194_v21 = vadd.f32 %v8868_v40, %v11273_v48  ;;  %v5365_v20 = vpop.f32.mrb[49].mxu1  ;;  %v11316_v3 = vld [vmem:[#allocation2 + $0x47] sm:$0xff] }
 0x600   : > { %5581 = vst [vmem:[#allocation2 + $0x68] sm:$0xff] %v11302_v61  ;;  %v9195_v7 = vadd.f32 %v11273_v48, %v5365_v20  ;;  %v8869_v8 = vpop.f32.mrb[50].mxu1  ;;  %v11309_v43 = vpack.c.bf16 %v11302_v61, %v11290_v46  ;;  %v10041_v46 = vld [vmem:[#allocation10 + $0x1d8] sm:$0xff]  }
 0x601   : > { %5478 = vst [vmem:[#allocation3 + $0x90] sm:$0xff] %v9194_v21  ;;  %v9196_v31 = vadd.f32 %v8869_v8, %v11273_v48  ;;  %v5368_v42 = vpop.f32.mrb[51].mxu1 }
 0x602   : > { %v5506_v23 = vld [vmem:[#allocation3 + $0x70] ss:$2 sm:$0xff]  ;;  %v5538_v63 = vld [vmem:[#allocation3 + $0x71] ss:$2 sm:$0xff]  ;;  %5476 = vst [vmem:[#allocation3 + $0x80] sm:$0xff] %v9195_v7  ;;  %v9197_v34 = vadd.f32 %v11273_v48, %v5368_v42  ;;  %v10006_v7 = vld [vmem:[#allocation10 + $0xe0] sm:$0xff]  }
 0x603   : > { %v5562_v57 = vmax.f32 %v5506_v23, %v5538_v63  ;;  %v5504_v29 = vld [vmem:[#allocation3 + $0x60] ss:$2 sm:$0xff]  ;;  %v5536_v1 = vld [vmem:[#allocation3 + $0x61] ss:$2 sm:$0xff]  ;;  %5479 = vst [vmem:[#allocation3 + $0x98] sm:$0xff] %v9196_v31 }
 0x604   : > { %v5561_v60 = vmax.f32 %v5504_v29, %v5536_v1  ;;  %5477 = vst [vmem:[#allocation3 + $0x88] sm:$0xff] %v9197_v34 }
 0x606   : > { %v11313_v25 = vmax.f32 %v5561_v60, %v5562_v57  ;;  %v8872_v17 = vpop.f32.mrb[52].mxu1  ;;  %v10008_v60 = vld [vmem:[#allocation10 + $0xe8] sm:$0xff]  }
 0x607   : > { %v9198_v14 = vadd.f32 %v8872_v17, %v11273_v48  ;;  %v5381_v62 = vpop.f32.mrb[53].mxu1  ;;  %v11318_v54 = vld [vmem:[#allocation2 + $0x67] sm:$0xff] }
 0x608   : > { %5582 = vst [vmem:[#allocation2 + $0x88] sm:$0xff] %v11313_v25  ;;  %v9199_v28 = vadd.f32 %v11273_v48, %v5381_v62  ;;  %v8873_v55 = vpop.f32.mrb[54].mxu1  ;;  %v11324_v4 = vpack.c.bf16 %v11318_v54, %v11316_v3  ;;  %v7464_v58 = vpack.c.bf16 %v11313_v25, %v11302_v61  ;;  %v10043_v61 = vld [vmem:[#allocation10 + $0x1e8] sm:$0xff]  }
 0x609   : > { %5482 = vst [vmem:[#allocation3 + $0xb0] sm:$0xff] %v9198_v14  ;;  %v9200_v16 = vadd.f32 %v8873_v55, %v11273_v48  ;;  %v5384_v37 = vpop.f32.mrb[55].mxu1 }
 0x60a   : > { %v5510_v2 = vld [vmem:[#allocation3 + $0x90] ss:$2 sm:$0xff]  ;;  %v5542_v52 = vld [vmem:[#allocation3 + $0x91] ss:$2 sm:$0xff]  ;;  %5480 = vst [vmem:[#allocation3 + $0xa0] sm:$0xff] %v9199_v28  ;;  %v9201_v18 = vadd.f32 %v11273_v48, %v5384_v37  ;;  %8899 = vmatmul.mubr.bf16.vlgmr.msra.gmra.mrb[32].mxu0 %v11324_v4 }
 0x60b   : > { %v5564_v51 = vmax.f32 %v5510_v2, %v5542_v52  ;;  %v5508_v39 = vld [vmem:[#allocation3 + $0x80] ss:$2 sm:$0xff]  ;;  %v5540_v53 = vld [vmem:[#allocation3 + $0x81] ss:$2 sm:$0xff]  ;;  %5483 = vst [vmem:[#allocation3 + $0xb8] sm:$0xff] %v9200_v16  ;;  %8907 = vmatpush3.bf16.msra.mxu0 %v11235_v45 }
 0x60c   : > { %v5563_v47 = vmax.f32 %v5508_v39, %v5540_v53  ;;  %5481 = vst [vmem:[#allocation3 + $0xa8] sm:$0xff] %v9201_v18  ;;  %8908 = vmatprep.subr.bf16.mxu0 %v10000_v33  ;;  %v10010_v18 = vld [vmem:[#allocation10 + $0xf0] sm:$0xff]   ;;  %v10012_v39 = vld [vmem:[#allocation10 + $0xf8] sm:$0xff]  }
 0x60e   : > { %v11332_v6 = vmax.f32 %v5563_v47, %v5564_v51  ;;  %v8876_v36 = vpop.f32.mrb[56].mxu1 }
 0x60f   : > { %v9202_v50 = vadd.f32 %v8876_v36, %v11273_v48  ;;  %v5397_v13 = vpop.f32.mrb[57].mxu1  ;;  %8909 = vmatpush3.bf16.msra.mxu0 %v10000_v33  ;;  %v11346_v63 = vld [vmem:[#allocation2 + $0x87] sm:$0xff] }
 0x610   : > { %5583 = vst [vmem:[#allocation2 + $0xa8] sm:$0xff] %v11332_v6  ;;  %v9203_v49 = vadd.f32 %v11273_v48, %v5397_v13  ;;  %v8877_v44 = vpop.f32.mrb[58].mxu1  ;;  %8910 = vmatprep.subr.bf16.mxu0 %v10002_v27  ;;  %v11339_v45 = vpack.c.bf16 %v11332_v6, %v11313_v25  ;;  %v10044_v25 = vld [vmem:[#allocation10 + $0x1f0] sm:$0xff]  }
 0x611   : > { %5486 = vst [vmem:[#allocation3 + $0xd0] sm:$0xff] %v9202_v50  ;;  %v9204_v12 = vadd.f32 %v8877_v44, %v11273_v48  ;;  %v5400_v24 = vpop.f32.mrb[59].mxu1 }
 0x612   : > { %v5514_v32 = vld [vmem:[#allocation3 + $0xb0] ss:$2 sm:$0xff]  ;;  %v5546_v38 = vld [vmem:[#allocation3 + $0xb1] ss:$2 sm:$0xff]  ;;  %5484 = vst [vmem:[#allocation3 + $0xc0] sm:$0xff] %v9203_v49  ;;  %v9205_v5 = vadd.f32 %v11273_v48, %v5400_v24  ;;  %v10014_v49 = vld [vmem:[#allocation10 + $0x180] sm:$0xff]  }
 0x613   : > { %v5566_v22 = vmax.f32 %v5514_v32, %v5546_v38  ;;  %v5512_v40 = vld [vmem:[#allocation3 + $0xa0] ss:$2 sm:$0xff]  ;;  %v5544_v21 = vld [vmem:[#allocation3 + $0xa1] ss:$2 sm:$0xff]  ;;  %5487 = vst [vmem:[#allocation3 + $0xd8] sm:$0xff] %v9204_v12  ;;  %8911 = vmatpush3.bf16.msra.mxu0 %v10002_v27 }
 0x614   : > { %v5565_v20 = vmax.f32 %v5512_v40, %v5544_v21  ;;  %5485 = vst [vmem:[#allocation3 + $0xc8] sm:$0xff] %v9205_v5  ;;  %8912 = vmatprep.subr.bf16.mxu0 %v10004_v19  ;;  %v7454_v40 = vpack.c.bf16 %v11316_v3, %v11293_v10  ;;  %v6561_v21 = vld [vmem:[#allocation2 + $0x129] sm:$0xff] }
 0x615   : > { %v10016_v10 = vld [vmem:[#allocation10 + $0x190] sm:$0xff]  }
 0x616   : > { %v11343_v8 = vmax.f32 %v5565_v20, %v5566_v22  ;;  %v8880_v31 = vpop.f32.mrb[60].mxu1 }
 0x617   : > { %v9206_v42 = vadd.f32 %v8880_v31, %v11273_v48  ;;  %v5413_v23 = vpop.f32.mrb[61].mxu1  ;;  %v11348_v34 = vld [vmem:[#allocation2 + $0xa7] sm:$0xff]  ;;  %8913 = vmatpush3.bf16.msra.mxu0 %v10004_v19 }
 0x618   : > { %5584 = vst [vmem:[#allocation2 + $0xc8] sm:$0xff] %v11343_v8  ;;  %v9207_v57 = vadd.f32 %v11273_v48, %v5413_v23  ;;  %v8881_v29 = vpop.f32.mrb[62].mxu1  ;;  %v11354_v1 = vpack.c.bf16 %v11348_v34, %v11346_v63  ;;  %8914 = vmatprep.subr.bf16.mxu0 %v10006_v7  ;;  %v7465_v17 = vpack.c.bf16 %v11343_v8, %v11332_v6  ;;  %v10046_v6 = vld [vmem:[#allocation10 + $0x80] sm:$0xff]  }
 0x619   : > { %5490 = vst [vmem:[#allocation3 + $0xf0] sm:$0xff] %v9206_v42  ;;  %v9208_v14 = vadd.f32 %v8881_v29, %v11273_v48  ;;  %v5416_v62 = vpop.f32.mrb[63].mxu1  ;;  %v10015_v42 = vld [vmem:[#allocation10 + $0x188] sm:$0xff]  }
 0x61a   : > { %v5518_v28 = vld [vmem:[#allocation3 + $0xd0] ss:$2 sm:$0xff]  ;;  %v5550_v55 = vld [vmem:[#allocation3 + $0xd1] ss:$2 sm:$0xff]  ;;  %5488 = vst [vmem:[#allocation3 + $0xe0] sm:$0xff] %v9207_v57  ;;  %v9209_v33 = vadd.f32 %v11273_v48, %v5416_v62  ;;  %8902 = vmatprep.mubr.bf16.mxu0 %v11354_v1  ;;  %v10022_v62 = vld [vmem:[#allocation10 + $0x40] sm:$0xff]  }
 0x61b   : > { %v5568_v16 = vmax.f32 %v5518_v28, %v5550_v55  ;;  %v5516_v37 = vld [vmem:[#allocation3 + $0xc0] ss:$2 sm:$0xff]  ;;  %v5548_v2 = vld [vmem:[#allocation3 + $0xc1] ss:$2 sm:$0xff]  ;;  %5491 = vst [vmem:[#allocation3 + $0xf8] sm:$0xff] %v9208_v14  ;;  %8915 = vmatpush3.bf16.msra.mxu0 %v10006_v7  ;;  %v7455_v7 = vpack.c.bf16 %v11346_v63, %v11318_v54  ;;  %v10021_v14 = vld [vmem:[#allocation10 + $0x1b8] sm:$0xff]  }
 0x61c   : > { %v5567_v52 = vmax.f32 %v5516_v37, %v5548_v2  ;;  %5489 = vst [vmem:[#allocation3 + $0xe8] sm:$0xff] %v9209_v33  ;;  %8916 = vmatprep.subr.bf16.mxu0 %v10008_v60  ;;  %v10018_v54 = vld [vmem:[#allocation10 + $0x1a0] sm:$0xff]   ;;  %v10019_v63 = vld [vmem:[#allocation10 + $0x1a8] sm:$0xff]  }
 0x61d   : > { %v10023_v28 = vld [vmem:[#allocation10 + $0x48] sm:$0xff]   ;;  %v11394_v37 = vld [vmem:[#allocation2 + $0x40] sm:$0xff] }
 0x61e   : > { %v11361_v51 = vmax.f32 %v5567_v52, %v5568_v16  ;;  %v5618_v55 = vld [vmem:[#allocation2 + $0x127] sm:$0xff]  ;;  %v10025_v16 = vld [vmem:[#allocation10 + $0x58] sm:$0xff]   ;;  %v7459_v2 = vpack.c.bf16 %v11283_v59, %v11394_v37  ;;  %v10040_v59 = vld [vmem:[#allocation10 + $0x1d0] sm:$0xff]  }
 0x61f   : > { %8917 = vmatpush3.bf16.msra.mxu0 %v10008_v60  ;;  %v5615_v19 = vld [vmem:[#allocation2 + $0xc7] sm:$0xff]  ;;  %v10017_v60 = vld [vmem:[#allocation10 + $0x198] sm:$0xff]  }
 0x620   : > { %5585 = vst [vmem:[#allocation2 + $0xe8] sm:$0xff] %v11361_v51  ;;  %8918 = vmatprep.subr.bf16.mxu0 %v10010_v18  ;;  %v11366_v48 = vpack.c.bf16 %v11361_v51, %v11343_v8  ;;  %v11370_v24 = vld [vmem:[#allocation2 + $0xc9] sm:$0xff]  ;;  %v7456_v57 = vpack.c.bf16 %v5615_v19, %v11348_v34  ;;  %v10026_v52 = vld [vmem:[#allocation10 + $0x60] sm:$0xff]  }
 0x621   : > { %v10020_v34 = vld [vmem:[#allocation10 + $0x1b0] sm:$0xff]   ;;  %v10047_v8 = vld [vmem:[#allocation10 + $0x88] sm:$0xff]  }
 0x622   : > { %v5522_v53 = vld [vmem:[#allocation3 + $0xf0] ss:$2 sm:$0xff]  ;;  %v5554_v47 = vld [vmem:[#allocation3 + $0xf1] ss:$2 sm:$0xff] }
 0x623   : > { %v5570_v27 = vmax.f32 %v5522_v53, %v5554_v47  ;;  %v5520_v36 = vld [vmem:[#allocation3 + $0xe0] ss:$2 sm:$0xff]  ;;  %v5552_v50 = vld [vmem:[#allocation3 + $0xe1] ss:$2 sm:$0xff]  ;;  %8919 = vmatpush3.bf16.msra.mxu0 %v10010_v18  ;;  %v10028_v18 = vld [vmem:[#allocation10 + $0x70] sm:$0xff]  }
 0x624   : > { %v5569_v13 = vmax.f32 %v5520_v36, %v5552_v50  ;;  %8920 = vmatprep.subr.bf16.mxu0 %v10012_v39  ;;  %v10030_v53 = vld [vmem:[#allocation10 + $0x100] sm:$0xff]   ;;  %v10031_v47 = vld [vmem:[#allocation10 + $0x108] sm:$0xff]   ;;  %v10033_v36 = vld [vmem:[#allocation10 + $0x118] sm:$0xff]  }
 0x625   : > { %v10034_v50 = vld [vmem:[#allocation10 + $0x120] sm:$0xff]  }
 0x626   : > { %v11368_v44 = vmax.f32 %v5569_v13, %v5570_v27  ;;  %v10032_v27 = vld [vmem:[#allocation10 + $0x110] sm:$0xff]   ;;  %v10035_v13 = vld [vmem:[#allocation10 + $0x128] sm:$0xff]  }
 0x627   : > { %v5616_v12 = vld [vmem:[#allocation2 + $0xe7] sm:$0xff]  ;;  %8921 = vmatpush3.bf16.msra.mxu0 %v10012_v39  ;;  %v10029_v39 = vld [vmem:[#allocation10 + $0x78] sm:$0xff]  }
 0x628   : > { %v11372_v32 = vld [vmem:[#allocation2 + $0xe9] sm:$0xff]  ;;  %5586 = vst [vmem:[#allocation2 + $0x108] sm:$0xff] %v11368_v44  ;;  %v7453_v38 = vpack.c.bf16 %v5616_v12, %v5615_v19  ;;  %8930 = vmatprep.subr.bf16.mxu0 %v10014_v49  ;;  %v7466_v22 = vpack.c.bf16 %v11368_v44, %v11361_v51  ;;  %v10037_v19 = vld [vmem:[#allocation10 + $0x138] sm:$0xff]  }
 0x629   : > { %v11377_v5 = vpack.c.bf16 %v11372_v32, %v11370_v24  ;;  %v6553_v51 = vld [vmem:[#allocation2 + $0x29] sm:$0xff] }
 0x62a   : > { %8903 = vmatmul.mubr.bf16.gmra.mrb[36].mxu0 %v7453_v38 }
 0x62b   : > { %9094 = vmatprep.mubr.bf16.mxu1 %v11377_v5  ;;  %8922 = vmatprep.mubr.bf16.mxu0 %v7454_v40  ;;  %v10049_v40 = vld [vmem:[#allocation10 + $0x98] sm:$0xff]  }
 0x62f   : > { %v11384_v20 = vld [vmem:[#allocation2 + $0x109] sm:$0xff] }
 0x630   : > { %v7476_v31 = vpack.c.bf16 %v6561_v21, %v11384_v20  ;;  %v7475_v23 = vpack.c.bf16 %v11384_v20, %v11372_v32  ;;  %v5617_v3 = vld [vmem:[#allocation2 + $0x107] sm:$0xff] }
 0x631   : > { %v7457_v29 = vpack.c.bf16 %v5617_v3, %v5616_v12  ;;  %v7458_v33 = vpack.c.bf16 %v5618_v55, %v5617_v3  ;;  %v10038_v12 = vld [vmem:[#allocation10 + $0x1c0] sm:$0xff]   ;;  %v10061_v55 = vld [vmem:[#allocation10 + $0x178] sm:$0xff]  }
 0x632   : > { %8923 = vmatmul.mubr.bf16.vlgmr.msra.gmra.mrb[32].mxu0 %v7455_v7  ;;  %9095 = vmatmul.mubr.bf16.vlgmr.msra.gmra.mrb[64].mxu1 %v7476_v31  ;;  %v10050_v7 = vld [vmem:[#allocation10 + $0xa0] sm:$0xff]   ;;  %v10053_v31 = vld [vmem:[#allocation10 + $0xb8] sm:$0xff]  }
 0x633   : > { %8931 = vmatpush3.bf16.msra.mxu0 %v10014_v49  ;;  %8926 = vmatprep.mubr.bf16.mxu0 %v7456_v57  ;;  %v10036_v49 = vld [vmem:[#allocation10 + $0x130] sm:$0xff]  }
 0x634   : > { %8932 = vmatprep.subr.bf16.mxu0 %v10015_v42  ;;  %v6557_v57 = vld [vmem:[#allocation2 + $0xa9] sm:$0xff] }
 0x637   : > { %8933 = vmatpush3.bf16.msra.mxu0 %v10015_v42  ;;  %v6555_v42 = vld [vmem:[#allocation2 + $0x69] sm:$0xff] }
 0x638   : > { %8934 = vmatprep.subr.bf16.mxu0 %v10016_v10 }
 0x63a   : > { %8927 = vmatmul.mubr.bf16.gmra.mrb[36].mxu0 %v7457_v29  ;;  %v6556_v29 = vld [vmem:[#allocation2 + $0x89] sm:$0xff] }
 0x63b   : > { %8935 = vmatpush3.bf16.msra.mxu0 %v10016_v10  ;;  %8946 = vmatprep.mubr.bf16.mxu0 %v11324_v4  ;;  %v10024_v4 = vld [vmem:[#allocation10 + $0x50] sm:$0xff]  }
 0x63c   : > { %8936 = vmatprep.subr.bf16.mxu0 %v10017_v60  ;;  %v6554_v10 = vld [vmem:[#allocation2 + $0x49] sm:$0xff] }
 0x63d   : > { %v7469_v3 = vpack.c.bf16 %v6555_v42, %v6554_v10 }
 0x63f   : > { %8937 = vmatpush3.bf16.msra.mxu0 %v10017_v60  ;;  %v10055_v60 = vld [vmem:[#allocation10 + $0x148] sm:$0xff]  }
 0x640   : > { %8938 = vmatprep.subr.bf16.mxu0 %v10018_v54 }
 0x643   : > { %8939 = vmatpush3.bf16.msra.mxu0 %v10018_v54  ;;  %v7470_v54 = vpack.c.bf16 %v6557_v57, %v6556_v29 }
 0x644   : > { %8940 = vmatprep.subr.bf16.mxu0 %v10019_v63 }
 0x647   : > { %8941 = vmatpush3.bf16.msra.mxu0 %v10019_v63  ;;  %v10056_v63 = vld [vmem:[#allocation10 + $0x150] sm:$0xff]  }
 0x648   : > { %8942 = vmatprep.subr.bf16.mxu0 %v10020_v34 }
 0x64b   : > { %8943 = vmatpush3.bf16.msra.mxu0 %v10020_v34  ;;  %v10057_v34 = vld [vmem:[#allocation10 + $0x158] sm:$0xff]  }
 0x64c   : > { %8944 = vmatprep.subr.bf16.mxu0 %v10021_v14 }
 0x64f   : > { %8945 = vmatpush3.bf16.msra.mxu0 %v10021_v14  ;;  %v7472_v14 = vpack.c.bf16 %v6554_v10, %v6553_v51 }
 0x650   : > { %8954 = vmatprep.subr.bf16.mxu0 %v10022_v62 }
 0x652   : > { %8947 = vmatmul.mubr.bf16.vlgmr.msra.gmra.mrb[32].mxu0 %v11354_v1  ;;  %v10027_v1 = vld [vmem:[#allocation10 + $0x68] sm:$0xff]  }
 0x653   : > { %8950 = vmatprep.mubr.bf16.mxu0 %v7453_v38  ;;  %8955 = vmatpush3.bf16.msra.mxu0 %v10022_v62  ;;  %v10039_v38 = vld [vmem:[#allocation10 + $0x1c8] sm:$0xff]   ;;  %v10058_v62 = vld [vmem:[#allocation10 + $0x160] sm:$0xff]  }
 0x654   : > { %8956 = vmatprep.subr.bf16.mxu0 %v10023_v28 }
 0x657   : > { %8957 = vmatpush3.bf16.msra.mxu0 %v10023_v28  ;;  %v10059_v28 = vld [vmem:[#allocation10 + $0x168] sm:$0xff]  }
 0x658   : > { %8958 = vmatprep.subr.bf16.mxu0 %v10024_v4 }
 0x65a   : > { %8951 = vmatmul.mubr.bf16.gmra.mrb[36].mxu0 %v7458_v33  ;;  %v7473_v33 = vpack.c.bf16 %v6556_v29, %v6555_v42 }
 0x65b   : > { %8959 = vmatpush3.bf16.msra.mxu0 %v10024_v4  ;;  %8970 = vmatprep.mubr.bf16.mxu0 %v7459_v2  ;;  %v10060_v4 = vld [vmem:[#allocation10 + $0x170] sm:$0xff]  }
 0x65c   : > { %8960 = vmatprep.subr.bf16.mxu0 %v10025_v16 }
 0x65f   : > { %8961 = vmatpush3.bf16.msra.mxu0 %v10025_v16 }
 0x660   : > { %8962 = vmatprep.subr.bf16.mxu0 %v10026_v52 }
 0x663   : > { %8963 = vmatpush3.bf16.msra.mxu0 %v10026_v52 }
 0x664   : > { %8964 = vmatprep.subr.bf16.mxu0 %v10027_v1 }
 0x667   : > { %8965 = vmatpush3.bf16.msra.mxu0 %v10027_v1 }
 0x668   : > { %8966 = vmatprep.subr.bf16.mxu0 %v10028_v18 }
 0x66b   : > { %8967 = vmatpush3.bf16.msra.mxu0 %v10028_v18 }
 0x66c   : > { %8968 = vmatprep.subr.bf16.mxu0 %v10029_v39 }
 0x66f   : > { %8969 = vmatpush3.bf16.msra.mxu0 %v10029_v39 }
 0x670   : > { %8978 = vmatprep.subr.bf16.mxu0 %v10030_v53 }
 0x672   : > { %8971 = vmatmul.mubr.bf16.vlgmr.msra.gmra.mrb[32].mxu0 %v11309_v43 }
 0x673   : > { %8974 = vmatprep.mubr.bf16.mxu0 %v11339_v45  ;;  %8979 = vmatpush3.bf16.msra.mxu0 %v10030_v53 }
 0x674   : > { %8980 = vmatprep.subr.bf16.mxu0 %v10031_v47 }
 0x677   : > { %8981 = vmatpush3.bf16.msra.mxu0 %v10031_v47 }
 0x678   : > { %8982 = vmatprep.subr.bf16.mxu0 %v10032_v27 }
 0x67a   : > { %8975 = vmatmul.mubr.bf16.gmra.mrb[36].mxu0 %v11366_v48 }
 0x67b   : > { %8983 = vmatpush3.bf16.msra.mxu0 %v10032_v27  ;;  %8994 = vmatprep.mubr.bf16.mxu0 %v7463_v26  ;;  %v10042_v26 = vld [vmem:[#allocation10 + $0x1e0] sm:$0xff]  }
 0x67c   : > { %8984 = vmatprep.subr.bf16.mxu0 %v10033_v36 }
 0x67f   : > { %8985 = vmatpush3.bf16.msra.mxu0 %v10033_v36 }
 0x680   : > { %8986 = vmatprep.subr.bf16.mxu0 %v10034_v50 }
 0x683   : > { %8987 = vmatpush3.bf16.msra.mxu0 %v10034_v50 }
 0x684   : > { %8988 = vmatprep.subr.bf16.mxu0 %v10035_v13 }
 0x687   : > { %8989 = vmatpush3.bf16.msra.mxu0 %v10035_v13 }
 0x688   : > { %8990 = vmatprep.subr.bf16.mxu0 %v10036_v49 }
 0x68b   : > { %8991 = vmatpush3.bf16.msra.mxu0 %v10036_v49 }
 0x68c   : > { %8992 = vmatprep.subr.bf16.mxu0 %v10037_v19 }
 0x68f   : > { %8993 = vmatpush3.bf16.msra.mxu0 %v10037_v19 }
 0x690   : > { %9002 = vmatprep.subr.bf16.mxu0 %v10038_v12 }
 0x692   : > { %8995 = vmatmul.mubr.bf16.vlgmr.msra.gmra.mrb[32].mxu0 %v7464_v58  ;;  %v10045_v58 = vld [vmem:[#allocation10 + $0x1f8] sm:$0xff]  }
 0x693   : > { %8998 = vmatprep.mubr.bf16.mxu0 %v7465_v17  ;;  %9003 = vmatpush3.bf16.msra.mxu0 %v10038_v12  ;;  %v6552_v17 = vld [vmem:[#allocation2 + $0x9] sm:$0xff] }
 0x694   : > { %9004 = vmatprep.subr.bf16.mxu0 %v10039_v38  ;;  %v7468_v21 = vpack.c.bf16 %v6553_v51, %v6552_v17 }
 0x697   : > { %9005 = vmatpush3.bf16.msra.mxu0 %v10039_v38 }
 0x698   : > { %9006 = vmatprep.subr.bf16.mxu0 %v10040_v59 }
 0x69a   : > { %8999 = vmatmul.mubr.bf16.gmra.mrb[36].mxu0 %v7466_v22  ;;  %v7467_v22 = vpack.c.bf16 %v11394_v37, %v11368_v44  ;;  %v10054_v44 = vld [vmem:[#allocation10 + $0x140] sm:$0xff]  }
 0x69b   : > { %9007 = vmatpush3.bf16.msra.mxu0 %v10040_v59  ;;  %9018 = vmatprep.mubr.bf16.mxu0 %v11309_v43  ;;  %v10048_v43 = vld [vmem:[#allocation10 + $0x90] sm:$0xff]  }
 0x69c   : > { %9008 = vmatprep.subr.bf16.mxu0 %v10041_v46 }
 0x69f   : > { %9009 = vmatpush3.bf16.msra.mxu0 %v10041_v46 }
 0x6a0   : > { %9010 = vmatprep.subr.bf16.mxu0 %v10042_v26 }
 0x6a3   : > { %9011 = vmatpush3.bf16.msra.mxu0 %v10042_v26 }
 0x6a4   : > { %9012 = vmatprep.subr.bf16.mxu0 %v10043_v61 }
 0x6a7   : > { %9013 = vmatpush3.bf16.msra.mxu0 %v10043_v61 }
 0x6a8   : > { %9014 = vmatprep.subr.bf16.mxu0 %v10044_v25 }
 0x6ab   : > { %9015 = vmatpush3.bf16.msra.mxu0 %v10044_v25 }
 0x6ac   : > { %9016 = vmatprep.subr.bf16.mxu0 %v10045_v58 }
 0x6af   : > { %9017 = vmatpush3.bf16.msra.mxu0 %v10045_v58 }
 0x6b0   : > { %9026 = vmatprep.subr.bf16.mxu0 %v10046_v6 }
 0x6b2   : > { %9019 = vmatmul.mubr.bf16.vlgmr.msra.gmra.mrb[32].mxu0 %v11339_v45  ;;  %v10051_v45 = vld [vmem:[#allocation10 + $0xa8] sm:$0xff]  }
 0x6b3   : > { %9022 = vmatprep.mubr.bf16.mxu0 %v11366_v48  ;;  %9027 = vmatpush3.bf16.msra.mxu0 %v10046_v6  ;;  %v10052_v48 = vld [vmem:[#allocation10 + $0xb0] sm:$0xff]  }
 0x6b4   : > { %9028 = vmatprep.subr.bf16.mxu0 %v10047_v8 }
 0x6b7   : > { %9029 = vmatpush3.bf16.msra.mxu0 %v10047_v8 }
 0x6b8   : > { %9030 = vmatprep.subr.bf16.mxu0 %v10048_v43 }
 0x6ba   : > { %9023 = vmatmul.mubr.bf16.gmra.mrb[36].mxu0 %v7467_v22 }
 0x6bb   : > { %9031 = vmatpush3.bf16.msra.mxu0 %v10048_v43  ;;  %9042 = vmatprep.mubr.bf16.mxu0 %v7468_v21 }
 0x6bc   : > { %9032 = vmatprep.subr.bf16.mxu0 %v10049_v40 }
 0x6bf   : > { %9033 = vmatpush3.bf16.msra.mxu0 %v10049_v40 }
 0x6c0   : > { %9034 = vmatprep.subr.bf16.mxu0 %v10050_v7 }
 0x6c3   : > { %9035 = vmatpush3.bf16.msra.mxu0 %v10050_v7 }
 0x6c4   : > { %9036 = vmatprep.subr.bf16.mxu0 %v10051_v45 }
 0x6c7   : > { %9037 = vmatpush3.bf16.msra.mxu0 %v10051_v45 }
 0x6c8   : > { %9038 = vmatprep.subr.bf16.mxu0 %v10052_v48 }
 0x6cb   : > { %9039 = vmatpush3.bf16.msra.mxu0 %v10052_v48 }
 0x6cc   : > { %9040 = vmatprep.subr.bf16.mxu0 %v10053_v31 }
 0x6cf   : > { %9041 = vmatpush3.bf16.msra.mxu0 %v10053_v31 }
 0x6d0   : > { %9050 = vmatprep.subr.bf16.mxu0 %v10054_v44 }
 0x6d2   : > { %9043 = vmatmul.mubr.bf16.vlgmr.msra.gmra.mrb[32].mxu0 %v7469_v3 }
 0x6d3   : > { %9046 = vmatprep.mubr.bf16.mxu0 %v7470_v54  ;;  %9051 = vmatpush3.bf16.msra.mxu0 %v10054_v44 }
 0x6d4   : > { %9052 = vmatprep.subr.bf16.mxu0 %v10055_v60 }
 0x6d7   : > { %9053 = vmatpush3.bf16.msra.mxu0 %v10055_v60 }
 0x6d8   : > { %9054 = vmatprep.subr.bf16.mxu0 %v10056_v63 }
 0x6da   : > { %9047 = vmatmul.mubr.bf16.gmra.mrb[36].mxu0 %v11377_v5  ;;  %v7474_v5 = vpack.c.bf16 %v11370_v24, %v6557_v57 }
 0x6db   : > { %9055 = vmatpush3.bf16.msra.mxu0 %v10056_v63  ;;  %9066 = vmatprep.mubr.bf16.mxu0 %v7472_v14 }
 0x6dc   : > { %9056 = vmatprep.subr.bf16.mxu0 %v10057_v34 }
 0x6df   : > { %9057 = vmatpush3.bf16.msra.mxu0 %v10057_v34 }
 0x6e0   : > { %9058 = vmatprep.subr.bf16.mxu0 %v10058_v62 }
 0x6e3   : > { %9059 = vmatpush3.bf16.msra.mxu0 %v10058_v62 }
 0x6e4   : > { %9060 = vmatprep.subr.bf16.mxu0 %v10059_v28 }
 0x6e7   : > { %9061 = vmatpush3.bf16.msra.mxu0 %v10059_v28 }
 0x6e8   : > { %9062 = vmatprep.subr.bf16.mxu0 %v10060_v4 }
 0x6eb   : > { %9063 = vmatpush3.bf16.msra.mxu0 %v10060_v4 }
 0x6ec   : > { %9064 = vmatprep.subr.bf16.mxu0 %v10061_v55 }
 0x6ef   : > { %9065 = vmatpush3.bf16.msra.mxu0 %v10061_v55 }
 0x6f0   : > { %9074 = vmatprep.subr.bf16.mxu0 %v11237_v11 }
 0x6f2   : > { %9067 = vmatmul.mubr.bf16.vlgmr.msra.gmra.mrb[32].mxu0 %v7473_v33 }
 0x6f3   : > { %9070 = vmatprep.mubr.bf16.mxu0 %v7474_v5  ;;  %9075 = vmatpush3.bf16.msra.mxu0 %v11237_v11 }
 0x6f4   : > { %9076 = vmatprep.subr.bf16.mxu0 %v11242_v35 }
 0x6f7   : > { %9077 = vmatpush3.bf16.msra.mxu0 %v11242_v35 }
 0x6f8   : > { %9078 = vmatprep.subr.bf16.mxu0 %v11246_v15 }
 0x6fa   : > { %9071 = vmatmul.mubr.bf16.gmra.mrb[36].mxu0 %v7475_v23 }
 0x6fb   : > { %9079 = vmatpush3.bf16.msra.mxu0 %v11246_v15  ;;  %9090 = vmatprep.mubr.bf16.mxu0 %v7469_v3  ;;  %v7344_v15 = vld [vmem:[%s11499_s6] ss:$0 sm:$0xff] }
 0x6fc   : > { %9080 = vmatprep.subr.bf16.mxu0 %v11250_v41 }
 0x6ff   : > { %9081 = vmatpush3.bf16.msra.mxu0 %v11250_v41 }
 0x700   : > { %9082 = vmatprep.subr.bf16.mxu0 %v11254_v9 }
 0x703   : > { %9083 = vmatpush3.bf16.msra.mxu0 %v11254_v9 }
 0x704   : > { %9084 = vmatprep.subr.bf16.mxu0 %v11258_v56 }
 0x705   : > { %v9096_v11 = vpop.f32.mrb[64].mxu1 }
 0x706   : > { %v7001_v35 = vpop.f32.mrb[65].mxu1 }
 0x707   : > { %9085 = vmatpush3.bf16.msra.mxu0 %v11258_v56  ;;  %v9097_v24 = vpop.f32.mrb[66].mxu1 }
 0x708   : > { %v7004_v32 = vpop.f32.mrb[67].mxu1  ;;  %9086 = vmatprep.subr.bf16.mxu0 %v11262_v0 }
 0x70b   : > { %9087 = vmatpush3.bf16.msra.mxu0 %v11262_v0 }
 0x70c   : > { %9088 = vmatprep.subr.bf16.mxu0 %v11266_v30 }
 0x70f   : > { %9089 = vmatpush3.bf16.msra.mxu0 %v11266_v30 }
 0x712   : > { %9091 = vmatmul.mubr.bf16.vlgmr.msra.gmra.mrb[32].mxu0 %v7470_v54 }
 0x7cd   : > { %v9072_v41 = vpop.f32.mrb[36].mxu0 }
 0x7ce   : > { %v9214_v9 = vadd.f32 %v9072_v41, %v7344_v15  ;;  %v6859_v20 = vpop.f32.mrb[37].mxu0 }
 0x7cf   : > { %v9216_v56 = vadd.f32 %v7344_v15, %v6859_v20  ;;  %v9073_v23 = vpop.f32.mrb[38].mxu0 }
 0x7d0   : > { %v9215_v16 = vadd.f32 %v9214_v9, %v9096_v11  ;;  %v9218_v37 = vadd.f32 %v9073_v23, %v7344_v15  ;;  %v6862_v2 = vpop.f32.mrb[39].mxu0 }
 0x7d1   : > { %v9217_v52 = vadd.f32 %v9216_v56, %v7001_v35  ;;  %v9220_v0 = vadd.f32 %v7344_v15, %v6862_v2 }
 0x7d2   : > { %7030 = vst [vmem:[#allocation3 + $0x30] sm:$0xff] %v9215_v16  ;;  %v9219_v1 = vadd.f32 %v9218_v37, %v9097_v24 }
 0x7d3   : > { %7028 = vst [vmem:[#allocation3 + $0x20] sm:$0xff] %v9217_v52  ;;  %v9221_v30 = vadd.f32 %v9220_v0, %v7004_v32 }
 0x7d4   : > { %7031 = vst [vmem:[#allocation3 + $0x38] sm:$0xff] %v9219_v1 }
 0x7d5   : > { %7029 = vst [vmem:[#allocation3 + $0x28] sm:$0xff] %v9221_v30 }
 0x7db   : > { %v7038_v18 = vld [vmem:[#allocation3 + $0x30] ss:$2 sm:$0xff]  ;;  %v7042_v39 = vld [vmem:[#allocation3 + $0x31] ss:$2 sm:$0xff] }
 0x7dc   : > { %v7036_v53 = vld [vmem:[#allocation3 + $0x20] ss:$2 sm:$0xff]  ;;  %v7041_v47 = vld [vmem:[#allocation3 + $0x21] ss:$2 sm:$0xff]  ;;  %v7046_v27 = vmax.f32 %v7038_v18, %v7042_v39 }
 0x7dd   : > { %v7045_v36 = vmax.f32 %v7036_v53, %v7041_v47 }
 0x7de   : > { %v7054_v50 = vcombine.high %v7046_v27, %v7046_v27 }
 0x7df   : > { %v7053_v13 = vcombine.high %v7045_v36, %v7045_v36 }
 0x7e0   : > { %v7062_v49 = vmax.f32 %v7046_v27, %v7054_v50 }
 0x7e1   : > { %v7061_v19 = vmax.f32 %v7045_v36, %v7053_v13 }
 0x7e2   : > { %7066 = vst [vmem:[%s340_s29 + $0xc] sm:$0xf] %v7062_v49 }
 0x7e3   : > { %7065 = vst [vmem:[%s340_s29 + $0x8] sm:$0xf] %v7061_v19 }
 0x7e5   : > { %v9092_v12 = vpop.f32.mrb[32].mxu0 }
 0x7e6   : > { %v9210_v38 = vadd.f32 %v9092_v12, %v7344_v15  ;;  %v6985_v59 = vpop.f32.mrb[33].mxu0 }
 0x7e7   : > { %v9211_v46 = vadd.f32 %v7344_v15, %v6985_v59  ;;  %v9093_v26 = vpop.f32.mrb[34].mxu0 }
 0x7e8   : > { %7026 = vst [vmem:[#allocation3 + $0x10] sm:$0xff] %v9210_v38  ;;  %v9212_v61 = vadd.f32 %v9093_v26, %v7344_v15  ;;  %v6988_v25 = vpop.f32.mrb[35].mxu0 }
 0x7e9   : > { %7024 = vst [vmem:[#allocation3] sm:$0xff] %v9211_v46  ;;  %v9213_v58 = vadd.f32 %v7344_v15, %v6988_v25 }
 0x7ea   : > { %7027 = vst [vmem:[#allocation3 + $0x18] sm:$0xff] %v9212_v61 }
 0x7eb   : > { %7025 = vst [vmem:[#allocation3 + $0x8] sm:$0xff] %v9213_v58 }
 0x7f1   : > { %v7034_v6 = vld [vmem:[#allocation3 + $0x10] ss:$2 sm:$0xff]  ;;  %v7040_v8 = vld [vmem:[#allocation3 + $0x11] ss:$2 sm:$0xff] }
 0x7f2   : > { %v7032_v43 = vld [vmem:[#allocation3] ss:$2 sm:$0xff]  ;;  %v7039_v17 = vld [vmem:[#allocation3 + $0x1] ss:$2 sm:$0xff]  ;;  %v7044_v51 = vmax.f32 %v7034_v6, %v7040_v8 }
 0x7f3   : > { %v7043_v22 = vmax.f32 %v7032_v43, %v7039_v17 }
 0x7f4   : > { %v7052_v40 = vcombine.high %v7044_v51, %v7044_v51 }
 0x7f5   : > { %v7051_v21 = vcombine.high %v7043_v22, %v7043_v22 }
 0x7f6   : > { %v7060_v7 = vmax.f32 %v7044_v51, %v7052_v40 }
 0x7f7   : > { %v7059_v45 = vmax.f32 %v7043_v22, %v7051_v21 }
 0x7f8   : > { %7064 = vst [vmem:[%s340_s29 + $0x4] sm:$0xf] %v7060_v7 }
 0x7f9   : > { %7063 = vst [vmem:[%s340_s29] sm:$0xf] %v7059_v45 }
 0x7fa   : > { %10191 = shalt.err (!%p10188_p4)
}
 0x7fb   : > { %s10192_s10 = scalar_lea.hbm %s11447_s13, 256  ;;  %s10196_s15 = scalar_lea.hbm %s11500_s7, 512 }
 0x7fc   : > { %p10193_p9 = scmp.ne.s32.totalorder %s11447_s13, %s10192_s10  ;;  %p10197_p8 = scmp.lt.u32.totalorder %s11447_s13, %s11500_s7 }
 0x7fd   : > { %p10198_p13 = scmp.lt.u32.totalorder %s10196_s15, %s10192_s10  ;;  %p10200_p10 = scmp.lt.u32.totalorder %s10192_s10, %s11447_s13 }
 0x7fe   : > { %p10194_p0 = pnand %p10193_p9, %p10461_p5 }
 0x7ff   : > { %p10199_p6 = por %p10198_p13, %p10197_p8 }
 0x800   : > { %p10195_p11 = pneg %p10194_p0 }
 0x801   : > { %p10201_p3 = por %p10200_p10, %p10199_p6 }
 0x803   : > { %p10202_p7 = pnand %p10201_p3, %p10195_p11 }
 0x805   : > { %10205 = shalt.err (!%p10202_p7)
}
 0x806   : > { %s10265_s17 = smov 64   ;;  %s10266_s16 = smov 4  }
 0x807   : > { %9776 = dma.vmem_to_hbm [thread:$0]  (%p10461_p5), %s11449_s8, 256, %s11447_s13, %s7068_s20, %s10265_s17, %s10265_s17, %s10266_s16  }
 0x808 PF: > { %s11520_s30 = sld [smem:[#allocation17_spill]]  ;;  %s7096_s28 = sand.u32 1, %s10240_s24  }
 0x809   : > { %p11522_p1 = scmp.ge.s32.totalorder %s10252_s27, 2  ;;  %s7097_s9 = scalar_lea.sflag [#allocation6], %s7096_s28 }
 0x80e   : > { %p11521_p12 = scmp.ne.s32.totalorder %s11520_s30, 0 }
 0x810   : > { %p9793_p2 = pnand %p11522_p1, %p11521_p12 }
 0x812   : > { %10235 = dma.done.wait (!%p9793_p2), %s7097_s9, 256  }
 0x813   : > { %10237 = vsyncadd (!%p9793_p2), %s7097_s9, 4294967040  ;;  %p22_p4 = scmp.ge.s32.totalorder %s10447_s22, 4   ;;  %s11523_s24 = smov %s10244_s25 }
 0x814   : > { %s11524_s25 = smov %s10248_s26  ;;  %s11525_s26 = smov %s10457_s18 }
 0x815   : > { %s11526_s27 = smov %s10447_s22  ;;  %24 = sbr.rel (!%p22_p4) target bundleno = 7 (0x7), region = 166 }
 0x81c   :  { %7102 = vsyncpa [#allocation5], 1 }
 0x81d   :  { %7104 = vsyncpa [#allocation5 + $0x1], 1 }
 0x81e   :  { %7105 = vsyncpa [#allocation8], 1 }
 0x81f   :  { %7106 = vsyncpa [#allocation11], 1 }
 0x820   :  { %7107 = vsyncpa [#allocation6], 1 }
 0x821   :  { %7109 = vsyncpa [#allocation6 + $0x1], 1 }

</bundles_post_ra>
